<compile_context>
chip_gen: v7x
topology: tpu7x:2x2x1
jax: 0.10.0
libtpu: 0.0.40
codegen_flags: <defaults>
</compile_context>

<pallas_src>
import functools
import math

import jax
import jax.numpy as jnp
from jax import lax
from jax.experimental import pallas as pl
from jax.experimental.pallas import tpu as pltpu

_TM_EXTRA_DIM = 32
_TD_EXTRA_DIM = 64
_HEAD_SIZE_DIVISOR = 8

# Default GEMM tiles (128-aligned; small enough to double-buffer inside the
# 32 MiB scoped-VMEM default and v7x's 64 MiB physical VMEM).
_TM = 256
_TN = 256
_TK = 512
_FULL_N = 4096                     # keep the whole N axis resident up to this
_VMEM_LIMIT = 64 * 1024 * 1024     # explicit scoped-VMEM budget for big kernels


def _tile(dim, pref):
    """Largest divisor of `dim` that is <= pref (never silently the full dim
    unless dim <= pref)."""
    if dim <= pref:
        return dim
    t = pref
    while dim % t:
        t -= 1
    return t


# ---------------------------------------------------------------- activations
def _apply_act(y, act):
    if act == "none":
        return y
    if act == "tanh":
        return jnp.tanh(y)
    if act == "sigmoid":
        return jax.nn.sigmoid(y)
    if act == "relu_sq":
        r = jnp.maximum(y, 0.0)
        return r * r
    raise ValueError(f"unknown act {act}")


# ----------------------------------------------------- general fused GEMM
def _gemm_kernel(*refs, act, has_mix, has_gate, has_res):
    acc_ref = refs[-1]
    o_ref = refs[-2]
    if has_mix:
        h_ref, xx_ref, maa_ref = refs[0], refs[1], refs[2]
        idx = 3
    else:
        x_ref = refs[0]
        idx = 1
    w_ref = refs[idx]
    idx += 1
    g_ref = refs[idx] if has_gate else None
    if has_gate:
        idx += 1
    r_ref = refs[idx] if has_res else None

    kk = pl.program_id(2)

    @pl.when(kk == 0)
    def _():
        acc_ref[...] = jnp.zeros_like(acc_ref)

    if has_mix:
        xin = h_ref[...] + xx_ref[...] * maa_ref[...]
    else:
        xin = x_ref[...]
    acc_ref[...] += jnp.dot(xin.astype(w_ref.dtype), w_ref[...],
                            preferred_element_type=jnp.float32)

    @pl.when(kk == pl.num_programs(2) - 1)
    def _():
        y = _apply_act(acc_ref[...], act)
        if has_gate:
            y = y * g_ref[...].astype(jnp.float32)
        if has_res:
            y = y + r_ref[...]
        o_ref[...] = y.astype(o_ref.dtype)


def fused_gemm(w_t, *, x=None, h=None, xx=None, maa=None, act="none",
               gate=None, residual=None, out_dtype=jnp.float32,
               tm=_TM, tn=_TN, tk=_TK):
    """act((x or h+xx*maa) @ w_t) [* gate] [+ residual], tiled over M/N/K."""
    has_mix = x is None
    M, K = (h.shape if has_mix else x.shape)
    K2, N = w_t.shape
    assert K == K2
    tm, tk = _tile(M, tm), _tile(K, tk)
    # Keep the full N axis resident when it fits so h/xx are streamed only
    # once per K pass (avoids re-streaming A per N tile).
    tn = N if N <= _FULL_N else _tile(N, tn)
    grid = (M // tm, N // tn, K // tk)

    in_specs = []
    inputs = []
    if has_mix:
        in_specs += [pl.BlockSpec((tm, tk), lambda i, j, k: (i, k)),
                     pl.BlockSpec((tm, tk), lambda i, j, k: (i, k)),
                     pl.BlockSpec((1, tk), lambda i, j, k: (0, k))]
        inputs += [h, xx, maa.reshape(1, K)]
    else:
        in_specs += [pl.BlockSpec((tm, tk), lambda i, j, k: (i, k))]
        inputs += [x]
    in_specs += [pl.BlockSpec((tk, tn), lambda i, j, k: (k, j))]
    inputs += [w_t]
    if gate is not None:
        in_specs += [pl.BlockSpec((tm, tn), lambda i, j, k: (i, j))]
        inputs += [gate]
    if residual is not None:
        in_specs += [pl.BlockSpec((tm, tn), lambda i, j, k: (i, j))]
        inputs += [residual]

    kernel = functools.partial(_gemm_kernel, act=act, has_mix=has_mix,
                               has_gate=gate is not None,
                               has_res=residual is not None)
    return pl.pallas_call(
        kernel,
        grid=grid,
        in_specs=in_specs,
        out_specs=pl.BlockSpec((tm, tn), lambda i, j, k: (i, j)),
        out_shape=jax.ShapeDtypeStruct((M, N), out_dtype),
        scratch_shapes=[pltpu.VMEM((tm, tn), jnp.float32)],
        compiler_params=pltpu.CompilerParams(
            dimension_semantics=("parallel", "parallel", "arbitrary"),
            vmem_limit_bytes=_VMEM_LIMIT),
    )(*inputs)


# --------------------------------------------------------------- norm kernels
def _layernorm2_kernel(x_ref, w0_ref, b0_ref, w1_ref, b1_ref,
                       o0_ref, o1_ref, *, eps):
    x = x_ref[...]
    m = jnp.mean(x, axis=-1, keepdims=True)
    xc = x - m
    v = jnp.mean(xc * xc, axis=-1, keepdims=True)
    x0 = xc * lax.rsqrt(v + eps) * w0_ref[...] + b0_ref[...]
    o0_ref[...] = x0
    m1 = jnp.mean(x0, axis=-1, keepdims=True)
    x0c = x0 - m1
    v1 = jnp.mean(x0c * x0c, axis=-1, keepdims=True)
    o1_ref[...] = x0c * lax.rsqrt(v1 + eps) * w1_ref[...] + b1_ref[...]


def layernorm2(x2d, w0, b0, w1, b1, eps=1e-5, tm=_TM):
    """Fused ln0 then ln1(ln0(x)); returns both (one pass over x)."""
    M, D = x2d.shape
    tm = _tile(M, tm)
    return pl.pallas_call(
        functools.partial(_layernorm2_kernel, eps=eps),
        grid=(M // tm,),
        in_specs=[pl.BlockSpec((tm, D), lambda i: (i, 0))]
                 + [pl.BlockSpec((1, D), lambda i: (0, 0))] * 4,
        out_specs=(pl.BlockSpec((tm, D), lambda i: (i, 0)),
                   pl.BlockSpec((tm, D), lambda i: (i, 0))),
        out_shape=(jax.ShapeDtypeStruct((M, D), jnp.float32),
                   jax.ShapeDtypeStruct((M, D), jnp.float32)),
        compiler_params=pltpu.CompilerParams(dimension_semantics=("parallel",)),
    )(x2d, w0.reshape(1, D), b0.reshape(1, D), w1.reshape(1, D), b1.reshape(1, D))


def _layernorm_kernel(x_ref, w_ref, b_ref, o_ref, *, eps):
    x = x_ref[...]
    m = jnp.mean(x, axis=-1, keepdims=True)
    xc = x - m
    v = jnp.mean(xc * xc, axis=-1, keepdims=True)
    o_ref[...] = xc * lax.rsqrt(v + eps) * w_ref[...] + b_ref[...]


def layernorm(x2d, w, b, eps=1e-5, tm=_TM):
    M, D = x2d.shape
    tm = _tile(M, tm)
    return pl.pallas_call(
        functools.partial(_layernorm_kernel, eps=eps),
        grid=(M // tm,),
        in_specs=[pl.BlockSpec((tm, D), lambda i: (i, 0)),
                  pl.BlockSpec((1, D), lambda i: (0, 0)),
                  pl.BlockSpec((1, D), lambda i: (0, 0))],
        out_specs=pl.BlockSpec((tm, D), lambda i: (i, 0)),
        out_shape=jax.ShapeDtypeStruct((M, D), jnp.float32),
        compiler_params=pltpu.CompilerParams(dimension_semantics=("parallel",)),
    )(x2d, w.reshape(1, D), b.reshape(1, D))


# -------------------------------------------- TimeMix LoRA (mix + time-decay)
def _tmix_lora_kernel(h_ref, xx_ref, maa_x_ref, maa_w_ref, tdec_ref,
                      w1_ref, w2_ref, tdw1_ref, tdw2_ref,
                      m4_ref, wpre_ref):
    h = h_ref[...]
    xx = xx_ref[...]
    E = w2_ref.shape[1]
    xxx = h + xx * maa_x_ref[...]
    t = jnp.tanh(jnp.dot(xxx.astype(w1_ref.dtype), w1_ref[...],
                         preferred_element_type=jnp.float32))     # (tm, 5E)
    tw = t.astype(w2_ref.dtype)
    # w2 order: 0=w, 1=k, 2=v, 3=r, 4=g.  m4 output order: (k, v, r, g).
    for j in range(4):
        src = j + 1
        m4_ref[j] = jnp.dot(tw[:, src * E:(src + 1) * E], w2_ref[src],
                            preferred_element_type=jnp.float32
                            ).astype(m4_ref.dtype)
    mw = jnp.dot(tw[:, 0:E], w2_ref[0], preferred_element_type=jnp.float32)
    xw = h + xx * (maa_w_ref[...] + mw)
    t2 = jnp.tanh(jnp.dot(xw.astype(tdw1_ref.dtype), tdw1_ref[...],
                          preferred_element_type=jnp.float32))
    wpre_ref[...] = tdec_ref[...] + jnp.dot(t2.astype(tdw2_ref.dtype),
                                            tdw2_ref[...],
                                            preferred_element_type=jnp.float32)


def tmix_lora(h, xx, maa_x, maa_w, time_decay, w1, w2, tdw1, tdw2,
              out_dtype=jnp.float32, tm=_TM):
    M, D = h.shape
    E5 = w1.shape[1]
    E = E5 // 5
    Dtd = tdw1.shape[1]
    tm = _tile(M, tm)
    return pl.pallas_call(
        _tmix_lora_kernel,
        grid=(M // tm,),
        in_specs=[
            pl.BlockSpec((tm, D), lambda i: (i, 0)),
            pl.BlockSpec((tm, D), lambda i: (i, 0)),
            pl.BlockSpec((1, D), lambda i: (0, 0)),
            pl.BlockSpec((1, D), lambda i: (0, 0)),
            pl.BlockSpec((1, D), lambda i: (0, 0)),
            pl.BlockSpec((D, E5), lambda i: (0, 0)),
            pl.BlockSpec((5, E, D), lambda i: (0, 0, 0)),
            pl.BlockSpec((D, Dtd), lambda i: (0, 0)),
            pl.BlockSpec((Dtd, D), lambda i: (0, 0)),
        ],
        out_specs=(pl.BlockSpec((4, tm, D), lambda i: (0, i, 0)),
                   pl.BlockSpec((tm, D), lambda i: (i, 0))),
        out_shape=(jax.ShapeDtypeStruct((4, M, D), out_dtype),     # bf16-able
                   jax.ShapeDtypeStruct((M, D), jnp.float32)),     # w_pre f32
        compiler_params=pltpu.CompilerParams(
            dimension_semantics=("parallel",),
            vmem_limit_bytes=_VMEM_LIMIT),
    )(h, xx, maa_x.reshape(1, D), maa_w.reshape(1, D), time_decay.reshape(1, D),
      w1, w2, tdw1, tdw2)


# ------------------- fused mix + r/k/v/g projections (K-tiled DxD weights)
def _mix_proj4_kernel(h_ref, xx_ref, maa4_ref, m4_ref, w4_ref, o_ref, acc_ref):
    kk = pl.program_id(2)

    @pl.when(kk == 0)
    def _():
        acc_ref[...] = jnp.zeros_like(acc_ref)

    mixed = h_ref[...] + xx_ref[...] * (maa4_ref[0]
                                        + m4_ref[0].astype(jnp.float32))
    acc_ref[...] += jnp.dot(mixed.astype(w4_ref.dtype), w4_ref[0],
                            preferred_element_type=jnp.float32)

    @pl.when(kk == pl.num_programs(2) - 1)
    def _():
        o_ref[0] = acc_ref[...].astype(o_ref.dtype)


def mix_proj4(h, xx, maa4, m4, w4, out_dtype=jnp.float32, tm=_TM, tk=_TK):
    M, D = h.shape
    N = w4.shape[2]
    tm, tk = _tile(M, tm), _tile(D, tk)
    return pl.pallas_call(
        _mix_proj4_kernel,
        grid=(4, M // tm, D // tk),
        in_specs=[
            pl.BlockSpec((tm, tk), lambda i, m, k: (m, k)),
            pl.BlockSpec((tm, tk), lambda i, m, k: (m, k)),
            pl.BlockSpec((1, 1, tk), lambda i, m, k: (i, 0, k)),
            pl.BlockSpec((1, tm, tk), lambda i, m, k: (i, m, k)),
            pl.BlockSpec((1, tk, N), lambda i, m, k: (i, k, 0)),
        ],
        out_specs=pl.BlockSpec((1, tm, N), lambda i, m, k: (i, m, 0)),
        out_shape=jax.ShapeDtypeStruct((4, M, N), out_dtype),
        scratch_shapes=[pltpu.VMEM((tm, N), jnp.float32)],
        compiler_params=pltpu.CompilerParams(
            dimension_semantics=("parallel", "parallel", "arbitrary"),
            vmem_limit_bytes=_VMEM_LIMIT),
    )(h, xx, maa4, m4, w4)


# --------------- group-norm + SiLU gate + Wo + residual (fused, K-tiled Wo)
def _attn_out_kernel(y_ref, g_ref, res_ref, lnw_ref, lnb_ref, ind_ref,
                     indt_ref, wo_ref, o_ref, acc_ref, *, inv_group, eps):
    kk = pl.program_id(1)

    @pl.when(kk == 0)
    def _():
        acc_ref[...] = jnp.zeros_like(acc_ref)

    # Per-head group-norm on this k-tile (tile width is a multiple of d_head,
    # so every group lies entirely inside the tile).  Indicator matrices are
    # small host-built constants (hoisted out of the kernel).
    y = y_ref[...]
    ind = ind_ref[...]
    ind_t = indt_ref[...]
    mean_g = jnp.dot(y, ind, preferred_element_type=jnp.float32) * inv_group
    mean = jnp.dot(mean_g, ind_t, preferred_element_type=jnp.float32)
    yc = y - mean
    var_g = jnp.dot(yc * yc, ind, preferred_element_type=jnp.float32) * inv_group
    inv_std = jnp.dot(lax.rsqrt(var_g + eps), ind_t,
                      preferred_element_type=jnp.float32)
    yn = yc * inv_std * lnw_ref[...] + lnb_ref[...]
    g = g_ref[0].astype(jnp.float32)
    gated = yn * (g * jax.nn.sigmoid(g))
    acc_ref[...] += jnp.dot(gated.astype(wo_ref.dtype), wo_ref[...],
                            preferred_element_type=jnp.float32)

    @pl.when(kk == pl.num_programs(1) - 1)
    def _():
        o_ref[...] = (acc_ref[...] + res_ref[...]).astype(o_ref.dtype)


def attn_out(y2, kvrg, res, lnx_w, lnx_b, wo_t, *, d_head, eps,
             tm=_TM, tk_pref=_TK):
    M, D = y2.shape
    H = D // d_head
    tm = _tile(M, tm)
    tk = d_head * _tile(H, max(1, tk_pref // d_head))
    gt = tk // d_head
    ids = jnp.arange(tk, dtype=jnp.int32) // d_head
    ind = (ids[:, None] == jnp.arange(gt, dtype=jnp.int32)[None, :]
           ).astype(jnp.float32)
    ind_t = ind.T
    kernel = functools.partial(_attn_out_kernel, inv_group=1.0 / d_head,
                               eps=eps)
    return pl.pallas_call(
        kernel,
        grid=(M // tm, D // tk),
        in_specs=[
            pl.BlockSpec((tm, tk), lambda m, k: (m, k)),
            pl.BlockSpec((1, tm, tk), lambda m, k: (3, m, k)),    # g = kvrg[3]
            pl.BlockSpec((tm, D), lambda m, k: (m, 0)),
            pl.BlockSpec((1, tk), lambda m, k: (0, k)),
            pl.BlockSpec((1, tk), lambda m, k: (0, k)),
            pl.BlockSpec((tk, gt), lambda m, k: (0, 0)),
            pl.BlockSpec((gt, tk), lambda m, k: (0, 0)),
            pl.BlockSpec((tk, D), lambda m, k: (k, 0)),
        ],
        out_specs=pl.BlockSpec((tm, D), lambda m, k: (m, 0)),
        out_shape=jax.ShapeDtypeStruct((M, D), jnp.float32),
        scratch_shapes=[pltpu.VMEM((tm, D), jnp.float32)],
        compiler_params=pltpu.CompilerParams(
            dimension_semantics=("parallel", "arbitrary"),
            vmem_limit_bytes=_VMEM_LIMIT),
    )(y2, kvrg, res, lnx_w.reshape(1, D), lnx_b.reshape(1, D), ind, ind_t, wo_t)


# --------------------------------------------------- WKV6 chunked recurrence
def _wkv6_kernel(k_ref, v_ref, r_ref, wpre_ref, u_ref, y_ref, s_ref,
                 state_ref, *, T):
    ns = pl.program_id(1)
    S, H, K = wpre_ref.shape[1], wpre_ref.shape[2], wpre_ref.shape[3]
    C = S // T
    log_floor = math.log(0.005)

    @pl.when(ns == 0)
    def _():
        state_ref[...] = jnp.zeros_like(state_ref)

    u = u_ref[...].astype(jnp.float32)[:, None, :]            # (H, 1, K)
    row = lax.broadcasted_iota(jnp.int32, (T, T), 0)
    col = lax.broadcasted_iota(jnp.int32, (T, T), 1)
    incl = jnp.broadcast_to((row >= col).astype(jnp.float32), (H, T, T))
    strict = (row > col)[None]                                # (1, T, T)
    diag_m = (row == col).astype(jnp.float32)[None]           # (1, T, T)

    def chunk_body(c, carry):
        start = c * T
        if T % 8 == 0:
            start = pl.multiple_of(start, 8)
        # (T, H, K) chunk -> head-major (H, T, K); the head split stays inside
        # VMEM (no HBM-pass transpose).
        rm = jnp.transpose(r_ref[0, 0, pl.ds(start, T)].astype(jnp.float32),
                           (1, 0, 2))
        km = jnp.transpose(k_ref[0, 0, pl.ds(start, T)].astype(jnp.float32),
                           (1, 0, 2))
        vm = jnp.transpose(v_ref[0, 0, pl.ds(start, T)].astype(jnp.float32),
                           (1, 0, 2))
        wp = jnp.transpose(wpre_ref[0, pl.ds(start, T)], (1, 0, 2))

        # decay in log space: w = clamp(exp(-exp(w_pre)), 0.005)
        lw = jnp.maximum(-jnp.exp(wp), log_floor)             # (H, T, K) <= 0
        cum = jnp.einsum("hts,hsk->htk", incl, lw)            # incl. cumsum
        ex = cum - lw                                         # excl. cumsum
        off = ex[:, T // 2:T // 2 + 1, :]                     # centring offset
        total = cum[:, T - 1:T, :]                            # (H, 1, K)

        state = state_ref[...]                                # (H, K, K)
        # inter-chunk contribution from the carried state
        y = jnp.einsum("htk,hkv->htv", rm * jnp.exp(ex), state)
        # intra-chunk: strictly-lower decayed scores + diag(r.u.k)
        rr = rm * jnp.exp(ex - off)
        kk = km * jnp.exp(off - cum)
        a = jnp.einsum("htk,hsk->hts", rr, kk)
        diag = jnp.sum(rm * u * km, axis=-1)                  # (H, T)
        a = jnp.where(strict, a, 0.0) + diag_m * diag[:, :, None]
        y = y + jnp.einsum("hts,hsv->htv", a, vm)
        y_ref[0, pl.ds(start, T)] = jnp.transpose(y, (1, 0, 2)
                                                  ).astype(y_ref.dtype)

        # state <- exp(total) * state + (k * exp(total - cum))^T @ v
        kw = km * jnp.exp(total - cum)
        kv = jnp.einsum("htk,htv->hkv", kw, vm)
        state_ref[...] = jnp.exp(total)[:, 0, :, None] * state + kv
        return carry

    lax.fori_loop(0, C, chunk_body, 0)

    @pl.when(ns == pl.num_programs(1) - 1)
    def _():
        s_ref[0] = state_ref[...]


def _pick_chunk(L, pref):
    if L <= pref:
        return L
    t = pref
    while L % t != 0:
        t -= 1
    return t


def _pick_super(L, T, pref_tokens=256):
    n_chunks = L // T
    c = max(1, min(n_chunks, pref_tokens // T))
    while n_chunks % c:
        c -= 1
    return c * T


def wkv6(kvrg, w_pre, u, *, chunk_len=32, super_tokens=256):
    """kvrg: (4, B, L, H, K) with k, v, r at leading indices 0..2 (selected by
    BlockSpec, no XLA slice); w_pre: (B, L, H, K) f32; u: (H, K).
    Returns y (B, L, H, K) f32 and the final state (B, H, K, K) f32.

    chunk_len <= ~32 keeps the centred decay exponents inside f32 range even
    at the 0.005 decay floor (the PyTorch reference needs float64 above 24).
    """
    _, B, L, H, K = kvrg.shape
    T = _pick_chunk(L, min(chunk_len, 32))
    S = _pick_super(L, T, super_tokens)
    NS = L // S
    kernel = functools.partial(_wkv6_kernel, T=T)
    return pl.pallas_call(
        kernel,
        grid=(B, NS),
        in_specs=[
            pl.BlockSpec((1, 1, S, H, K), lambda b, n: (0, b, n, 0, 0)),  # k
            pl.BlockSpec((1, 1, S, H, K), lambda b, n: (1, b, n, 0, 0)),  # v
            pl.BlockSpec((1, 1, S, H, K), lambda b, n: (2, b, n, 0, 0)),  # r
            pl.BlockSpec((1, S, H, K), lambda b, n: (b, n, 0, 0)),        # w
            pl.BlockSpec((H, K), lambda b, n: (0, 0)),                    # u
        ],
        out_specs=(
            pl.BlockSpec((1, S, H, K), lambda b, n: (b, n, 0, 0)),
            pl.BlockSpec((1, H, K, K), lambda b, n: (b, 0, 0, 0)),
        ),
        out_shape=(jax.ShapeDtypeStruct((B, L, H, K), jnp.float32),
                   jax.ShapeDtypeStruct((B, H, K, K), jnp.float32)),
        scratch_shapes=[pltpu.VMEM((H, K, K), jnp.float32)],
        compiler_params=pltpu.CompilerParams(
            dimension_semantics=("parallel", "arbitrary"),
            vmem_limit_bytes=_VMEM_LIMIT),
    )(kvrg, kvrg, kvrg, w_pre, u)


# ----------------------------------------------------------- params / forward
def init_params(key, d_model, d_head, expand):
    H = d_model // d_head
    d_ffn = int(d_model * expand)
    keys = iter(jax.random.split(key, 64))

    def rnd(shape, scale=0.1):
        return jax.random.normal(next(keys), shape, dtype=jnp.float32) * scale

    def lin(out_f, in_f):
        return rnd((out_f, in_f), 1.0 / math.sqrt(in_f))

    return {
        "ln0_w": jnp.ones((d_model,), jnp.float32), "ln0_b": jnp.zeros((d_model,), jnp.float32),
        "ln1_w": jnp.ones((d_model,), jnp.float32), "ln1_b": jnp.zeros((d_model,), jnp.float32),
        "ln2_w": jnp.ones((d_model,), jnp.float32), "ln2_b": jnp.zeros((d_model,), jnp.float32),
        "att_maa_x": rnd((1, 1, d_model)), "att_maa_r": rnd((1, 1, d_model)),
        "att_maa_w": rnd((1, 1, d_model)), "att_maa_k": rnd((1, 1, d_model)),
        "att_maa_v": rnd((1, 1, d_model)), "att_maa_g": rnd((1, 1, d_model)),
        "att_maa_w1": rnd((d_model, _TM_EXTRA_DIM * 5)),
        "att_maa_w2": rnd((5, _TM_EXTRA_DIM, d_model)),
        "att_td_w1": rnd((d_model, _TD_EXTRA_DIM)),
        "att_td_w2": rnd((_TD_EXTRA_DIM, d_model)),
        "att_time_decay": rnd((1, 1, d_model)),
        "att_time_faaaa": rnd((H, d_head)),
        "att_Wr": lin(d_model, d_model), "att_Wk": lin(d_model, d_model),
        "att_Wv": lin(d_model, d_model), "att_Wo": lin(d_model, d_model),
        "att_Wg": lin(d_model, d_model),
        "att_lnx_w": jnp.ones((d_model,), jnp.float32),
        "att_lnx_b": jnp.zeros((d_model,), jnp.float32),
        "ffn_maa_k": rnd((1, 1, d_model)), "ffn_maa_r": rnd((1, 1, d_model)),
        "ffn_Wk": lin(d_ffn, d_model), "ffn_Wr": lin(d_model, d_model),
        "ffn_Wv": lin(d_model, d_ffn),
    }


def prepare_params(p, compute_dtype=jnp.bfloat16):
    """One-time weight prep: transpose, stack, cast matmul weights."""
    cd = compute_dtype
    D = p["att_Wr"].shape[0]
    return {
        "ln0_w": p["ln0_w"], "ln0_b": p["ln0_b"],
        "ln1_w": p["ln1_w"], "ln1_b": p["ln1_b"],
        "ln2_w": p["ln2_w"], "ln2_b": p["ln2_b"],
        "att_maa_x": p["att_maa_x"], "att_maa_w": p["att_maa_w"],
        "att_time_decay": p["att_time_decay"],
        "maa_w1_c": p["att_maa_w1"].astype(cd),
        "maa_w2_c": p["att_maa_w2"].astype(cd),
        "td_w1_c": p["att_td_w1"].astype(cd),
        "td_w2_c": p["att_td_w2"].astype(cd),
        # projection order: k, v, r, g  (matches the LoRA-mix output order)
        "maa4": jnp.stack([p["att_maa_k"], p["att_maa_v"],
                           p["att_maa_r"], p["att_maa_g"]]).reshape(4, 1, D),
        "W4_t": jnp.stack([p["att_Wk"].T, p["att_Wv"].T,
                           p["att_Wr"].T, p["att_Wg"].T]).astype(cd),
        "att_time_faaaa": p["att_time_faaaa"],
        "att_lnx_w": p["att_lnx_w"], "att_lnx_b": p["att_lnx_b"],
        "Wo_t": p["att_Wo"].T.astype(cd),
        "ffn_maa_k": p["ffn_maa_k"], "ffn_maa_r": p["ffn_maa_r"],
        "ffn_Wk_t": p["ffn_Wk"].T.astype(cd),
        "ffn_Wv_t": p["ffn_Wv"].T.astype(cd),
        "ffn_Wr_t": p["ffn_Wr"].T.astype(cd),
    }


def _token_shift(x):
    # nn.ZeroPad2d((0,0,1,-1)) along the sequence axis
    return jnp.concatenate([jnp.zeros_like(x[:, :1]), x[:, :-1]], axis=1)


def block_forward(x, q, d_head, *, chunk_len=32):
    """Pallas implementation of Block.forward(x, state=None, need_state=True)."""
    B, L, D = x.shape
    H = D // d_head
    BL = B * L
    idt = q["W4_t"].dtype          # dtype for memory-bound intermediates

    # ln0 + ln1 fused (one pass over x)
    x0, h = layernorm2(x.reshape(BL, D), q["ln0_w"], q["ln0_b"],
                       q["ln1_w"], q["ln1_b"])
    h3 = h.reshape(B, L, D)
    xx = (_token_shift(h3) - h3).reshape(BL, D)

    # ----------------------- TimeMix ------------------------
    m4, w_pre = tmix_lora(h, xx, q["att_maa_x"], q["att_maa_w"],
                          q["att_time_decay"], q["maa_w1_c"], q["maa_w2_c"],
                          q["td_w1_c"], q["td_w2_c"], out_dtype=idt)
    kvrg = mix_proj4(h, xx, q["maa4"], m4, q["W4_t"], out_dtype=idt)  # k,v,r,g
    # Free reshapes into the (B, L, H, K) layout consumed by WKV (no XLA
    # transposes, heads are indexed inside the kernel / BlockSpecs).
    kvrg5 = kvrg.reshape(4, B, L, H, d_head)
    wp4 = w_pre.reshape(B, L, H, d_head)
    y, kv_state = wkv6(kvrg5, wp4, q["att_time_faaaa"], chunk_len=chunk_len)
    y2 = y.reshape(BL, D)                                   # free reshape
    eps_gn = 1e-5 * _HEAD_SIZE_DIVISOR ** 2
    x1 = attn_out(y2, kvrg, x0, q["att_lnx_w"], q["att_lnx_b"], q["Wo_t"],
                  d_head=d_head, eps=eps_gn)                # x0 + att_out
    tm_state = h3[:, -1]

    # ---------------------- ChannelMix ----------------------
    h2 = layernorm(x1, q["ln2_w"], q["ln2_b"])
    h2_3 = h2.reshape(B, L, D)
    xx2 = (_token_shift(h2_3) - h2_3).reshape(BL, D)
    k_act = fused_gemm(q["ffn_Wk_t"], h=h2, xx=xx2, maa=q["ffn_maa_k"],
                       act="relu_sq", out_dtype=idt)        # (BL, d_ffn)
    kv = fused_gemm(q["ffn_Wv_t"], x=k_act)                 # (BL, D) f32
    xout = fused_gemm(q["ffn_Wr_t"], h=h2, xx=xx2, maa=q["ffn_maa_r"],
                      act="sigmoid", gate=kv, residual=x1)  # x1 + ffn_out
    cm_state = h2_3[:, -1]

    return xout.reshape(B, L, D), ((tm_state, kv_state), cm_state)


# ----------------------------------------------------- pure-JAX reference
def ref_block(x, p, d_head):
    B, L, D = x.shape
    H = D // d_head

    def ln(v, w, b, eps=1e-5):
        m = v.mean(-1, keepdims=True)
        var = ((v - m) ** 2).mean(-1, keepdims=True)
        return (v - m) / jnp.sqrt(var + eps) * w + b

    x = ln(x, p["ln0_w"], p["ln0_b"])
    h = ln(x, p["ln1_w"], p["ln1_b"])
    xx = _token_shift(h) - h
    xxx = h + xx * p["att_maa_x"]
    t = jnp.tanh(xxx.reshape(B * L, D) @ p["att_maa_w1"])
    t = t.reshape(B * L, 5, _TM_EXTRA_DIM).transpose(1, 0, 2)
    m = jnp.einsum("nbk,nkd->nbd", t, p["att_maa_w2"]).reshape(5, B, L, D)
    mw, mk, mv, mr, mg = m
    xw = h + xx * (p["att_maa_w"] + mw)
    xr = h + xx * (p["att_maa_r"] + mr)
    xk = h + xx * (p["att_maa_k"] + mk)
    xv = h + xx * (p["att_maa_v"] + mv)
    xg = h + xx * (p["att_maa_g"] + mg)
    r = xr @ p["att_Wr"].T
    k = xk @ p["att_Wk"].T
    v = xv @ p["att_Wv"].T
    g = xg @ p["att_Wg"].T
    wpre = p["att_time_decay"] + jnp.tanh(xw @ p["att_td_w1"]) @ p["att_td_w2"]
    wdec = jnp.maximum(jnp.exp(-jnp.exp(wpre)), 0.005)

    def th(a):
        return a.reshape(B, L, H, d_head).transpose(0, 2, 1, 3)

    rb, kb, vb, wb = map(th, (r, k, v, wdec))
    u = p["att_time_faaaa"]
    state = jnp.zeros((B, H, d_head, d_head), jnp.float32)
    ys = []
    for tstep in range(L):
        kt, vt = kb[:, :, tstep, :], vb[:, :, tstep, :]
        rt, wt = rb[:, :, tstep, :], wb[:, :, tstep, :]
        kv = kt[..., :, None] * vt[..., None, :]
        ys.append(jnp.einsum("bhk,bhkv->bhv", rt, state + u[None, :, :, None] * kv))
        state = wt[..., :, None] * state + kv
    y = jnp.stack(ys, axis=2)
    kv_state = state
    y2 = y.transpose(0, 2, 1, 3).reshape(B * L, D)
    yg = y2.reshape(B * L, H, d_head)
    gm = yg.mean(-1, keepdims=True)
    gv = ((yg - gm) ** 2).mean(-1, keepdims=True)
    yn = (((yg - gm) / jnp.sqrt(gv + 1e-5 * _HEAD_SIZE_DIVISOR ** 2)).reshape(B * L, D)
          * p["att_lnx_w"] + p["att_lnx_b"]).reshape(B, L, D)
    att_out_ = (yn * (g * jax.nn.sigmoid(g))) @ p["att_Wo"].T
    tm_state = h[:, -1]
    x = x + att_out_

    h2 = ln(x, p["ln2_w"], p["ln2_b"])
    xx2 = _token_shift(h2) - h2
    xk2 = h2 + xx2 * p["ffn_maa_k"]
    xr2 = h2 + xx2 * p["ffn_maa_r"]
    kact = jnp.maximum(xk2 @ p["ffn_Wk"].T, 0.0) ** 2
    kv2 = kact @ p["ffn_Wv"].T
    ffn_out = jax.nn.sigmoid(xr2 @ p["ffn_Wr"].T) * kv2
    cm_state = h2[:, -1]
    x = x + ffn_out
    return x, ((tm_state, kv_state), cm_state)


if __name__ == "__main__":
    B, L, D, d_head = 2, 8, 32, 16          # n_head = 2, d_ffn = int(32*3.5) = 112
    key = jax.random.PRNGKey(0)
    kp, kx = jax.random.split(key)
    params = init_params(kp, D, d_head, expand=3.5)
    x = jax.random.normal(kx, (B, L, D), dtype=jnp.float32)

    ref_out, ((ref_tm, ref_kv), ref_cm) = ref_block(x, params, d_head)

    fwd = jax.jit(functools.partial(block_forward, d_head=d_head))

    # ---- f32 compute path: tight check against the pure-JAX reference ----
    q32 = prepare_params(params, jnp.float32)
    out, ((tm_state, kv_state), cm_state) = fwd(x, q32)
    jax.block_until_ready(out)
    assert jnp.allclose(out, ref_out, rtol=2e-2, atol=2e-2), "output mismatch (f32)"
    assert jnp.allclose(tm_state, ref_tm, rtol=2e-2, atol=2e-2), "tm_state mismatch"
    assert jnp.allclose(kv_state, ref_kv, rtol=2e-2, atol=2e-2), "kv_state mismatch"
    assert jnp.allclose(cm_state, ref_cm, rtol=2e-2, atol=2e-2), "cm_state mismatch"

    # ---- bf16 weights + bf16 intermediates (perf config): looser tolerance ----
    qbf = prepare_params(params, jnp.bfloat16)
    out_bf, ((tm_bf, kv_bf), cm_bf) = fwd(x, qbf)
    jax.block_until_ready(out_bf)
    assert jnp.allclose(out_bf, ref_out, rtol=2e-1, atol=2e-1), "output mismatch (bf16)"
    assert jnp.allclose(kv_bf, ref_kv, rtol=2e-1, atol=2e-1), "kv_state mismatch (bf16)"

    print("KERNEL_OK")
</pallas_src>

<mosaic_0001>
module attributes {stable_mosaic.version = 11 : i64} {
  func.func @_layernorm2_kernel(%arg0: i32, %arg1: memref<16x32xf32, #tpu.memory_space<vmem>>, %arg2: memref<1x32xf32, #tpu.memory_space<vmem>>, %arg3: memref<1x32xf32, #tpu.memory_space<vmem>>, %arg4: memref<1x32xf32, #tpu.memory_space<vmem>>, %arg5: memref<1x32xf32, #tpu.memory_space<vmem>>, %arg6: memref<16x32xf32, #tpu.memory_space<vmem>>, %arg7: memref<16x32xf32, #tpu.memory_space<vmem>>) attributes {dimension_semantics = [#tpu.dimension_semantics<parallel>], iteration_bounds = array<i64: 1>, scalar_prefetch = 0 : i64, scratch_operands = 0 : i64, tpu.core_type = #tpu.core_type<tc>, window_params = [{transform_indices = @transform_0, window_bounds = array<i64: 16, 32>}, {pipeline_mode = #tpu.pipeline_mode<synchronous>, transform_indices = @transform_1, window_bounds = array<i64: 1, 32>}, {pipeline_mode = #tpu.pipeline_mode<synchronous>, transform_indices = @transform_2, window_bounds = array<i64: 1, 32>}, {pipeline_mode = #tpu.pipeline_mode<synchronous>, transform_indices = @transform_3, window_bounds = array<i64: 1, 32>}, {pipeline_mode = #tpu.pipeline_mode<synchronous>, transform_indices = @transform_4, window_bounds = array<i64: 1, 32>}, {transform_indices = @transform_5, window_bounds = array<i64: 16, 32>}, {transform_indices = @transform_6, window_bounds = array<i64: 16, 32>}]} {
    %c0 = arith.constant 0 : index
    %c0_0 = arith.constant 0 : index
    %0 = vector.load %arg1[%c0, %c0_0] : memref<16x32xf32, #tpu.memory_space<vmem>>, vector<16x32xf32>
    %cst = arith.constant dense<0.000000e+00> : vector<16xf32>
    %1 = vector.multi_reduction <add>, %0, %cst [1] : vector<16x32xf32> to vector<16xf32>
    %2 = vector.shape_cast %1 : vector<16xf32> to vector<16x1xf32>
    %cst_1 = arith.constant 3.200000e+01 : f32
    %3 = vector.broadcast %cst_1 : f32 to vector<16x1xf32>
    %4 = arith.divf %2, %3 : vector<16x1xf32>
    %5 = vector.broadcast %4 : vector<16x1xf32> to vector<16x32xf32>
    %6 = arith.subf %0, %5 : vector<16x32xf32>
    %7 = arith.mulf %6, %6 : vector<16x32xf32>
    %cst_2 = arith.constant dense<0.000000e+00> : vector<16xf32>
    %8 = vector.multi_reduction <add>, %7, %cst_2 [1] : vector<16x32xf32> to vector<16xf32>
    %9 = vector.shape_cast %8 : vector<16xf32> to vector<16x1xf32>
    %cst_3 = arith.constant 3.200000e+01 : f32
    %10 = vector.broadcast %cst_3 : f32 to vector<16x1xf32>
    %11 = arith.divf %9, %10 : vector<16x1xf32>
    %cst_4 = arith.constant 9.99999974E-6 : f32
    %12 = vector.broadcast %cst_4 : f32 to vector<16x1xf32>
    %13 = arith.addf %11, %12 : vector<16x1xf32>
    %14 = math.rsqrt %13 : vector<16x1xf32>
    %15 = vector.broadcast %14 : vector<16x1xf32> to vector<16x32xf32>
    %16 = arith.mulf %6, %15 : vector<16x32xf32>
    %c0_5 = arith.constant 0 : index
    %c0_6 = arith.constant 0 : index
    %17 = vector.load %arg2[%c0_5, %c0_6] : memref<1x32xf32, #tpu.memory_space<vmem>>, vector<1x32xf32>
    %18 = vector.broadcast %17 : vector<1x32xf32> to vector<16x32xf32>
    %19 = arith.mulf %16, %18 : vector<16x32xf32>
    %c0_7 = arith.constant 0 : index
    %c0_8 = arith.constant 0 : index
    %20 = vector.load %arg3[%c0_7, %c0_8] : memref<1x32xf32, #tpu.memory_space<vmem>>, vector<1x32xf32>
    %21 = vector.broadcast %20 : vector<1x32xf32> to vector<16x32xf32>
    %22 = arith.addf %19, %21 : vector<16x32xf32>
    %c0_9 = arith.constant 0 : index
    %c0_10 = arith.constant 0 : index
    %23 = vector.load %arg6[%c0_9, %c0_10] : memref<16x32xf32, #tpu.memory_space<vmem>>, vector<16x32xf32>
    tpu.vector_store %arg6[%c0_9, %c0_10], %22 {strides = array<i32>} : memref<16x32xf32, #tpu.memory_space<vmem>>, vector<16x32xf32>,
    %cst_11 = arith.constant dense<0.000000e+00> : vector<16xf32>
    %24 = vector.multi_reduction <add>, %22, %cst_11 [1] : vector<16x32xf32> to vector<16xf32>
    %25 = vector.shape_cast %24 : vector<16xf32> to vector<16x1xf32>
    %cst_12 = arith.constant 3.200000e+01 : f32
    %26 = vector.broadcast %cst_12 : f32 to vector<16x1xf32>
    %27 = arith.divf %25, %26 : vector<16x1xf32>
    %28 = vector.broadcast %27 : vector<16x1xf32> to vector<16x32xf32>
    %29 = arith.subf %22, %28 : vector<16x32xf32>
    %30 = arith.mulf %29, %29 : vector<16x32xf32>
    %cst_13 = arith.constant dense<0.000000e+00> : vector<16xf32>
    %31 = vector.multi_reduction <add>, %30, %cst_13 [1] : vector<16x32xf32> to vector<16xf32>
    %32 = vector.shape_cast %31 : vector<16xf32> to vector<16x1xf32>
    %cst_14 = arith.constant 3.200000e+01 : f32
    %33 = vector.broadcast %cst_14 : f32 to vector<16x1xf32>
    %34 = arith.divf %32, %33 : vector<16x1xf32>
    %cst_15 = arith.constant 9.99999974E-6 : f32
    %35 = vector.broadcast %cst_15 : f32 to vector<16x1xf32>
    %36 = arith.addf %34, %35 : vector<16x1xf32>
    %37 = math.rsqrt %36 : vector<16x1xf32>
    %38 = vector.broadcast %37 : vector<16x1xf32> to vector<16x32xf32>
    %39 = arith.mulf %29, %38 : vector<16x32xf32>
    %c0_16 = arith.constant 0 : index
    %c0_17 = arith.constant 0 : index
    %40 = vector.load %arg4[%c0_16, %c0_17] : memref<1x32xf32, #tpu.memory_space<vmem>>, vector<1x32xf32>
    %41 = vector.broadcast %40 : vector<1x32xf32> to vector<16x32xf32>
    %42 = arith.mulf %39, %41 : vector<16x32xf32>
    %c0_18 = arith.constant 0 : index
    %c0_19 = arith.constant 0 : index
    %43 = vector.load %arg5[%c0_18, %c0_19] : memref<1x32xf32, #tpu.memory_space<vmem>>, vector<1x32xf32>
    %44 = vector.broadcast %43 : vector<1x32xf32> to vector<16x32xf32>
    %45 = arith.addf %42, %44 : vector<16x32xf32>
    %c0_20 = arith.constant 0 : index
    %c0_21 = arith.constant 0 : index
    %46 = vector.load %arg7[%c0_20, %c0_21] : memref<16x32xf32, #tpu.memory_space<vmem>>, vector<16x32xf32>
    tpu.vector_store %arg7[%c0_20, %c0_21], %45 {strides = array<i32>} : memref<16x32xf32, #tpu.memory_space<vmem>>, vector<16x32xf32>,
    return
  }
  func.func @transform_0(%arg0: i32) -> (i32, i32) {
    %c0_i32 = arith.constant 0 : i32
    %c0_i32_0 = arith.constant 0 : i32
    return %arg0, %c0_i32 : i32, i32
  }
  func.func @transform_1(%arg0: i32) -> (i32, i32) {
    %c0_i32 = arith.constant 0 : i32
    %c0_i32_0 = arith.constant 0 : i32
    %c0_i32_1 = arith.constant 0 : i32
    return %c0_i32, %c0_i32_0 : i32, i32
  }
  func.func @transform_2(%arg0: i32) -> (i32, i32) {
    %c0_i32 = arith.constant 0 : i32
    %c0_i32_0 = arith.constant 0 : i32
    %c0_i32_1 = arith.constant 0 : i32
    return %c0_i32, %c0_i32_0 : i32, i32
  }
  func.func @transform_3(%arg0: i32) -> (i32, i32) {
    %c0_i32 = arith.constant 0 : i32
    %c0_i32_0 = arith.constant 0 : i32
    %c0_i32_1 = arith.constant 0 : i32
    return %c0_i32, %c0_i32_0 : i32, i32
  }
  func.func @transform_4(%arg0: i32) -> (i32, i32) {
    %c0_i32 = arith.constant 0 : i32
    %c0_i32_0 = arith.constant 0 : i32
    %c0_i32_1 = arith.constant 0 : i32
    return %c0_i32, %c0_i32_0 : i32, i32
  }
  func.func @transform_5(%arg0: i32) -> (i32, i32) {
    %c0_i32 = arith.constant 0 : i32
    %c0_i32_0 = arith.constant 0 : i32
    return %arg0, %c0_i32 : i32, i32
  }
  func.func @transform_6(%arg0: i32) -> (i32, i32) {
    %c0_i32 = arith.constant 0 : i32
    %c0_i32_0 = arith.constant 0 : i32
    return %arg0, %c0_i32 : i32, i32
  }
}

module attributes {stable_mosaic.version = 11 : i64} {
  func.func @_tmix_lora_kernel(%arg0: i32, %arg1: memref<16x32xf32, #tpu.memory_space<vmem>>, %arg2: memref<16x32xf32, #tpu.memory_space<vmem>>, %arg3: memref<1x32xf32, #tpu.memory_space<vmem>>, %arg4: memref<1x32xf32, #tpu.memory_space<vmem>>, %arg5: memref<1x32xf32, #tpu.memory_space<vmem>>, %arg6: memref<32x160xf32, #tpu.memory_space<vmem>>, %arg7: memref<5x32x32xf32, #tpu.memory_space<vmem>>, %arg8: memref<32x64xf32, #tpu.memory_space<vmem>>, %arg9: memref<64x32xf32, #tpu.memory_space<vmem>>, %arg10: memref<4x16x32xf32, #tpu.memory_space<vmem>>, %arg11: memref<16x32xf32, #tpu.memory_space<vmem>>) attributes {dimension_semantics = [#tpu.dimension_semantics<parallel>], iteration_bounds = array<i64: 1>, scalar_prefetch = 0 : i64, scratch_operands = 0 : i64, tpu.core_type = #tpu.core_type<tc>, window_params = [{transform_indices = @transform_0, window_bounds = array<i64: 16, 32>}, {transform_indices = @transform_1, window_bounds = array<i64: 16, 32>}, {pipeline_mode = #tpu.pipeline_mode<synchronous>, transform_indices = @transform_2, window_bounds = array<i64: 1, 32>}, {pipeline_mode = #tpu.pipeline_mode<synchronous>, transform_indices = @transform_3, window_bounds = array<i64: 1, 32>}, {pipeline_mode = #tpu.pipeline_mode<synchronous>, transform_indices = @transform_4, window_bounds = array<i64: 1, 32>}, {pipeline_mode = #tpu.pipeline_mode<synchronous>, transform_indices = @transform_5, window_bounds = array<i64: 32, 160>}, {pipeline_mode = #tpu.pipeline_mode<synchronous>, transform_indices = @transform_6, window_bounds = array<i64: 5, 32, 32>}, {pipeline_mode = #tpu.pipeline_mode<synchronous>, transform_indices = @transform_7, window_bounds = array<i64: 32, 64>}, {pipeline_mode = #tpu.pipeline_mode<synchronous>, transform_indices = @transform_8, window_bounds = array<i64: 64, 32>}, {transform_indices = @transform_9, window_bounds = array<i64: 4, 16, 32>}, {transform_indices = @transform_10, window_bounds = array<i64: 16, 32>}]} {
    %c0 = arith.constant 0 : index
    %c0_0 = arith.constant 0 : index
    %0 = vector.load %arg1[%c0, %c0_0] : memref<16x32xf32, #tpu.memory_space<vmem>>, vector<16x32xf32>
    %c0_1 = arith.constant 0 : index
    %c0_2 = arith.constant 0 : index
    %1 = vector.load %arg2[%c0_1, %c0_2] : memref<16x32xf32, #tpu.memory_space<vmem>>, vector<16x32xf32>
    %c0_3 = arith.constant 0 : index
    %c0_4 = arith.constant 0 : index
    %2 = vector.load %arg3[%c0_3, %c0_4] : memref<1x32xf32, #tpu.memory_space<vmem>>, vector<1x32xf32>
    %3 = vector.broadcast %2 : vector<1x32xf32> to vector<16x32xf32>
    %4 = arith.mulf %1, %3 : vector<16x32xf32>
    %5 = arith.addf %0, %4 : vector<16x32xf32>
    %c0_5 = arith.constant 0 : index
    %c0_6 = arith.constant 0 : index
    %6 = vector.load %arg6[%c0_5, %c0_6] : memref<32x160xf32, #tpu.memory_space<vmem>>, vector<32x160xf32>
    %cst = arith.constant dense<0.000000e+00> : vector<16x160xf32>
    %7 = tpu.matmul %5, %6, %cst {dimension_numbers = #tpu.dot_dimension_numbers<[1], [0], [0], [1], [0, 0, 1, 1], [], []>} : vector<16x32xf32>, vector<32x160xf32>, vector<16x160xf32> -> vector<16x160xf32>
    %8 = math.tanh %7 : vector<16x160xf32>
    %9 = vector.extract_strided_slice %8 {offsets = [0, 32], sizes = [16, 32], strides = [1, 1]} : vector<16x160xf32> to vector<16x32xf32>
    %c1 = arith.constant 1 : index
    %c0_7 = arith.constant 0 : index
    %c0_8 = arith.constant 0 : index
    %10 = vector.load %arg7[%c1, %c0_7, %c0_8] : memref<5x32x32xf32, #tpu.memory_space<vmem>>, vector<1x32x32xf32>
    %11 = vector.shape_cast %10 : vector<1x32x32xf32> to vector<32x32xf32>
    %cst_9 = arith.constant dense<0.000000e+00> : vector<16x32xf32>
    %12 = tpu.matmul %9, %11, %cst_9 {dimension_numbers = #tpu.dot_dimension_numbers<[1], [0], [0], [1], [0, 0, 1, 1], [], []>} : vector<16x32xf32>, vector<32x32xf32>, vector<16x32xf32> -> vector<16x32xf32>
    %c0_10 = arith.constant 0 : index
    %c0_11 = arith.constant 0 : index
    %c0_12 = arith.constant 0 : index
    %13 = vector.load %arg10[%c0_10, %c0_11, %c0_12] : memref<4x16x32xf32, #tpu.memory_space<vmem>>, vector<1x16x32xf32>
    %14 = vector.shape_cast %13 : vector<1x16x32xf32> to vector<16x32xf32>
    %15 = vector.shape_cast %12 : vector<16x32xf32> to vector<1x16x32xf32>
    tpu.vector_store %arg10[%c0_10, %c0_11, %c0_12], %15 {strides = array<i32>} : memref<4x16x32xf32, #tpu.memory_space<vmem>>, vector<1x16x32xf32>,
    %16 = vector.extract_strided_slice %8 {offsets = [0, 64], sizes = [16, 32], strides = [1, 1]} : vector<16x160xf32> to vector<16x32xf32>
    %c2 = arith.constant 2 : index
    %c0_13 = arith.constant 0 : index
    %c0_14 = arith.constant 0 : index
    %17 = vector.load %arg7[%c2, %c0_13, %c0_14] : memref<5x32x32xf32, #tpu.memory_space<vmem>>, vector<1x32x32xf32>
    %18 = vector.shape_cast %17 : vector<1x32x32xf32> to vector<32x32xf32>
    %cst_15 = arith.constant dense<0.000000e+00> : vector<16x32xf32>
    %19 = tpu.matmul %16, %18, %cst_15 {dimension_numbers = #tpu.dot_dimension_numbers<[1], [0], [0], [1], [0, 0, 1, 1], [], []>} : vector<16x32xf32>, vector<32x32xf32>, vector<16x32xf32> -> vector<16x32xf32>
    %c1_16 = arith.constant 1 : index
    %c0_17 = arith.constant 0 : index
    %c0_18 = arith.constant 0 : index
    %20 = vector.load %arg10[%c1_16, %c0_17, %c0_18] : memref<4x16x32xf32, #tpu.memory_space<vmem>>, vector<1x16x32xf32>
    %21 = vector.shape_cast %20 : vector<1x16x32xf32> to vector<16x32xf32>
    %22 = vector.shape_cast %19 : vector<16x32xf32> to vector<1x16x32xf32>
    tpu.vector_store %arg10[%c1_16, %c0_17, %c0_18], %22 {strides = array<i32>} : memref<4x16x32xf32, #tpu.memory_space<vmem>>, vector<1x16x32xf32>,
    %23 = vector.extract_strided_slice %8 {offsets = [0, 96], sizes = [16, 32], strides = [1, 1]} : vector<16x160xf32> to vector<16x32xf32>
    %c3 = arith.constant 3 : index
    %c0_19 = arith.constant 0 : index
    %c0_20 = arith.constant 0 : index
    %24 = vector.load %arg7[%c3, %c0_19, %c0_20] : memref<5x32x32xf32, #tpu.memory_space<vmem>>, vector<1x32x32xf32>
    %25 = vector.shape_cast %24 : vector<1x32x32xf32> to vector<32x32xf32>
    %cst_21 = arith.constant dense<0.000000e+00> : vector<16x32xf32>
    %26 = tpu.matmul %23, %25, %cst_21 {dimension_numbers = #tpu.dot_dimension_numbers<[1], [0], [0], [1], [0, 0, 1, 1], [], []>} : vector<16x32xf32>, vector<32x32xf32>, vector<16x32xf32> -> vector<16x32xf32>
    %c2_22 = arith.constant 2 : index
    %c0_23 = arith.constant 0 : index
    %c0_24 = arith.constant 0 : index
    %27 = vector.load %arg10[%c2_22, %c0_23, %c0_24] : memref<4x16x32xf32, #tpu.memory_space<vmem>>, vector<1x16x32xf32>
    %28 = vector.shape_cast %27 : vector<1x16x32xf32> to vector<16x32xf32>
    %29 = vector.shape_cast %26 : vector<16x32xf32> to vector<1x16x32xf32>
    tpu.vector_store %arg10[%c2_22, %c0_23, %c0_24], %29 {strides = array<i32>} : memref<4x16x32xf32, #tpu.memory_space<vmem>>, vector<1x16x32xf32>,
    %30 = vector.extract_strided_slice %8 {offsets = [0, 128], sizes = [16, 32], strides = [1, 1]} : vector<16x160xf32> to vector<16x32xf32>
    %c4 = arith.constant 4 : index
    %c0_25 = arith.constant 0 : index
    %c0_26 = arith.constant 0 : index
    %31 = vector.load %arg7[%c4, %c0_25, %c0_26] : memref<5x32x32xf32, #tpu.memory_space<vmem>>, vector<1x32x32xf32>
    %32 = vector.shape_cast %31 : vector<1x32x32xf32> to vector<32x32xf32>
    %cst_27 = arith.constant dense<0.000000e+00> : vector<16x32xf32>
    %33 = tpu.matmul %30, %32, %cst_27 {dimension_numbers = #tpu.dot_dimension_numbers<[1], [0], [0], [1], [0, 0, 1, 1], [], []>} : vector<16x32xf32>, vector<32x32xf32>, vector<16x32xf32> -> vector<16x32xf32>
    %c3_28 = arith.constant 3 : index
    %c0_29 = arith.constant 0 : index
    %c0_30 = arith.constant 0 : index
    %34 = vector.load %arg10[%c3_28, %c0_29, %c0_30] : memref<4x16x32xf32, #tpu.memory_space<vmem>>, vector<1x16x32xf32>
    %35 = vector.shape_cast %34 : vector<1x16x32xf32> to vector<16x32xf32>
    %36 = vector.shape_cast %33 : vector<16x32xf32> to vector<1x16x32xf32>
    tpu.vector_store %arg10[%c3_28, %c0_29, %c0_30], %36 {strides = array<i32>} : memref<4x16x32xf32, #tpu.memory_space<vmem>>, vector<1x16x32xf32>,
    %37 = vector.extract_strided_slice %8 {offsets = [0, 0], sizes = [16, 32], strides = [1, 1]} : vector<16x160xf32> to vector<16x32xf32>
    %c0_31 = arith.constant 0 : index
    %c0_32 = arith.constant 0 : index
    %c0_33 = arith.constant 0 : index
    %38 = vector.load %arg7[%c0_31, %c0_32, %c0_33] : memref<5x32x32xf32, #tpu.memory_space<vmem>>, vector<1x32x32xf32>
    %39 = vector.shape_cast %38 : vector<1x32x32xf32> to vector<32x32xf32>
    %cst_34 = arith.constant dense<0.000000e+00> : vector<16x32xf32>
    %40 = tpu.matmul %37, %39, %cst_34 {dimension_numbers = #tpu.dot_dimension_numbers<[1], [0], [0], [1], [0, 0, 1, 1], [], []>} : vector<16x32xf32>, vector<32x32xf32>, vector<16x32xf32> -> vector<16x32xf32>
    %c0_35 = arith.constant 0 : index
    %c0_36 = arith.constant 0 : index
    %41 = vector.load %arg4[%c0_35, %c0_36] : memref<1x32xf32, #tpu.memory_space<vmem>>, vector<1x32xf32>
    %42 = vector.broadcast %41 : vector<1x32xf32> to vector<16x32xf32>
    %43 = arith.addf %42, %40 : vector<16x32xf32>
    %44 = arith.mulf %1, %43 : vector<16x32xf32>
    %45 = arith.addf %0, %44 : vector<16x32xf32>
    %c0_37 = arith.constant 0 : index
    %c0_38 = arith.constant 0 : index
    %46 = vector.load %arg8[%c0_37, %c0_38] : memref<32x64xf32, #tpu.memory_space<vmem>>, vector<32x64xf32>
    %cst_39 = arith.constant dense<0.000000e+00> : vector<16x64xf32>
    %47 = tpu.matmul %45, %46, %cst_39 {dimension_numbers = #tpu.dot_dimension_numbers<[1], [0], [0], [1], [0, 0, 1, 1], [], []>} : vector<16x32xf32>, vector<32x64xf32>, vector<16x64xf32> -> vector<16x64xf32>
    %48 = math.tanh %47 : vector<16x64xf32>
    %c0_40 = arith.constant 0 : index
    %c0_41 = arith.constant 0 : index
    %49 = vector.load %arg5[%c0_40, %c0_41] : memref<1x32xf32, #tpu.memory_space<vmem>>, vector<1x32xf32>
    %c0_42 = arith.constant 0 : index
    %c0_43 = arith.constant 0 : index
    %50 = vector.load %arg9[%c0_42, %c0_43] : memref<64x32xf32, #tpu.memory_space<vmem>>, vector<64x32xf32>
    %cst_44 = arith.constant dense<0.000000e+00> : vector<16x32xf32>
    %51 = tpu.matmul %48, %50, %cst_44 {dimension_numbers = #tpu.dot_dimension_numbers<[1], [0], [0], [1], [0, 0, 1, 1], [], []>} : vector<16x64xf32>, vector<64x32xf32>, vector<16x32xf32> -> vector<16x32xf32>
    %52 = vector.broadcast %49 : vector<1x32xf32> to vector<16x32xf32>
    %53 = arith.addf %52, %51 : vector<16x32xf32>
    %c0_45 = arith.constant 0 : index
    %c0_46 = arith.constant 0 : index
    %54 = vector.load %arg11[%c0_45, %c0_46] : memref<16x32xf32, #tpu.memory_space<vmem>>, vector<16x32xf32>
    tpu.vector_store %arg11[%c0_45, %c0_46], %53 {strides = array<i32>} : memref<16x32xf32, #tpu.memory_space<vmem>>, vector<16x32xf32>,
    return
  }
  func.func @transform_0(%arg0: i32) -> (i32, i32) {
    %c0_i32 = arith.constant 0 : i32
    %c0_i32_0 = arith.constant 0 : i32
    return %arg0, %c0_i32 : i32, i32
  }
  func.func @transform_1(%arg0: i32) -> (i32, i32) {
    %c0_i32 = arith.constant 0 : i32
    %c0_i32_0 = arith.constant 0 : i32
    return %arg0, %c0_i32 : i32, i32
  }
  func.func @transform_2(%arg0: i32) -> (i32, i32) {
    %c0_i32 = arith.constant 0 : i32
    %c0_i32_0 = arith.constant 0 : i32
    %c0_i32_1 = arith.constant 0 : i32
    return %c0_i32, %c0_i32_0 : i32, i32
  }
  func.func @transform_3(%arg0: i32) -> (i32, i32) {
    %c0_i32 = arith.constant 0 : i32
    %c0_i32_0 = arith.constant 0 : i32
    %c0_i32_1 = arith.constant 0 : i32
    return %c0_i32, %c0_i32_0 : i32, i32
  }
  func.func @transform_4(%arg0: i32) -> (i32, i32) {
    %c0_i32 = arith.constant 0 : i32
    %c0_i32_0 = arith.constant 0 : i32
    %c0_i32_1 = arith.constant 0 : i32
    return %c0_i32, %c0_i32_0 : i32, i32
  }
  func.func @transform_5(%arg0: i32) -> (i32, i32) {
    %c0_i32 = arith.constant 0 : i32
    %c0_i32_0 = arith.constant 0 : i32
    %c0_i32_1 = arith.constant 0 : i32
    return %c0_i32, %c0_i32_0 : i32, i32
  }
  func.func @transform_6(%arg0: i32) -> (i32, i32, i32) {
    %c0_i32 = arith.constant 0 : i32
    %c0_i32_0 = arith.constant 0 : i32
    %c0_i32_1 = arith.constant 0 : i32
    %c0_i32_2 = arith.constant 0 : i32
    return %c0_i32, %c0_i32_0, %c0_i32_1 : i32, i32, i32
  }
  func.func @transform_7(%arg0: i32) -> (i32, i32) {
    %c0_i32 = arith.constant 0 : i32
    %c0_i32_0 = arith.constant 0 : i32
    %c0_i32_1 = arith.constant 0 : i32
    return %c0_i32, %c0_i32_0 : i32, i32
  }
  func.func @transform_8(%arg0: i32) -> (i32, i32) {
    %c0_i32 = arith.constant 0 : i32
    %c0_i32_0 = arith.constant 0 : i32
    %c0_i32_1 = arith.constant 0 : i32
    return %c0_i32, %c0_i32_0 : i32, i32
  }
  func.func @transform_9(%arg0: i32) -> (i32, i32, i32) {
    %c0_i32 = arith.constant 0 : i32
    %c0_i32_0 = arith.constant 0 : i32
    %c0_i32_1 = arith.constant 0 : i32
    return %c0_i32, %arg0, %c0_i32_0 : i32, i32, i32
  }
  func.func @transform_10(%arg0: i32) -> (i32, i32) {
    %c0_i32 = arith.constant 0 : i32
    %c0_i32_0 = arith.constant 0 : i32
    return %arg0, %c0_i32 : i32, i32
  }
}

module attributes {stable_mosaic.version = 11 : i64} {
  func.func @_mix_proj4_kernel(%arg0: i32, %arg1: i32, %arg2: i32, %arg3: memref<16x32xf32, #tpu.memory_space<vmem>>, %arg4: memref<16x32xf32, #tpu.memory_space<vmem>>, %arg5: memref<1x1x32xf32, #tpu.memory_space<vmem>>, %arg6: memref<1x16x32xf32, #tpu.memory_space<vmem>>, %arg7: memref<1x32x32xf32, #tpu.memory_space<vmem>>, %arg8: memref<1x16x32xf32, #tpu.memory_space<vmem>>, %arg9: memref<16x32xf32, #tpu.memory_space<vmem>>) attributes {dimension_semantics = [#tpu.dimension_semantics<parallel>, #tpu.dimension_semantics<parallel>, #tpu.dimension_semantics<arbitrary>], iteration_bounds = array<i64: 4, 1, 1>, scalar_prefetch = 0 : i64, scratch_operands = 1 : i64, tpu.core_type = #tpu.core_type<tc>, window_params = [{transform_indices = @transform_0, window_bounds = array<i64: 16, 32>}, {transform_indices = @transform_1, window_bounds = array<i64: 16, 32>}, {transform_indices = @transform_2, window_bounds = array<i64: 1, 1, 32>}, {transform_indices = @transform_3, window_bounds = array<i64: 1, 16, 32>}, {transform_indices = @transform_4, window_bounds = array<i64: 1, 32, 32>}, {transform_indices = @transform_5, window_bounds = array<i64: 1, 16, 32>}]} {
    %c0_i32 = arith.constant 0 : i32
    %0 = arith.cmpi eq, %arg2, %c0_i32 : i32
    %1 = arith.extui %0 : i1 to i32
    %c0_i32_0 = arith.constant 0 : i32
    %2 = arith.cmpi ne, %1, %c0_i32_0 : i32
    scf.if %2 {
      %cst_19 = arith.constant 0.000000e+00 : f32
      %22 = vector.broadcast %cst_19 : f32 to vector<16x32xf32>
      %c0_20 = arith.constant 0 : index
      %c0_21 = arith.constant 0 : index
      %23 = vector.load %arg9[%c0_20, %c0_21] : memref<16x32xf32, #tpu.memory_space<vmem>>, vector<16x32xf32>
      tpu.vector_store %arg9[%c0_20, %c0_21], %22 {strides = array<i32>} : memref<16x32xf32, #tpu.memory_space<vmem>>, vector<16x32xf32>,
    } else {
    }
    %c0 = arith.constant 0 : index
    %c0_1 = arith.constant 0 : index
    %3 = vector.load %arg3[%c0, %c0_1] : memref<16x32xf32, #tpu.memory_space<vmem>>, vector<16x32xf32>
    %c0_2 = arith.constant 0 : index
    %c0_3 = arith.constant 0 : index
    %4 = vector.load %arg4[%c0_2, %c0_3] : memref<16x32xf32, #tpu.memory_space<vmem>>, vector<16x32xf32>
    %c0_4 = arith.constant 0 : index
    %c0_5 = arith.constant 0 : index
    %c0_6 = arith.constant 0 : index
    %5 = vector.load %arg5[%c0_4, %c0_5, %c0_6] : memref<1x1x32xf32, #tpu.memory_space<vmem>>, vector<1x1x32xf32>
    %6 = vector.shape_cast %5 : vector<1x1x32xf32> to vector<1x32xf32>
    %c0_7 = arith.constant 0 : index
    %c0_8 = arith.constant 0 : index
    %c0_9 = arith.constant 0 : index
    %7 = vector.load %arg6[%c0_7, %c0_8, %c0_9] : memref<1x16x32xf32, #tpu.memory_space<vmem>>, vector<1x16x32xf32>
    %8 = vector.shape_cast %7 : vector<1x16x32xf32> to vector<16x32xf32>
    %9 = vector.broadcast %6 : vector<1x32xf32> to vector<16x32xf32>
    %10 = arith.addf %9, %8 : vector<16x32xf32>
    %11 = arith.mulf %4, %10 : vector<16x32xf32>
    %12 = arith.addf %3, %11 : vector<16x32xf32>
    %c0_10 = arith.constant 0 : index
    %c0_11 = arith.constant 0 : index
    %13 = vector.load %arg9[%c0_10, %c0_11] : memref<16x32xf32, #tpu.memory_space<vmem>>, vector<16x32xf32>
    %c0_12 = arith.constant 0 : index
    %c0_13 = arith.constant 0 : index
    %c0_14 = arith.constant 0 : index
    %14 = vector.load %arg7[%c0_12, %c0_13, %c0_14] : memref<1x32x32xf32, #tpu.memory_space<vmem>>, vector<1x32x32xf32>
    %15 = vector.shape_cast %14 : vector<1x32x32xf32> to vector<32x32xf32>
    %cst = arith.constant dense<0.000000e+00> : vector<16x32xf32>
    %16 = tpu.matmul %12, %15, %cst {dimension_numbers = #tpu.dot_dimension_numbers<[1], [0], [0], [1], [0, 0, 1, 1], [], []>} : vector<16x32xf32>, vector<32x32xf32>, vector<16x32xf32> -> vector<16x32xf32>
    %17 = arith.addf %13, %16 : vector<16x32xf32>
    %c0_15 = arith.constant 0 : index
    %c0_16 = arith.constant 0 : index
    %18 = vector.load %arg9[%c0_15, %c0_16] : memref<16x32xf32, #tpu.memory_space<vmem>>, vector<16x32xf32>
    tpu.vector_store %arg9[%c0_15, %c0_16], %17 {strides = array<i32>} : memref<16x32xf32, #tpu.memory_space<vmem>>, vector<16x32xf32>,
    %c0_i32_17 = arith.constant 0 : i32
    %19 = arith.cmpi eq, %arg2, %c0_i32_17 : i32
    %20 = arith.extui %19 : i1 to i32
    %c0_i32_18 = arith.constant 0 : i32
    %21 = arith.cmpi ne, %20, %c0_i32_18 : i32
    scf.if %21 {
      %c0_19 = arith.constant 0 : index
      %c0_20 = arith.constant 0 : index
      %22 = vector.load %arg9[%c0_19, %c0_20] : memref<16x32xf32, #tpu.memory_space<vmem>>, vector<16x32xf32>
      %c0_21 = arith.constant 0 : index
      %c0_22 = arith.constant 0 : index
      %c0_23 = arith.constant 0 : index
      %23 = vector.load %arg8[%c0_21, %c0_22, %c0_23] : memref<1x16x32xf32, #tpu.memory_space<vmem>>, vector<1x16x32xf32>
      %24 = vector.shape_cast %23 : vector<1x16x32xf32> to vector<16x32xf32>
      %25 = vector.shape_cast %22 : vector<16x32xf32> to vector<1x16x32xf32>
      tpu.vector_store %arg8[%c0_21, %c0_22, %c0_23], %25 {strides = array<i32>} : memref<1x16x32xf32, #tpu.memory_space<vmem>>, vector<1x16x32xf32>,
    } else {
    }
    return
  }
  func.func @transform_0(%arg0: i32, %arg1: i32, %arg2: i32) -> (i32, i32) {
    %c0_i32 = arith.constant 0 : i32
    return %arg1, %arg2 : i32, i32
  }
  func.func @transform_1(%arg0: i32, %arg1: i32, %arg2: i32) -> (i32, i32) {
    %c0_i32 = arith.constant 0 : i32
    return %arg1, %arg2 : i32, i32
  }
  func.func @transform_2(%arg0: i32, %arg1: i32, %arg2: i32) -> (i32, i32, i32) {
    %c0_i32 = arith.constant 0 : i32
    %c0_i32_0 = arith.constant 0 : i32
    return %arg0, %c0_i32, %arg2 : i32, i32, i32
  }
  func.func @transform_3(%arg0: i32, %arg1: i32, %arg2: i32) -> (i32, i32, i32) {
    %c0_i32 = arith.constant 0 : i32
    return %arg0, %arg1, %arg2 : i32, i32, i32
  }
  func.func @transform_4(%arg0: i32, %arg1: i32, %arg2: i32) -> (i32, i32, i32) {
    %c0_i32 = arith.constant 0 : i32
    %c0_i32_0 = arith.constant 0 : i32
    return %arg0, %arg2, %c0_i32 : i32, i32, i32
  }
  func.func @transform_5(%arg0: i32, %arg1: i32, %arg2: i32) -> (i32, i32, i32) {
    %c0_i32 = arith.constant 0 : i32
    %c0_i32_0 = arith.constant 0 : i32
    return %arg0, %arg1, %c0_i32 : i32, i32, i32
  }
}

module attributes {stable_mosaic.version = 11 : i64} {
  func.func @_wkv6_kernel(%arg0: i32, %arg1: i32, %arg2: memref<1x1x8x2x16xf32, #tpu.memory_space<vmem>>, %arg3: memref<1x1x8x2x16xf32, #tpu.memory_space<vmem>>, %arg4: memref<1x1x8x2x16xf32, #tpu.memory_space<vmem>>, %arg5: memref<1x8x2x16xf32, #tpu.memory_space<vmem>>, %arg6: memref<2x16xf32, #tpu.memory_space<vmem>>, %arg7: memref<1x8x2x16xf32, #tpu.memory_space<vmem>>, %arg8: memref<1x2x16x16xf32, #tpu.memory_space<vmem>>, %arg9: memref<2x16x16xf32, #tpu.memory_space<vmem>>) attributes {dimension_semantics = [#tpu.dimension_semantics<parallel>, #tpu.dimension_semantics<arbitrary>], iteration_bounds = array<i64: 2, 1>, scalar_prefetch = 0 : i64, scratch_operands = 1 : i64, tpu.core_type = #tpu.core_type<tc>, window_params = [{transform_indices = @transform_0, window_bounds = array<i64: 1, 1, 8, 2, 16>}, {transform_indices = @transform_1, window_bounds = array<i64: 1, 1, 8, 2, 16>}, {transform_indices = @transform_2, window_bounds = array<i64: 1, 1, 8, 2, 16>}, {transform_indices = @transform_3, window_bounds = array<i64: 1, 8, 2, 16>}, {pipeline_mode = #tpu.pipeline_mode<synchronous>, transform_indices = @transform_4, window_bounds = array<i64: 2, 16>}, {transform_indices = @transform_5, window_bounds = array<i64: 1, 8, 2, 16>}, {transform_indices = @transform_6, window_bounds = array<i64: 1, 2, 16, 16>}]} {
    %c0_i32 = arith.constant 0 : i32
    %0 = arith.cmpi eq, %arg1, %c0_i32 : i32
    %1 = arith.extui %0 : i1 to i32
    %c0_i32_0 = arith.constant 0 : i32
    %2 = arith.cmpi ne, %1, %c0_i32_0 : i32
    scf.if %2 {
      %cst_37 = arith.constant 0.000000e+00 : f32
      %93 = vector.broadcast %cst_37 : f32 to vector<2x16x16xf32>
      %c0_38 = arith.constant 0 : index
      %c0_39 = arith.constant 0 : index
      %c0_40 = arith.constant 0 : index
      %94 = vector.load %arg9[%c0_38, %c0_39, %c0_40] : memref<2x16x16xf32, #tpu.memory_space<vmem>>, vector<2x16x16xf32>
      tpu.vector_store %arg9[%c0_38, %c0_39, %c0_40], %93 {strides = array<i32>} : memref<2x16x16xf32, #tpu.memory_space<vmem>>, vector<2x16x16xf32>,
    } else {
    }
    %c0 = arith.constant 0 : index
    %c0_1 = arith.constant 0 : index
    %3 = vector.load %arg6[%c0, %c0_1] : memref<2x16xf32, #tpu.memory_space<vmem>>, vector<2x16xf32>
    %4 = vector.shape_cast %3 : vector<2x16xf32> to vector<2x1x16xf32>
    %5 = tpu.iota {dimensions = array<i32: 0>} : vector<8x8xi32>
    %6 = tpu.iota {dimensions = array<i32: 1>} : vector<8x8xi32>
    %7 = arith.cmpi sge, %5, %6 : vector<8x8xi32>
    %8 = arith.extui %7 : vector<8x8xi1> to vector<8x8xi32>
    %9 = arith.sitofp %8 : vector<8x8xi32> to vector<8x8xf32>
    %10 = vector.shape_cast %9 : vector<8x8xf32> to vector<1x8x8xf32>
    %11 = vector.broadcast %10 : vector<1x8x8xf32> to vector<2x8x8xf32>
    %12 = arith.cmpi sgt, %5, %6 : vector<8x8xi32>
    %13 = vector.shape_cast %12 : vector<8x8xi1> to vector<1x8x8xi1>
    %14 = arith.cmpi eq, %5, %6 : vector<8x8xi32>
    %15 = arith.extui %14 : vector<8x8xi1> to vector<8x8xi32>
    %16 = arith.sitofp %15 : vector<8x8xi32> to vector<8x8xf32>
    %17 = vector.shape_cast %16 : vector<8x8xf32> to vector<1x8x8xf32>
    %c0_i32_2 = arith.constant 0 : i32
    %c8_i32 = arith.constant 8 : i32
    %18 = arith.muli %c0_i32_2, %c8_i32 : i32
    %19 = tpu.assume_multiple %18, 8 : i32
    %c0_3 = arith.constant 0 : index
    %c0_4 = arith.constant 0 : index
    %20 = arith.index_cast %19 : i32 to index
    %c0_5 = arith.constant 0 : index
    %c0_6 = arith.constant 0 : index
    %21 = vector.load %arg4[%c0_3, %c0_4, %20, %c0_5, %c0_6] : memref<1x1x8x2x16xf32, #tpu.memory_space<vmem>>, vector<1x1x8x2x16xf32>
    %22 = vector.shape_cast %21 : vector<1x1x8x2x16xf32> to vector<8x2x16xf32>
    %23 = tpu.transpose %22, [1, 0, 2] : vector<8x2x16xf32> -> vector<2x8x16xf32>
    %c0_7 = arith.constant 0 : index
    %c0_8 = arith.constant 0 : index
    %24 = arith.index_cast %19 : i32 to index
    %c0_9 = arith.constant 0 : index
    %c0_10 = arith.constant 0 : index
    %25 = vector.load %arg2[%c0_7, %c0_8, %24, %c0_9, %c0_10] : memref<1x1x8x2x16xf32, #tpu.memory_space<vmem>>, vector<1x1x8x2x16xf32>
    %26 = vector.shape_cast %25 : vector<1x1x8x2x16xf32> to vector<8x2x16xf32>
    %27 = tpu.transpose %26, [1, 0, 2] : vector<8x2x16xf32> -> vector<2x8x16xf32>
    %c0_11 = arith.constant 0 : index
    %c0_12 = arith.constant 0 : index
    %28 = arith.index_cast %19 : i32 to index
    %c0_13 = arith.constant 0 : index
    %c0_14 = arith.constant 0 : index
    %29 = vector.load %arg3[%c0_11, %c0_12, %28, %c0_13, %c0_14] : memref<1x1x8x2x16xf32, #tpu.memory_space<vmem>>, vector<1x1x8x2x16xf32>
    %30 = vector.shape_cast %29 : vector<1x1x8x2x16xf32> to vector<8x2x16xf32>
    %31 = tpu.transpose %30, [1, 0, 2] : vector<8x2x16xf32> -> vector<2x8x16xf32>
    %c0_15 = arith.constant 0 : index
    %32 = arith.index_cast %19 : i32 to index
    %c0_16 = arith.constant 0 : index
    %c0_17 = arith.constant 0 : index
    %33 = vector.load %arg5[%c0_15, %32, %c0_16, %c0_17] : memref<1x8x2x16xf32, #tpu.memory_space<vmem>>, vector<1x8x2x16xf32>
    %34 = vector.shape_cast %33 : vector<1x8x2x16xf32> to vector<8x2x16xf32>
    %35 = tpu.transpose %34, [1, 0, 2] : vector<8x2x16xf32> -> vector<2x8x16xf32>
    %36 = math.exp %35 : vector<2x8x16xf32>
    %cst = arith.constant 0.000000e+00 : f32
    %37 = vector.broadcast %cst : f32 to vector<2x8x16xf32>
    %38 = arith.subf %37, %36 : vector<2x8x16xf32>
    %cst_18 = arith.constant -5.29831743 : f32
    %39 = vector.broadcast %cst_18 : f32 to vector<2x8x16xf32>
    %40 = arith.maximumf %38, %39 : vector<2x8x16xf32>
    "tpu.trace_start"() <{level = 10 : i32, message = "hts,hsk->htk"}> : () -> ()
    %cst_19 = arith.constant dense<0.000000e+00> : vector<2x8x16xf32>
    %41 = tpu.matmul %11, %40, %cst_19 {dimension_numbers = #tpu.dot_dimension_numbers<[2], [1], [1], [2], [0, 0, 0, 1, 1, 2], [0], [0]>} : vector<2x8x8xf32>, vector<2x8x16xf32>, vector<2x8x16xf32> -> vector<2x8x16xf32>
    "tpu.trace_stop"() : () -> ()
    %42 = arith.subf %41, %40 : vector<2x8x16xf32>
    %43 = vector.extract_strided_slice %42 {offsets = [0, 4, 0], sizes = [2, 1, 16], strides = [1, 1, 1]} : vector<2x8x16xf32> to vector<2x1x16xf32>
    %44 = vector.extract_strided_slice %41 {offsets = [0, 7, 0], sizes = [2, 1, 16], strides = [1, 1, 1]} : vector<2x8x16xf32> to vector<2x1x16xf32>
    %c0_20 = arith.constant 0 : index
    %c0_21 = arith.constant 0 : index
    %c0_22 = arith.constant 0 : index
    %45 = vector.load %arg9[%c0_20, %c0_21, %c0_22] : memref<2x16x16xf32, #tpu.memory_space<vmem>>, vector<2x16x16xf32>
    %46 = math.exp %42 : vector<2x8x16xf32>
    %47 = arith.mulf %23, %46 : vector<2x8x16xf32>
    "tpu.trace_start"() <{level = 10 : i32, message = "htk,hkv->htv"}> : () -> ()
    %cst_23 = arith.constant dense<0.000000e+00> : vector<2x8x16xf32>
    %48 = tpu.matmul %47, %45, %cst_23 {dimension_numbers = #tpu.dot_dimension_numbers<[2], [1], [1], [2], [0, 0, 0, 1, 1, 2], [0], [0]>} : vector<2x8x16xf32>, vector<2x16x16xf32>, vector<2x8x16xf32> -> vector<2x8x16xf32>
    "tpu.trace_stop"() : () -> ()
    %49 = vector.broadcast %43 : vector<2x1x16xf32> to vector<2x8x16xf32>
    %50 = arith.subf %42, %49 : vector<2x8x16xf32>
    %51 = math.exp %50 : vector<2x8x16xf32>
    %52 = arith.mulf %23, %51 : vector<2x8x16xf32>
    %53 = vector.broadcast %43 : vector<2x1x16xf32> to vector<2x8x16xf32>
    %54 = arith.subf %53, %41 : vector<2x8x16xf32>
    %55 = math.exp %54 : vector<2x8x16xf32>
    %56 = arith.mulf %27, %55 : vector<2x8x16xf32>
    "tpu.trace_start"() <{level = 10 : i32, message = "htk,hsk->hts"}> : () -> ()
    %cst_24 = arith.constant dense<0.000000e+00> : vector<2x8x8xf32>
    %57 = tpu.matmul %52, %56, %cst_24 {dimension_numbers = #tpu.dot_dimension_numbers<[2], [2], [1], [1], [0, 0, 0, 1, 1, 1], [0], [0]>} : vector<2x8x16xf32>, vector<2x8x16xf32>, vector<2x8x8xf32> -> vector<2x8x8xf32>
    "tpu.trace_stop"() : () -> ()
    %58 = vector.broadcast %4 : vector<2x1x16xf32> to vector<2x8x16xf32>
    %59 = arith.mulf %23, %58 : vector<2x8x16xf32>
    %60 = arith.mulf %59, %27 : vector<2x8x16xf32>
    %cst_25 = arith.constant dense<0.000000e+00> : vector<2x8xf32>
    %61 = vector.multi_reduction <add>, %60, %cst_25 [2] : vector<2x8x16xf32> to vector<2x8xf32>
    %cst_26 = arith.constant 0.000000e+00 : f32
    %62 = vector.shape_cast %13 : vector<1x8x8xi1> to vector<1x8x8xi1>
    %63 = vector.broadcast %62 : vector<1x8x8xi1> to vector<2x8x8xi1>
    %64 = vector.broadcast %cst_26 : f32 to vector<2x8x8xf32>
    %65 = arith.select %63, %57, %64 : vector<2x8x8xi1>, vector<2x8x8xf32>
    %66 = vector.shape_cast %61 : vector<2x8xf32> to vector<2x8x1xf32>
    %67 = vector.broadcast %17 : vector<1x8x8xf32> to vector<2x8x8xf32>
    %68 = vector.broadcast %66 : vector<2x8x1xf32> to vector<2x8x8xf32>
    %69 = arith.mulf %67, %68 : vector<2x8x8xf32>
    %70 = arith.addf %65, %69 : vector<2x8x8xf32>
    "tpu.trace_start"() <{level = 10 : i32, message = "hts,hsv->htv"}> : () -> ()
    %cst_27 = arith.constant dense<0.000000e+00> : vector<2x8x16xf32>
    %71 = tpu.matmul %70, %31, %cst_27 {dimension_numbers = #tpu.dot_dimension_numbers<[2], [1], [1], [2], [0, 0, 0, 1, 1, 2], [0], [0]>} : vector<2x8x8xf32>, vector<2x8x16xf32>, vector<2x8x16xf32> -> vector<2x8x16xf32>
    "tpu.trace_stop"() : () -> ()
    %72 = arith.addf %48, %71 : vector<2x8x16xf32>
    %73 = tpu.transpose %72, [1, 0, 2] : vector<2x8x16xf32> -> vector<8x2x16xf32>
    %c0_28 = arith.constant 0 : index
    %74 = arith.index_cast %19 : i32 to index
    %c0_29 = arith.constant 0 : index
    %c0_30 = arith.constant 0 : index
    %75 = vector.load %arg7[%c0_28, %74, %c0_29, %c0_30] : memref<1x8x2x16xf32, #tpu.memory_space<vmem>>, vector<1x8x2x16xf32>
    %76 = vector.shape_cast %75 : vector<1x8x2x16xf32> to vector<8x2x16xf32>
    %77 = vector.shape_cast %73 : vector<8x2x16xf32> to vector<1x8x2x16xf32>
    tpu.vector_store %arg7[%c0_28, %74, %c0_29, %c0_30], %77 {strides = array<i32>} : memref<1x8x2x16xf32, #tpu.memory_space<vmem>>, vector<1x8x2x16xf32>,
    %78 = vector.broadcast %44 : vector<2x1x16xf32> to vector<2x8x16xf32>
    %79 = arith.subf %78, %41 : vector<2x8x16xf32>
    %80 = math.exp %79 : vector<2x8x16xf32>
    %81 = arith.mulf %27, %80 : vector<2x8x16xf32>
    "tpu.trace_start"() <{level = 10 : i32, message = "htk,htv->hkv"}> : () -> ()
    %cst_31 = arith.constant dense<0.000000e+00> : vector<2x16x16xf32>
    %82 = tpu.matmul %81, %31, %cst_31 {dimension_numbers = #tpu.dot_dimension_numbers<[1], [1], [2], [2], [0, 0, 0, 2, 1, 2], [0], [0]>} : vector<2x8x16xf32>, vector<2x8x16xf32>, vector<2x16x16xf32> -> vector<2x16x16xf32>
    "tpu.trace_stop"() : () -> ()
    %83 = math.exp %44 : vector<2x1x16xf32>
    %84 = vector.shape_cast %83 : vector<2x1x16xf32> to vector<2x16xf32>
    %85 = vector.shape_cast %84 : vector<2x16xf32> to vector<2x16x1xf32>
    %86 = vector.broadcast %85 : vector<2x16x1xf32> to vector<2x16x16xf32>
    %87 = arith.mulf %86, %45 : vector<2x16x16xf32>
    %88 = arith.addf %87, %82 : vector<2x16x16xf32>
    %c0_32 = arith.constant 0 : index
    %c0_33 = arith.constant 0 : index
    %c0_34 = arith.constant 0 : index
    %89 = vector.load %arg9[%c0_32, %c0_33, %c0_34] : memref<2x16x16xf32, #tpu.memory_space<vmem>>, vector<2x16x16xf32>
    tpu.vector_store %arg9[%c0_32, %c0_33, %c0_34], %88 {strides = array<i32>} : memref<2x16x16xf32, #tpu.memory_space<vmem>>, vector<2x16x16xf32>,
    %c1_i32 = arith.constant 1 : i32
    %c0_i32_35 = arith.constant 0 : i32
    %90 = arith.cmpi eq, %arg1, %c0_i32_35 : i32
    %91 = arith.extui %90 : i1 to i32
    %c0_i32_36 = arith.constant 0 : i32
    %92 = arith.cmpi ne, %91, %c0_i32_36 : i32
    scf.if %92 {
      %c0_37 = arith.constant 0 : index
      %c0_38 = arith.constant 0 : index
      %c0_39 = arith.constant 0 : index
      %93 = vector.load %arg9[%c0_37, %c0_38, %c0_39] : memref<2x16x16xf32, #tpu.memory_space<vmem>>, vector<2x16x16xf32>
      %c0_40 = arith.constant 0 : index
      %c0_41 = arith.constant 0 : index
      %c0_42 = arith.constant 0 : index
      %c0_43 = arith.constant 0 : index
      %94 = vector.load %arg8[%c0_40, %c0_41, %c0_42, %c0_43] : memref<1x2x16x16xf32, #tpu.memory_space<vmem>>, vector<1x2x16x16xf32>
      %95 = vector.shape_cast %94 : vector<1x2x16x16xf32> to vector<2x16x16xf32>
      %96 = vector.shape_cast %93 : vector<2x16x16xf32> to vector<1x2x16x16xf32>
      tpu.vector_store %arg8[%c0_40, %c0_41, %c0_42, %c0_43], %96 {strides = array<i32>} : memref<1x2x16x16xf32, #tpu.memory_space<vmem>>, vector<1x2x16x16xf32>,
    } else {
    }
    return
  }
  func.func @transform_0(%arg0: i32, %arg1: i32) -> (i32, i32, i32, i32, i32) {
    %c0_i32 = arith.constant 0 : i32
    %c0_i32_0 = arith.constant 0 : i32
    %c0_i32_1 = arith.constant 0 : i32
    %c0_i32_2 = arith.constant 0 : i32
    return %c0_i32, %arg0, %arg1, %c0_i32_0, %c0_i32_1 : i32, i32, i32, i32, i32
  }
  func.func @transform_1(%arg0: i32, %arg1: i32) -> (i32, i32, i32, i32, i32) {
    %c1_i32 = arith.constant 1 : i32
    %c0_i32 = arith.constant 0 : i32
    %c0_i32_0 = arith.constant 0 : i32
    %c0_i32_1 = arith.constant 0 : i32
    return %c1_i32, %arg0, %arg1, %c0_i32, %c0_i32_0 : i32, i32, i32, i32, i32
  }
  func.func @transform_2(%arg0: i32, %arg1: i32) -> (i32, i32, i32, i32, i32) {
    %c2_i32 = arith.constant 2 : i32
    %c0_i32 = arith.constant 0 : i32
    %c0_i32_0 = arith.constant 0 : i32
    %c0_i32_1 = arith.constant 0 : i32
    return %c2_i32, %arg0, %arg1, %c0_i32, %c0_i32_0 : i32, i32, i32, i32, i32
  }
  func.func @transform_3(%arg0: i32, %arg1: i32) -> (i32, i32, i32, i32) {
    %c0_i32 = arith.constant 0 : i32
    %c0_i32_0 = arith.constant 0 : i32
    %c0_i32_1 = arith.constant 0 : i32
    return %arg0, %arg1, %c0_i32, %c0_i32_0 : i32, i32, i32, i32
  }
  func.func @transform_4(%arg0: i32, %arg1: i32) -> (i32, i32) {
    %c0_i32 = arith.constant 0 : i32
    %c0_i32_0 = arith.constant 0 : i32
    %c0_i32_1 = arith.constant 0 : i32
    return %c0_i32, %c0_i32_0 : i32, i32
  }
  func.func @transform_5(%arg0: i32, %arg1: i32) -> (i32, i32, i32, i32) {
    %c0_i32 = arith.constant 0 : i32
    %c0_i32_0 = arith.constant 0 : i32
    %c0_i32_1 = arith.constant 0 : i32
    return %arg0, %arg1, %c0_i32, %c0_i32_0 : i32, i32, i32, i32
  }
  func.func @transform_6(%arg0: i32, %arg1: i32) -> (i32, i32, i32, i32) {
    %c0_i32 = arith.constant 0 : i32
    %c0_i32_0 = arith.constant 0 : i32
    %c0_i32_1 = arith.constant 0 : i32
    %c0_i32_2 = arith.constant 0 : i32
    return %arg0, %c0_i32, %c0_i32_0, %c0_i32_1 : i32, i32, i32, i32
  }
}

module attributes {stable_mosaic.version = 11 : i64} {
  func.func @_attn_out_kernel(%arg0: i32, %arg1: i32, %arg2: memref<16x32xf32, #tpu.memory_space<vmem>>, %arg3: memref<1x16x32xf32, #tpu.memory_space<vmem>>, %arg4: memref<16x32xf32, #tpu.memory_space<vmem>>, %arg5: memref<1x32xf32, #tpu.memory_space<vmem>>, %arg6: memref<1x32xf32, #tpu.memory_space<vmem>>, %arg7: memref<32x2xf32, #tpu.memory_space<vmem>>, %arg8: memref<2x32xf32, #tpu.memory_space<vmem>>, %arg9: memref<32x32xf32, #tpu.memory_space<vmem>>, %arg10: memref<16x32xf32, #tpu.memory_space<vmem>>, %arg11: memref<16x32xf32, #tpu.memory_space<vmem>>) attributes {dimension_semantics = [#tpu.dimension_semantics<parallel>, #tpu.dimension_semantics<arbitrary>], iteration_bounds = array<i64: 1, 1>, scalar_prefetch = 0 : i64, scratch_operands = 1 : i64, tpu.core_type = #tpu.core_type<tc>, window_params = [{transform_indices = @transform_0, window_bounds = array<i64: 16, 32>}, {transform_indices = @transform_1, window_bounds = array<i64: 1, 16, 32>}, {transform_indices = @transform_2, window_bounds = array<i64: 16, 32>}, {transform_indices = @transform_3, window_bounds = array<i64: 1, 32>}, {transform_indices = @transform_4, window_bounds = array<i64: 1, 32>}, {pipeline_mode = #tpu.pipeline_mode<synchronous>, transform_indices = @transform_5, window_bounds = array<i64: 32, 2>}, {pipeline_mode = #tpu.pipeline_mode<synchronous>, transform_indices = @transform_6, window_bounds = array<i64: 2, 32>}, {transform_indices = @transform_7, window_bounds = array<i64: 32, 32>}, {transform_indices = @transform_8, window_bounds = array<i64: 16, 32>}]} {
    %c0_i32 = arith.constant 0 : i32
    %0 = arith.cmpi eq, %arg1, %c0_i32 : i32
    %1 = arith.extui %0 : i1 to i32
    %c0_i32_0 = arith.constant 0 : i32
    %2 = arith.cmpi ne, %1, %c0_i32_0 : i32
    scf.if %2 {
      %cst_29 = arith.constant 0.000000e+00 : f32
      %43 = vector.broadcast %cst_29 : f32 to vector<16x32xf32>
      %c0_30 = arith.constant 0 : index
      %c0_31 = arith.constant 0 : index
      %44 = vector.load %arg11[%c0_30, %c0_31] : memref<16x32xf32, #tpu.memory_space<vmem>>, vector<16x32xf32>
      tpu.vector_store %arg11[%c0_30, %c0_31], %43 {strides = array<i32>} : memref<16x32xf32, #tpu.memory_space<vmem>>, vector<16x32xf32>,
    } else {
    }
    %c0 = arith.constant 0 : index
    %c0_1 = arith.constant 0 : index
    %3 = vector.load %arg2[%c0, %c0_1] : memref<16x32xf32, #tpu.memory_space<vmem>>, vector<16x32xf32>
    %c0_2 = arith.constant 0 : index
    %c0_3 = arith.constant 0 : index
    %4 = vector.load %arg7[%c0_2, %c0_3] : memref<32x2xf32, #tpu.memory_space<vmem>>, vector<32x2xf32>
    %c0_4 = arith.constant 0 : index
    %c0_5 = arith.constant 0 : index
    %5 = vector.load %arg8[%c0_4, %c0_5] : memref<2x32xf32, #tpu.memory_space<vmem>>, vector<2x32xf32>
    %cst = arith.constant dense<0.000000e+00> : vector<16x2xf32>
    %6 = tpu.matmul %3, %4, %cst {dimension_numbers = #tpu.dot_dimension_numbers<[1], [0], [0], [1], [0, 0, 1, 1], [], []>} : vector<16x32xf32>, vector<32x2xf32>, vector<16x2xf32> -> vector<16x2xf32>
    %cst_6 = arith.constant 6.250000e-02 : f32
    %7 = vector.broadcast %cst_6 : f32 to vector<16x2xf32>
    %8 = arith.mulf %6, %7 : vector<16x2xf32>
    %cst_7 = arith.constant dense<0.000000e+00> : vector<16x32xf32>
    %9 = tpu.matmul %8, %5, %cst_7 {dimension_numbers = #tpu.dot_dimension_numbers<[1], [0], [0], [1], [0, 0, 1, 1], [], []>} : vector<16x2xf32>, vector<2x32xf32>, vector<16x32xf32> -> vector<16x32xf32>
    %10 = arith.subf %3, %9 : vector<16x32xf32>
    %11 = arith.mulf %10, %10 : vector<16x32xf32>
    %cst_8 = arith.constant dense<0.000000e+00> : vector<16x2xf32>
    %12 = tpu.matmul %11, %4, %cst_8 {dimension_numbers = #tpu.dot_dimension_numbers<[1], [0], [0], [1], [0, 0, 1, 1], [], []>} : vector<16x32xf32>, vector<32x2xf32>, vector<16x2xf32> -> vector<16x2xf32>
    %cst_9 = arith.constant 6.250000e-02 : f32
    %13 = vector.broadcast %cst_9 : f32 to vector<16x2xf32>
    %14 = arith.mulf %12, %13 : vector<16x2xf32>
    %cst_10 = arith.constant 6.400000e-04 : f32
    %15 = vector.broadcast %cst_10 : f32 to vector<16x2xf32>
    %16 = arith.addf %14, %15 : vector<16x2xf32>
    %17 = math.rsqrt %16 : vector<16x2xf32>
    %cst_11 = arith.constant dense<0.000000e+00> : vector<16x32xf32>
    %18 = tpu.matmul %17, %5, %cst_11 {dimension_numbers = #tpu.dot_dimension_numbers<[1], [0], [0], [1], [0, 0, 1, 1], [], []>} : vector<16x2xf32>, vector<2x32xf32>, vector<16x32xf32> -> vector<16x32xf32>
    %19 = arith.mulf %10, %18 : vector<16x32xf32>
    %c0_12 = arith.constant 0 : index
    %c0_13 = arith.constant 0 : index
    %20 = vector.load %arg5[%c0_12, %c0_13] : memref<1x32xf32, #tpu.memory_space<vmem>>, vector<1x32xf32>
    %21 = vector.broadcast %20 : vector<1x32xf32> to vector<16x32xf32>
    %22 = arith.mulf %19, %21 : vector<16x32xf32>
    %c0_14 = arith.constant 0 : index
    %c0_15 = arith.constant 0 : index
    %23 = vector.load %arg6[%c0_14, %c0_15] : memref<1x32xf32, #tpu.memory_space<vmem>>, vector<1x32xf32>
    %24 = vector.broadcast %23 : vector<1x32xf32> to vector<16x32xf32>
    %25 = arith.addf %22, %24 : vector<16x32xf32>
    %c0_16 = arith.constant 0 : index
    %c0_17 = arith.constant 0 : index
    %c0_18 = arith.constant 0 : index
    %26 = vector.load %arg3[%c0_16, %c0_17, %c0_18] : memref<1x16x32xf32, #tpu.memory_space<vmem>>, vector<1x16x32xf32>
    %27 = vector.shape_cast %26 : vector<1x16x32xf32> to vector<16x32xf32>
    %28 = arith.negf %27 : vector<16x32xf32>
    %29 = math.exp %28 : vector<16x32xf32>
    %cst_19 = arith.constant 1.000000e+00 : f32
    %30 = vector.broadcast %cst_19 : f32 to vector<16x32xf32>
    %31 = arith.addf %30, %29 : vector<16x32xf32>
    %32 = arith.divf %30, %31 : vector<16x32xf32>
    %33 = arith.mulf %27, %32 : vector<16x32xf32>
    %34 = arith.mulf %25, %33 : vector<16x32xf32>
    %c0_20 = arith.constant 0 : index
    %c0_21 = arith.constant 0 : index
    %35 = vector.load %arg11[%c0_20, %c0_21] : memref<16x32xf32, #tpu.memory_space<vmem>>, vector<16x32xf32>
    %c0_22 = arith.constant 0 : index
    %c0_23 = arith.constant 0 : index
    %36 = vector.load %arg9[%c0_22, %c0_23] : memref<32x32xf32, #tpu.memory_space<vmem>>, vector<32x32xf32>
    %cst_24 = arith.constant dense<0.000000e+00> : vector<16x32xf32>
    %37 = tpu.matmul %34, %36, %cst_24 {dimension_numbers = #tpu.dot_dimension_numbers<[1], [0], [0], [1], [0, 0, 1, 1], [], []>} : vector<16x32xf32>, vector<32x32xf32>, vector<16x32xf32> -> vector<16x32xf32>
    %38 = arith.addf %35, %37 : vector<16x32xf32>
    %c0_25 = arith.constant 0 : index
    %c0_26 = arith.constant 0 : index
    %39 = vector.load %arg11[%c0_25, %c0_26] : memref<16x32xf32, #tpu.memory_space<vmem>>, vector<16x32xf32>
    tpu.vector_store %arg11[%c0_25, %c0_26], %38 {strides = array<i32>} : memref<16x32xf32, #tpu.memory_space<vmem>>, vector<16x32xf32>,
    %c0_i32_27 = arith.constant 0 : i32
    %40 = arith.cmpi eq, %arg1, %c0_i32_27 : i32
    %41 = arith.extui %40 : i1 to i32
    %c0_i32_28 = arith.constant 0 : i32
    %42 = arith.cmpi ne, %41, %c0_i32_28 : i32
    scf.if %42 {
      %c0_29 = arith.constant 0 : index
      %c0_30 = arith.constant 0 : index
      %43 = vector.load %arg11[%c0_29, %c0_30] : memref<16x32xf32, #tpu.memory_space<vmem>>, vector<16x32xf32>
      %c0_31 = arith.constant 0 : index
      %c0_32 = arith.constant 0 : index
      %44 = vector.load %arg4[%c0_31, %c0_32] : memref<16x32xf32, #tpu.memory_space<vmem>>, vector<16x32xf32>
      %45 = arith.addf %43, %44 : vector<16x32xf32>
      %c0_33 = arith.constant 0 : index
      %c0_34 = arith.constant 0 : index
      %46 = vector.load %arg10[%c0_33, %c0_34] : memref<16x32xf32, #tpu.memory_space<vmem>>, vector<16x32xf32>
      tpu.vector_store %arg10[%c0_33, %c0_34], %45 {strides = array<i32>} : memref<16x32xf32, #tpu.memory_space<vmem>>, vector<16x32xf32>,
    } else {
    }
    return
  }
  func.func @transform_0(%arg0: i32, %arg1: i32) -> (i32, i32) {
    %c0_i32 = arith.constant 0 : i32
    return %arg0, %arg1 : i32, i32
  }
  func.func @transform_1(%arg0: i32, %arg1: i32) -> (i32, i32, i32) {
    %c3_i32 = arith.constant 3 : i32
    %c0_i32 = arith.constant 0 : i32
    return %c3_i32, %arg0, %arg1 : i32, i32, i32
  }
  func.func @transform_2(%arg0: i32, %arg1: i32) -> (i32, i32) {
    %c0_i32 = arith.constant 0 : i32
    %c0_i32_0 = arith.constant 0 : i32
    return %arg0, %c0_i32 : i32, i32
  }
  func.func @transform_3(%arg0: i32, %arg1: i32) -> (i32, i32) {
    %c0_i32 = arith.constant 0 : i32
    %c0_i32_0 = arith.constant 0 : i32
    return %c0_i32, %arg1 : i32, i32
  }
  func.func @transform_4(%arg0: i32, %arg1: i32) -> (i32, i32) {
    %c0_i32 = arith.constant 0 : i32
    %c0_i32_0 = arith.constant 0 : i32
    return %c0_i32, %arg1 : i32, i32
  }
  func.func @transform_5(%arg0: i32, %arg1: i32) -> (i32, i32) {
    %c0_i32 = arith.constant 0 : i32
    %c0_i32_0 = arith.constant 0 : i32
    %c0_i32_1 = arith.constant 0 : i32
    return %c0_i32, %c0_i32_0 : i32, i32
  }
  func.func @transform_6(%arg0: i32, %arg1: i32) -> (i32, i32) {
    %c0_i32 = arith.constant 0 : i32
    %c0_i32_0 = arith.constant 0 : i32
    %c0_i32_1 = arith.constant 0 : i32
    return %c0_i32, %c0_i32_0 : i32, i32
  }
  func.func @transform_7(%arg0: i32, %arg1: i32) -> (i32, i32) {
    %c0_i32 = arith.constant 0 : i32
    %c0_i32_0 = arith.constant 0 : i32
    return %arg1, %c0_i32 : i32, i32
  }
  func.func @transform_8(%arg0: i32, %arg1: i32) -> (i32, i32) {
    %c0_i32 = arith.constant 0 : i32
    %c0_i32_0 = arith.constant 0 : i32
    return %arg0, %c0_i32 : i32, i32
  }
}

module attributes {stable_mosaic.version = 11 : i64} {
  func.func @_gemm_kernel(%arg0: i32, %arg1: i32, %arg2: i32, %arg3: memref<16x32xf32, #tpu.memory_space<vmem>>, %arg4: memref<16x32xf32, #tpu.memory_space<vmem>>, %arg5: memref<1x32xf32, #tpu.memory_space<vmem>>, %arg6: memref<32x112xf32, #tpu.memory_space<vmem>>, %arg7: memref<16x112xf32, #tpu.memory_space<vmem>>, %arg8: memref<16x112xf32, #tpu.memory_space<vmem>>) attributes {dimension_semantics = [#tpu.dimension_semantics<parallel>, #tpu.dimension_semantics<parallel>, #tpu.dimension_semantics<arbitrary>], iteration_bounds = array<i64: 1, 1, 1>, scalar_prefetch = 0 : i64, scratch_operands = 1 : i64, tpu.core_type = #tpu.core_type<tc>, window_params = [{transform_indices = @transform_0, window_bounds = array<i64: 16, 32>}, {transform_indices = @transform_1, window_bounds = array<i64: 16, 32>}, {transform_indices = @transform_2, window_bounds = array<i64: 1, 32>}, {transform_indices = @transform_3, window_bounds = array<i64: 32, 112>}, {transform_indices = @transform_4, window_bounds = array<i64: 16, 112>}]} {
    %c0_i32 = arith.constant 0 : i32
    %0 = arith.cmpi eq, %arg2, %c0_i32 : i32
    %1 = arith.extui %0 : i1 to i32
    %c0_i32_0 = arith.constant 0 : i32
    %2 = arith.cmpi ne, %1, %c0_i32_0 : i32
    scf.if %2 {
      %cst_14 = arith.constant 0.000000e+00 : f32
      %17 = vector.broadcast %cst_14 : f32 to vector<16x112xf32>
      %c0_15 = arith.constant 0 : index
      %c0_16 = arith.constant 0 : index
      %18 = vector.load %arg8[%c0_15, %c0_16] : memref<16x112xf32, #tpu.memory_space<vmem>>, vector<16x112xf32>
      tpu.vector_store %arg8[%c0_15, %c0_16], %17 {strides = array<i32>} : memref<16x112xf32, #tpu.memory_space<vmem>>, vector<16x112xf32>,
    } else {
    }
    %c0 = arith.constant 0 : index
    %c0_1 = arith.constant 0 : index
    %3 = vector.load %arg3[%c0, %c0_1] : memref<16x32xf32, #tpu.memory_space<vmem>>, vector<16x32xf32>
    %c0_2 = arith.constant 0 : index
    %c0_3 = arith.constant 0 : index
    %4 = vector.load %arg4[%c0_2, %c0_3] : memref<16x32xf32, #tpu.memory_space<vmem>>, vector<16x32xf32>
    %c0_4 = arith.constant 0 : index
    %c0_5 = arith.constant 0 : index
    %5 = vector.load %arg5[%c0_4, %c0_5] : memref<1x32xf32, #tpu.memory_space<vmem>>, vector<1x32xf32>
    %6 = vector.broadcast %5 : vector<1x32xf32> to vector<16x32xf32>
    %7 = arith.mulf %4, %6 : vector<16x32xf32>
    %8 = arith.addf %3, %7 : vector<16x32xf32>
    %c0_6 = arith.constant 0 : index
    %c0_7 = arith.constant 0 : index
    %9 = vector.load %arg8[%c0_6, %c0_7] : memref<16x112xf32, #tpu.memory_space<vmem>>, vector<16x112xf32>
    %c0_8 = arith.constant 0 : index
    %c0_9 = arith.constant 0 : index
    %10 = vector.load %arg6[%c0_8, %c0_9] : memref<32x112xf32, #tpu.memory_space<vmem>>, vector<32x112xf32>
    %cst = arith.constant dense<0.000000e+00> : vector<16x112xf32>
    %11 = tpu.matmul %8, %10, %cst {dimension_numbers = #tpu.dot_dimension_numbers<[1], [0], [0], [1], [0, 0, 1, 1], [], []>} : vector<16x32xf32>, vector<32x112xf32>, vector<16x112xf32> -> vector<16x112xf32>
    %12 = arith.addf %9, %11 : vector<16x112xf32>
    %c0_10 = arith.constant 0 : index
    %c0_11 = arith.constant 0 : index
    %13 = vector.load %arg8[%c0_10, %c0_11] : memref<16x112xf32, #tpu.memory_space<vmem>>, vector<16x112xf32>
    tpu.vector_store %arg8[%c0_10, %c0_11], %12 {strides = array<i32>} : memref<16x112xf32, #tpu.memory_space<vmem>>, vector<16x112xf32>,
    %c0_i32_12 = arith.constant 0 : i32
    %14 = arith.cmpi eq, %arg2, %c0_i32_12 : i32
    %15 = arith.extui %14 : i1 to i32
    %c0_i32_13 = arith.constant 0 : i32
    %16 = arith.cmpi ne, %15, %c0_i32_13 : i32
    scf.if %16 {
      %c0_14 = arith.constant 0 : index
      %c0_15 = arith.constant 0 : index
      %17 = vector.load %arg8[%c0_14, %c0_15] : memref<16x112xf32, #tpu.memory_space<vmem>>, vector<16x112xf32>
      %cst_16 = arith.constant 0.000000e+00 : f32
      %18 = vector.broadcast %cst_16 : f32 to vector<16x112xf32>
      %19 = arith.maximumf %17, %18 : vector<16x112xf32>
      %20 = arith.mulf %19, %19 : vector<16x112xf32>
      %c0_17 = arith.constant 0 : index
      %c0_18 = arith.constant 0 : index
      %21 = vector.load %arg7[%c0_17, %c0_18] : memref<16x112xf32, #tpu.memory_space<vmem>>, vector<16x112xf32>
      tpu.vector_store %arg7[%c0_17, %c0_18], %20 {strides = array<i32>} : memref<16x112xf32, #tpu.memory_space<vmem>>, vector<16x112xf32>,
    } else {
    }
    return
  }
  func.func @transform_0(%arg0: i32, %arg1: i32, %arg2: i32) -> (i32, i32) {
    %c0_i32 = arith.constant 0 : i32
    return %arg0, %arg2 : i32, i32
  }
  func.func @transform_1(%arg0: i32, %arg1: i32, %arg2: i32) -> (i32, i32) {
    %c0_i32 = arith.constant 0 : i32
    return %arg0, %arg2 : i32, i32
  }
  func.func @transform_2(%arg0: i32, %arg1: i32, %arg2: i32) -> (i32, i32) {
    %c0_i32 = arith.constant 0 : i32
    %c0_i32_0 = arith.constant 0 : i32
    return %c0_i32, %arg2 : i32, i32
  }
  func.func @transform_3(%arg0: i32, %arg1: i32, %arg2: i32) -> (i32, i32) {
    %c0_i32 = arith.constant 0 : i32
    return %arg2, %arg1 : i32, i32
  }
  func.func @transform_4(%arg0: i32, %arg1: i32, %arg2: i32) -> (i32, i32) {
    %c0_i32 = arith.constant 0 : i32
    return %arg0, %arg1 : i32, i32
  }
}

module attributes {stable_mosaic.version = 11 : i64} {
  func.func @_layernorm_kernel(%arg0: i32, %arg1: memref<16x32xf32, #tpu.memory_space<vmem>>, %arg2: memref<1x32xf32, #tpu.memory_space<vmem>>, %arg3: memref<1x32xf32, #tpu.memory_space<vmem>>, %arg4: memref<16x32xf32, #tpu.memory_space<vmem>>) attributes {dimension_semantics = [#tpu.dimension_semantics<parallel>], iteration_bounds = array<i64: 1>, scalar_prefetch = 0 : i64, scratch_operands = 0 : i64, tpu.core_type = #tpu.core_type<tc>, window_params = [{transform_indices = @transform_0, window_bounds = array<i64: 16, 32>}, {pipeline_mode = #tpu.pipeline_mode<synchronous>, transform_indices = @transform_1, window_bounds = array<i64: 1, 32>}, {pipeline_mode = #tpu.pipeline_mode<synchronous>, transform_indices = @transform_2, window_bounds = array<i64: 1, 32>}, {transform_indices = @transform_3, window_bounds = array<i64: 16, 32>}]} {
    %c0 = arith.constant 0 : index
    %c0_0 = arith.constant 0 : index
    %0 = vector.load %arg1[%c0, %c0_0] : memref<16x32xf32, #tpu.memory_space<vmem>>, vector<16x32xf32>
    %cst = arith.constant dense<0.000000e+00> : vector<16xf32>
    %1 = vector.multi_reduction <add>, %0, %cst [1] : vector<16x32xf32> to vector<16xf32>
    %2 = vector.shape_cast %1 : vector<16xf32> to vector<16x1xf32>
    %cst_1 = arith.constant 3.200000e+01 : f32
    %3 = vector.broadcast %cst_1 : f32 to vector<16x1xf32>
    %4 = arith.divf %2, %3 : vector<16x1xf32>
    %5 = vector.broadcast %4 : vector<16x1xf32> to vector<16x32xf32>
    %6 = arith.subf %0, %5 : vector<16x32xf32>
    %7 = arith.mulf %6, %6 : vector<16x32xf32>
    %cst_2 = arith.constant dense<0.000000e+00> : vector<16xf32>
    %8 = vector.multi_reduction <add>, %7, %cst_2 [1] : vector<16x32xf32> to vector<16xf32>
    %9 = vector.shape_cast %8 : vector<16xf32> to vector<16x1xf32>
    %cst_3 = arith.constant 3.200000e+01 : f32
    %10 = vector.broadcast %cst_3 : f32 to vector<16x1xf32>
    %11 = arith.divf %9, %10 : vector<16x1xf32>
    %cst_4 = arith.constant 9.99999974E-6 : f32
    %12 = vector.broadcast %cst_4 : f32 to vector<16x1xf32>
    %13 = arith.addf %11, %12 : vector<16x1xf32>
    %14 = math.rsqrt %13 : vector<16x1xf32>
    %15 = vector.broadcast %14 : vector<16x1xf32> to vector<16x32xf32>
    %16 = arith.mulf %6, %15 : vector<16x32xf32>
    %c0_5 = arith.constant 0 : index
    %c0_6 = arith.constant 0 : index
    %17 = vector.load %arg2[%c0_5, %c0_6] : memref<1x32xf32, #tpu.memory_space<vmem>>, vector<1x32xf32>
    %18 = vector.broadcast %17 : vector<1x32xf32> to vector<16x32xf32>
    %19 = arith.mulf %16, %18 : vector<16x32xf32>
    %c0_7 = arith.constant 0 : index
    %c0_8 = arith.constant 0 : index
    %20 = vector.load %arg3[%c0_7, %c0_8] : memref<1x32xf32, #tpu.memory_space<vmem>>, vector<1x32xf32>
    %21 = vector.broadcast %20 : vector<1x32xf32> to vector<16x32xf32>
    %22 = arith.addf %19, %21 : vector<16x32xf32>
    %c0_9 = arith.constant 0 : index
    %c0_10 = arith.constant 0 : index
    %23 = vector.load %arg4[%c0_9, %c0_10] : memref<16x32xf32, #tpu.memory_space<vmem>>, vector<16x32xf32>
    tpu.vector_store %arg4[%c0_9, %c0_10], %22 {strides = array<i32>} : memref<16x32xf32, #tpu.memory_space<vmem>>, vector<16x32xf32>,
    return
  }
  func.func @transform_0(%arg0: i32) -> (i32, i32) {
    %c0_i32 = arith.constant 0 : i32
    %c0_i32_0 = arith.constant 0 : i32
    return %arg0, %c0_i32 : i32, i32
  }
  func.func @transform_1(%arg0: i32) -> (i32, i32) {
    %c0_i32 = arith.constant 0 : i32
    %c0_i32_0 = arith.constant 0 : i32
    %c0_i32_1 = arith.constant 0 : i32
    return %c0_i32, %c0_i32_0 : i32, i32
  }
  func.func @transform_2(%arg0: i32) -> (i32, i32) {
    %c0_i32 = arith.constant 0 : i32
    %c0_i32_0 = arith.constant 0 : i32
    %c0_i32_1 = arith.constant 0 : i32
    return %c0_i32, %c0_i32_0 : i32, i32
  }
  func.func @transform_3(%arg0: i32) -> (i32, i32) {
    %c0_i32 = arith.constant 0 : i32
    %c0_i32_0 = arith.constant 0 : i32
    return %arg0, %c0_i32 : i32, i32
  }
}

module attributes {stable_mosaic.version = 11 : i64} {
  func.func @_gemm_kernel(%arg0: i32, %arg1: i32, %arg2: i32, %arg3: memref<16x112xf32, #tpu.memory_space<vmem>>, %arg4: memref<112x32xf32, #tpu.memory_space<vmem>>, %arg5: memref<16x32xf32, #tpu.memory_space<vmem>>, %arg6: memref<16x32xf32, #tpu.memory_space<vmem>>) attributes {dimension_semantics = [#tpu.dimension_semantics<parallel>, #tpu.dimension_semantics<parallel>, #tpu.dimension_semantics<arbitrary>], iteration_bounds = array<i64: 1, 1, 1>, scalar_prefetch = 0 : i64, scratch_operands = 1 : i64, tpu.core_type = #tpu.core_type<tc>, window_params = [{transform_indices = @transform_0, window_bounds = array<i64: 16, 112>}, {transform_indices = @transform_1, window_bounds = array<i64: 112, 32>}, {transform_indices = @transform_2, window_bounds = array<i64: 16, 32>}]} {
    %c0_i32 = arith.constant 0 : i32
    %0 = arith.cmpi eq, %arg2, %c0_i32 : i32
    %1 = arith.extui %0 : i1 to i32
    %c0_i32_0 = arith.constant 0 : i32
    %2 = arith.cmpi ne, %1, %c0_i32_0 : i32
    scf.if %2 {
      %cst_10 = arith.constant 0.000000e+00 : f32
      %12 = vector.broadcast %cst_10 : f32 to vector<16x32xf32>
      %c0_11 = arith.constant 0 : index
      %c0_12 = arith.constant 0 : index
      %13 = vector.load %arg6[%c0_11, %c0_12] : memref<16x32xf32, #tpu.memory_space<vmem>>, vector<16x32xf32>
      tpu.vector_store %arg6[%c0_11, %c0_12], %12 {strides = array<i32>} : memref<16x32xf32, #tpu.memory_space<vmem>>, vector<16x32xf32>,
    } else {
    }
    %c0 = arith.constant 0 : index
    %c0_1 = arith.constant 0 : index
    %3 = vector.load %arg3[%c0, %c0_1] : memref<16x112xf32, #tpu.memory_space<vmem>>, vector<16x112xf32>
    %c0_2 = arith.constant 0 : index
    %c0_3 = arith.constant 0 : index
    %4 = vector.load %arg6[%c0_2, %c0_3] : memref<16x32xf32, #tpu.memory_space<vmem>>, vector<16x32xf32>
    %c0_4 = arith.constant 0 : index
    %c0_5 = arith.constant 0 : index
    %5 = vector.load %arg4[%c0_4, %c0_5] : memref<112x32xf32, #tpu.memory_space<vmem>>, vector<112x32xf32>
    %cst = arith.constant dense<0.000000e+00> : vector<16x32xf32>
    %6 = tpu.matmul %3, %5, %cst {dimension_numbers = #tpu.dot_dimension_numbers<[1], [0], [0], [1], [0, 0, 1, 1], [], []>} : vector<16x112xf32>, vector<112x32xf32>, vector<16x32xf32> -> vector<16x32xf32>
    %7 = arith.addf %4, %6 : vector<16x32xf32>
    %c0_6 = arith.constant 0 : index
    %c0_7 = arith.constant 0 : index
    %8 = vector.load %arg6[%c0_6, %c0_7] : memref<16x32xf32, #tpu.memory_space<vmem>>, vector<16x32xf32>
    tpu.vector_store %arg6[%c0_6, %c0_7], %7 {strides = array<i32>} : memref<16x32xf32, #tpu.memory_space<vmem>>, vector<16x32xf32>,
    %c0_i32_8 = arith.constant 0 : i32
    %9 = arith.cmpi eq, %arg2, %c0_i32_8 : i32
    %10 = arith.extui %9 : i1 to i32
    %c0_i32_9 = arith.constant 0 : i32
    %11 = arith.cmpi ne, %10, %c0_i32_9 : i32
    scf.if %11 {
      %c0_10 = arith.constant 0 : index
      %c0_11 = arith.constant 0 : index
      %12 = vector.load %arg6[%c0_10, %c0_11] : memref<16x32xf32, #tpu.memory_space<vmem>>, vector<16x32xf32>
      %c0_12 = arith.constant 0 : index
      %c0_13 = arith.constant 0 : index
      %13 = vector.load %arg5[%c0_12, %c0_13] : memref<16x32xf32, #tpu.memory_space<vmem>>, vector<16x32xf32>
      tpu.vector_store %arg5[%c0_12, %c0_13], %12 {strides = array<i32>} : memref<16x32xf32, #tpu.memory_space<vmem>>, vector<16x32xf32>,
    } else {
    }
    return
  }
  func.func @transform_0(%arg0: i32, %arg1: i32, %arg2: i32) -> (i32, i32) {
    %c0_i32 = arith.constant 0 : i32
    return %arg0, %arg2 : i32, i32
  }
  func.func @transform_1(%arg0: i32, %arg1: i32, %arg2: i32) -> (i32, i32) {
    %c0_i32 = arith.constant 0 : i32
    return %arg2, %arg1 : i32, i32
  }
  func.func @transform_2(%arg0: i32, %arg1: i32, %arg2: i32) -> (i32, i32) {
    %c0_i32 = arith.constant 0 : i32
    return %arg0, %arg1 : i32, i32
  }
}

module attributes {stable_mosaic.version = 11 : i64} {
  func.func @_gemm_kernel(%arg0: i32, %arg1: i32, %arg2: i32, %arg3: memref<16x32xf32, #tpu.memory_space<vmem>>, %arg4: memref<16x32xf32, #tpu.memory_space<vmem>>, %arg5: memref<1x32xf32, #tpu.memory_space<vmem>>, %arg6: memref<32x32xf32, #tpu.memory_space<vmem>>, %arg7: memref<16x32xf32, #tpu.memory_space<vmem>>, %arg8: memref<16x32xf32, #tpu.memory_space<vmem>>, %arg9: memref<16x32xf32, #tpu.memory_space<vmem>>, %arg10: memref<16x32xf32, #tpu.memory_space<vmem>>) attributes {dimension_semantics = [#tpu.dimension_semantics<parallel>, #tpu.dimension_semantics<parallel>, #tpu.dimension_semantics<arbitrary>], iteration_bounds = array<i64: 1, 1, 1>, scalar_prefetch = 0 : i64, scratch_operands = 1 : i64, tpu.core_type = #tpu.core_type<tc>, window_params = [{transform_indices = @transform_0, window_bounds = array<i64: 16, 32>}, {transform_indices = @transform_1, window_bounds = array<i64: 16, 32>}, {transform_indices = @transform_2, window_bounds = array<i64: 1, 32>}, {transform_indices = @transform_3, window_bounds = array<i64: 32, 32>}, {transform_indices = @transform_4, window_bounds = array<i64: 16, 32>}, {transform_indices = @transform_5, window_bounds = array<i64: 16, 32>}, {transform_indices = @transform_6, window_bounds = array<i64: 16, 32>}]} {
    %c0_i32 = arith.constant 0 : i32
    %0 = arith.cmpi eq, %arg2, %c0_i32 : i32
    %1 = arith.extui %0 : i1 to i32
    %c0_i32_0 = arith.constant 0 : i32
    %2 = arith.cmpi ne, %1, %c0_i32_0 : i32
    scf.if %2 {
      %cst_14 = arith.constant 0.000000e+00 : f32
      %17 = vector.broadcast %cst_14 : f32 to vector<16x32xf32>
      %c0_15 = arith.constant 0 : index
      %c0_16 = arith.constant 0 : index
      %18 = vector.load %arg10[%c0_15, %c0_16] : memref<16x32xf32, #tpu.memory_space<vmem>>, vector<16x32xf32>
      tpu.vector_store %arg10[%c0_15, %c0_16], %17 {strides = array<i32>} : memref<16x32xf32, #tpu.memory_space<vmem>>, vector<16x32xf32>,
    } else {
    }
    %c0 = arith.constant 0 : index
    %c0_1 = arith.constant 0 : index
    %3 = vector.load %arg3[%c0, %c0_1] : memref<16x32xf32, #tpu.memory_space<vmem>>, vector<16x32xf32>
    %c0_2 = arith.constant 0 : index
    %c0_3 = arith.constant 0 : index
    %4 = vector.load %arg4[%c0_2, %c0_3] : memref<16x32xf32, #tpu.memory_space<vmem>>, vector<16x32xf32>
    %c0_4 = arith.constant 0 : index
    %c0_5 = arith.constant 0 : index
    %5 = vector.load %arg5[%c0_4, %c0_5] : memref<1x32xf32, #tpu.memory_space<vmem>>, vector<1x32xf32>
    %6 = vector.broadcast %5 : vector<1x32xf32> to vector<16x32xf32>
    %7 = arith.mulf %4, %6 : vector<16x32xf32>
    %8 = arith.addf %3, %7 : vector<16x32xf32>
    %c0_6 = arith.constant 0 : index
    %c0_7 = arith.constant 0 : index
    %9 = vector.load %arg10[%c0_6, %c0_7] : memref<16x32xf32, #tpu.memory_space<vmem>>, vector<16x32xf32>
    %c0_8 = arith.constant 0 : index
    %c0_9 = arith.constant 0 : index
    %10 = vector.load %arg6[%c0_8, %c0_9] : memref<32x32xf32, #tpu.memory_space<vmem>>, vector<32x32xf32>
    %cst = arith.constant dense<0.000000e+00> : vector<16x32xf32>
    %11 = tpu.matmul %8, %10, %cst {dimension_numbers = #tpu.dot_dimension_numbers<[1], [0], [0], [1], [0, 0, 1, 1], [], []>} : vector<16x32xf32>, vector<32x32xf32>, vector<16x32xf32> -> vector<16x32xf32>
    %12 = arith.addf %9, %11 : vector<16x32xf32>
    %c0_10 = arith.constant 0 : index
    %c0_11 = arith.constant 0 : index
    %13 = vector.load %arg10[%c0_10, %c0_11] : memref<16x32xf32, #tpu.memory_space<vmem>>, vector<16x32xf32>
    tpu.vector_store %arg10[%c0_10, %c0_11], %12 {strides = array<i32>} : memref<16x32xf32, #tpu.memory_space<vmem>>, vector<16x32xf32>,
    %c0_i32_12 = arith.constant 0 : i32
    %14 = arith.cmpi eq, %arg2, %c0_i32_12 : i32
    %15 = arith.extui %14 : i1 to i32
    %c0_i32_13 = arith.constant 0 : i32
    %16 = arith.cmpi ne, %15, %c0_i32_13 : i32
    scf.if %16 {
      %c0_14 = arith.constant 0 : index
      %c0_15 = arith.constant 0 : index
      %17 = vector.load %arg10[%c0_14, %c0_15] : memref<16x32xf32, #tpu.memory_space<vmem>>, vector<16x32xf32>
      %18 = arith.negf %17 : vector<16x32xf32>
      %19 = math.exp %18 : vector<16x32xf32>
      %cst_16 = arith.constant 1.000000e+00 : f32
      %20 = vector.broadcast %cst_16 : f32 to vector<16x32xf32>
      %21 = arith.addf %20, %19 : vector<16x32xf32>
      %22 = arith.divf %20, %21 : vector<16x32xf32>
      %c0_17 = arith.constant 0 : index
      %c0_18 = arith.constant 0 : index
      %23 = vector.load %arg7[%c0_17, %c0_18] : memref<16x32xf32, #tpu.memory_space<vmem>>, vector<16x32xf32>
      %24 = arith.mulf %22, %23 : vector<16x32xf32>
      %c0_19 = arith.constant 0 : index
      %c0_20 = arith.constant 0 : index
      %25 = vector.load %arg8[%c0_19, %c0_20] : memref<16x32xf32, #tpu.memory_space<vmem>>, vector<16x32xf32>
      %26 = arith.addf %24, %25 : vector<16x32xf32>
      %c0_21 = arith.constant 0 : index
      %c0_22 = arith.constant 0 : index
      %27 = vector.load %arg9[%c0_21, %c0_22] : memref<16x32xf32, #tpu.memory_space<vmem>>, vector<16x32xf32>
      tpu.vector_store %arg9[%c0_21, %c0_22], %26 {strides = array<i32>} : memref<16x32xf32, #tpu.memory_space<vmem>>, vector<16x32xf32>,
    } else {
    }
    return
  }
  func.func @transform_0(%arg0: i32, %arg1: i32, %arg2: i32) -> (i32, i32) {
    %c0_i32 = arith.constant 0 : i32
    return %arg0, %arg2 : i32, i32
  }
  func.func @transform_1(%arg0: i32, %arg1: i32, %arg2: i32) -> (i32, i32) {
    %c0_i32 = arith.constant 0 : i32
    return %arg0, %arg2 : i32, i32
  }
  func.func @transform_2(%arg0: i32, %arg1: i32, %arg2: i32) -> (i32, i32) {
    %c0_i32 = arith.constant 0 : i32
    %c0_i32_0 = arith.constant 0 : i32
    return %c0_i32, %arg2 : i32, i32
  }
  func.func @transform_3(%arg0: i32, %arg1: i32, %arg2: i32) -> (i32, i32) {
    %c0_i32 = arith.constant 0 : i32
    return %arg2, %arg1 : i32, i32
  }
  func.func @transform_4(%arg0: i32, %arg1: i32, %arg2: i32) -> (i32, i32) {
    %c0_i32 = arith.constant 0 : i32
    return %arg0, %arg1 : i32, i32
  }
  func.func @transform_5(%arg0: i32, %arg1: i32, %arg2: i32) -> (i32, i32) {
    %c0_i32 = arith.constant 0 : i32
    return %arg0, %arg1 : i32, i32
  }
  func.func @transform_6(%arg0: i32, %arg1: i32, %arg2: i32) -> (i32, i32) {
    %c0_i32 = arith.constant 0 : i32
    return %arg0, %arg1 : i32, i32
  }
}

</mosaic_0001>

<bundles_post_ra>
// kernel: block_forward.9
= control target key start
LH: loop header
LB: loop body
LE: loop exit
PB: predicated region body
PF: predicated region fallthrough
CT: control target
= control target key end

     0   :  { %vm25_vm0 = vcmask 261120   ;;  %s264_s0 = inlined_call_operand.vmem [shape: f32[16,32], index: 0, kind: input, shape index: {}]   ;;  %s265_s1 = inlined_call_operand.vmem [shape: f32[1,32], index: 1, kind: input, shape index: {}]   ;;  %s266_s2 = inlined_call_operand.vmem [shape: f32[1,32], index: 2, kind: input, shape index: {}]   ;;  %s267_s3 = inlined_call_operand.vmem [shape: f32[1,32], index: 3, kind: input, shape index: {}]   ;;  %s268_s4 = inlined_call_operand.vmem [shape: f32[1,32], index: 4, kind: input, shape index: {}]   ;;  %s269_s5 = inlined_call_operand.hbm [shape: f32[16,32], index: 5, kind: output, shape index: {0}]   ;;  %s270_s6 = inlined_call_operand.vmem [shape: f32[16,32], index: 6, kind: output, shape index: {1}]  }
   0x1   :  { %v23_v0 = vld [vmem:[%s264_s0] sm:$0xff]  ;;  %v24_v1 = vld [vmem:[%s264_s0 + $0x8] sm:$0xff] }
   0x2   :  { %12 = vsyncpa [#allocation3], 0  ;;  %v26_v2 = vsel %vm25_vm0, %v23_v0, 0.0  ;;  %v29_v3 = vsel %vm25_vm0, %v24_v1, 0.0  ;;  %v139_v21 = vld [vmem:[%s265_s1] ss:$0 sm:$0xff] }
   0x3   :  { %27 = vadd.xlane.f32.xlu0 %v26_v2  ;;  %v140_v23 = vld [vmem:[%s266_s2] ss:$0 sm:$0xff]  ;;  %s178_s1 = smov [#allocation2]  }
   0x4   :  { %s124_s2 = sshll.u32 %s178_s1, 4  ;;  %s125_s2 = int_to_ptr.vmem [resolvable:$true] %s124_s2 }
   0x5   :  { %s154_s28 = scalar_lea.vmem %s125_s2, 256  ;;  %p159_p1 = scmp.lt.s32.totalorder %s125_s2, %s125_s2 }
   0x6   :  { %p155_p0 = scmp.ne.s32.totalorder %s125_s2, %s154_s28  ;;  %p160_p2 = scmp.lt.s32.totalorder %s154_s28, %s154_s28 }
   0x7   :  { %30 = vadd.xlane.f32.xlu0 %v29_v3 }
   0x8   :  { %p161_p3 = por %p160_p2, %p159_p1 }
   0xa   :  { %p162_p4 = pnand %p161_p3, %p155_p0 }
  0x90   :  { %v28_v4 = vpop.xlane.xlu0 %27 }
  0x91   :  { %v33_v5 = vmul.f32 0.03125, %v28_v4 }
  0x93   :  { %v35_v6 = vsub.f32 %v23_v0, %v33_v5 }
  0x94   :  { %v31_v7 = vpop.xlane.xlu0 %30 }
  0x95   :  { %v34_v8 = vmul.f32 0.03125, %v31_v7  ;;  %v37_v9 = vmul.f32 %v35_v6, %v35_v6 }
  0x97   :  { %v36_v10 = vsub.f32 %v24_v1, %v34_v8  ;;  %v39_v11 = vsel %vm25_vm0, %v37_v9, 0.0 }
  0x98   :  { %40 = vadd.xlane.f32.xlu1 %v39_v11 }
  0x99   :  { %v38_v12 = vmul.f32 %v36_v10, %v36_v10 }
  0x9b   :  { %v42_v13 = vsel %vm25_vm0, %v38_v12, 0.0 }
  0x9c   :  { %43 = vadd.xlane.f32.xlu1 %v42_v13 }
 0x125   :  { %v41_v14 = vpop.xlane.xlu1 %40 }
 0x126   :  { %v45_v15 = vmul.f32 0.03125, %v41_v14 }
 0x128   :  { %v47_v16 = vadd.f32 1e-05, %v45_v15 }
 0x129   :  { %v44_v17 = vpop.xlane.xlu1 %43 }
 0x12a   :  { %146 = vrsqrt.f32 %v47_v16  ;;  %v46_v18 = vmul.f32 0.03125, %v44_v17 }
 0x12c   :  { %v48_v19 = vadd.f32 1e-05, %v46_v18 }
 0x12e   :  { %148 = vrsqrt.f32 %v48_v19 }
 0x134   :  { %v147_v20 = vpop.eup %146 }
 0x135   :  { %v51_v22 = vmul.f32 %v147_v20, %v35_v6 }
 0x137   :  { %v60_v24 = vmul.f32 %v139_v21, %v51_v22 }
 0x138   :  { %v149_v25 = vpop.eup %148 }
 0x139   :  { %v69_v26 = vadd.f32 %v140_v23, %v60_v24  ;;  %v52_v27 = vmul.f32 %v149_v25, %v36_v10 }
 0x13b   :  { %v73_v28 = vsel %vm25_vm0, %v69_v26, 0.0  ;;  %71 = vst.msk [vmem:[#allocation2] sm:$0xff] %vm25_vm0, %v69_v26  ;;  %v61_v29 = vmul.f32 %v139_v21, %v52_v27 }
 0x13c   :  { %74 = vadd.xlane.f32.xlu0 %v73_v28 }
 0x13d   :  { %v70_v30 = vadd.f32 %v140_v23, %v61_v29 }
 0x13f   :  { %v76_v31 = vsel %vm25_vm0, %v70_v30, 0.0  ;;  %72 = vst.msk [vmem:[#allocation2 + $0x8] sm:$0xff] %vm25_vm0, %v70_v30 }
 0x140   :  { %77 = vadd.xlane.f32.xlu1 %v76_v31 }
 0x1c9   :  { %v75_v32 = vpop.xlane.xlu0 %74 }
 0x1ca   :  { %v79_v33 = vmul.f32 0.03125, %v75_v32 }
 0x1cc   :  { %v81_v34 = vsub.f32 %v69_v26, %v79_v33 }
 0x1cd   :  { %v78_v35 = vpop.xlane.xlu1 %77 }
 0x1ce   :  { %v80_v36 = vmul.f32 0.03125, %v78_v35  ;;  %v83_v37 = vmul.f32 %v81_v34, %v81_v34 }
 0x1d0   :  { %v82_v38 = vsub.f32 %v70_v30, %v80_v36  ;;  %v85_v39 = vsel %vm25_vm0, %v83_v37, 0.0 }
 0x1d1   :  { %86 = vadd.xlane.f32.xlu0 %v85_v39 }
 0x1d2   :  { %v84_v40 = vmul.f32 %v82_v38, %v82_v38 }
 0x1d4   :  { %v88_v41 = vsel %vm25_vm0, %v84_v40, 0.0 }
 0x1d5   :  { %89 = vadd.xlane.f32.xlu1 %v88_v41 }
 0x1d6   :  { %165 = shalt.err (!%p162_p4)
}
 0x1d7   :  { %s166_s7 = scalar_lea.hbm %s269_s5, 256 }
 0x1d8   :  { %p167_p5 = scmp.ne.s32.totalorder %s269_s5, %s166_s7  ;;  %p170_p6 = scmp.lt.u32.totalorder %s166_s7, %s269_s5 }
 0x1da   :  { %p172_p7 = pnand %p170_p6, %p167_p5 }
 0x1dc   :  { %175 = shalt.err (!%p172_p7)
}
 0x1dd   :  { %s179_s12 = smov 128   ;;  %s180_s13 = smov 8   ;;  %v141_v49 = vld [vmem:[%s267_s3] ss:$0 sm:$0xff] }
 0x1de   :  { %130 = dma.vmem_to_hbm [thread:$0]  %s125_s2, 256, %s269_s5, [#allocation3], %s179_s12, %s179_s12, %s180_s13  }
 0x1df   :  { %v142_v51 = vld [vmem:[%s268_s4] ss:$0 sm:$0xff] }
 0x25e   :  { %v87_v42 = vpop.xlane.xlu0 %86 }
 0x25f   :  { %v91_v43 = vmul.f32 0.03125, %v87_v42 }
 0x261   :  { %v93_v44 = vadd.f32 1e-05, %v91_v43 }
 0x262   :  { %v90_v45 = vpop.xlane.xlu1 %89 }
 0x263   :  { %150 = vrsqrt.f32 %v93_v44  ;;  %v92_v46 = vmul.f32 0.03125, %v90_v45 }
 0x265   :  { %v94_v47 = vadd.f32 1e-05, %v92_v46 }
 0x267   :  { %152 = vrsqrt.f32 %v94_v47 }
 0x26d   :  { %v151_v48 = vpop.eup %150 }
 0x26e   :  { %v97_v50 = vmul.f32 %v151_v48, %v81_v34 }
 0x270   :  { %v106_v52 = vmul.f32 %v141_v49, %v97_v50 }
 0x271   :  { %v153_v53 = vpop.eup %152 }
 0x272   :  { %v115_v54 = vadd.f32 %v142_v51, %v106_v52  ;;  %v98_v55 = vmul.f32 %v153_v53, %v82_v38 }
 0x274   :  { %117 = vst.msk [vmem:[%s270_s6] sm:$0xff] %vm25_vm0, %v115_v54  ;;  %v107_v56 = vmul.f32 %v141_v49, %v98_v55 }
 0x276   :  { %v116_v57 = vadd.f32 %v142_v51, %v107_v56 }
 0x278   :  { %118 = vst.msk [vmem:[%s270_s6 + $0x8] sm:$0xff] %vm25_vm0, %v116_v57 }
 0x279   :  { %176 = dma.done.wait [#allocation3], 256  }
 0x27a   :  { %177 = vsyncadd [#allocation3], 4294967040 }
 0x27b   :  { %138 = vsyncpa [#allocation3], 1 }

// kernel: block_forward.11
= control target key start
LH: loop header
LB: loop body
LE: loop exit
PB: predicated region body
PF: predicated region fallthrough
CT: control target
= control target key end

     0   :  { %s1473_s0 = inlined_call_operand.hbm [shape: f32[16,32], index: 0, kind: input, shape index: {}]   ;;  %s1474_s1 = inlined_call_operand.hbm [shape: f32[16,32], index: 1, kind: input, shape index: {}]   ;;  %s1475_s2 = inlined_call_operand.hbm [shape: f32[4,1,32], index: 2, kind: input, shape index: {}]   ;;  %s1476_s3 = inlined_call_operand.hbm [shape: f32[4,16,32], index: 3, kind: input, shape index: {}]   ;;  %s1477_s4 = inlined_call_operand.hbm [shape: f32[4,32,32], index: 4, kind: input, shape index: {}]   ;;  %s1478_s5 = inlined_call_operand.hbm [shape: f32[4,16,32], index: 5, kind: output, shape index: {}]  }
   0x1   :  { %1497 = sst [smem:[#allocation21_spill]] %s1473_s0 }
   0x2   :  { %1498 = sst [smem:[#allocation22_spill]] %s1475_s2 }
   0x3   :  { %1499 = sst [smem:[#allocation23_spill]] %s1476_s3 }
   0x4   :  { %10 = vsyncpa [#allocation4], 0 }
   0x5   :  { %11 = vsyncpa [#allocation7], 0 }
   0x6   :  { %12 = vsyncpa [#allocation5], 0 }
   0x7   :  { %14 = vsyncpa [#allocation5 + $0x1], 0  ;;  %s1132_s18 = smov 0   ;;  %s1134_s19 = smov 0  }
   0x8   :  { %s1136_s20 = smov 0   ;;  %s1138_s21 = smov 0  }
   0x9   :  { %s1140_s22 = smov 0   ;;  %s1142_s23 = smov 0  }
   0xa LB: > { %1500 = sst [smem:[#allocation16_spill]] %s1069_s18  ;;  %s1163_s24 = sadd.s32 4294967295, %s1089_s23   ;;  %s1089_s23 = sphi %s1142_s23, %s20_s23   ;;  %s1085_s22 = sphi %s1140_s22, %s1541_s22   ;;  %s1081_s21 = sphi %s1138_s21, %s1540_s21   ;;  %s1077_s20 = sphi %s1136_s20, %s1536_s20   ;;  %s1073_s19 = sphi %s1134_s19, %s1539_s19   ;;  %s1069_s18 = sphi %s1132_s18, %s1538_s18  }
   0xb   : > { %1501 = sst [smem:[#allocation17_spill]] %s1077_s20  ;;  %s701_s25 = sadd.s32 4294967294, %s1089_s23  }
   0xc   : > { %p117_p0 = scmp.ne.s32.totalorder %s1073_s19, %s1069_s18  ;;  %p1479_p1 = scmp.eq.s32.totalorder %s1163_s24, 0 }
   0xd   : > { %p207_p3 = scmp.eq.s32.totalorder %s701_s25, 3  ;;  %p702_p5 = scmp.ge.s32.totalorder %s1089_s23, 1 }
   0xe   : > { %p1172_p4 = por %p1479_p1, %p117_p0  ;;  %p214_p7 = scmp.lt.s32.totalorder %s1089_s23, 5 }
   0xf   : > { %p1177_p6 = por %p207_p3, %p117_p0  ;;  %s1091_s29 = smov [#allocation3]  }
  0x10   : > { %s1502_s26 = scalar_select %p1172_p4, 1, 0 }
  0x11   : > { %s1503_s27 = scalar_select %p1177_p6, 1, 0 }
  0x12   : > { %p1182_p8 = pnand %p702_p5, %p214_p7  ;;  %s230_s30 = sshll.u32 %s1091_s29, 4  ;;  %s231_s30 = int_to_ptr.vmem [resolvable:$true] %s230_s30 }
  0x13   : > { %1504 = sst [smem:[#allocation18_spill]] %s1503_s27  ;;  %s39_s7 = sadd.s32 1, %s1085_s22 }
  0x14   : > { %s1505_s28 = scalar_select %p1182_p8, 1, 0 }
  0x15   : > { %p771_p9 = pneg %p1182_p8  ;;  %s1507_s0 = sld [smem:[#allocation21_spill]] }
  0x17   : > { %p1190_p10 = pnand %p771_p9, %p1479_p1 }
  0x19   : > { %s1506_s6 = scalar_select %p1190_p10, 1, 0 }
  0x1a   : > { %p1487_p12 = pneg %p1190_p10 }
  0x1b   : > { %s853_s10 = scalar_lea.hbm %s1507_s0, 256 }
  0x1c   : > { %p854_p11 = scmp.ne.s32.totalorder %s1507_s0, %s853_s10  ;;  %p860_p3 = scmp.lt.u32.totalorder %s853_s10, %s1507_s0 }
  0x1e   : > { %p856_p13 = pnand %p1487_p12, %p854_p11 }
  0x20   : > { %p857_p0 = pneg %p856_p13 }
  0x22   : > { %p862_p5 = pnand %p860_p3, %p857_p0 }
  0x24   : > { %865 = shalt.err (!%p862_p5)
}
  0x25   : > { %s866_s15 = scalar_lea.vmem %s231_s30, 256  ;;  %p874_p2 = scmp.lt.s32.totalorder %s231_s30, %s231_s30 }
  0x26   : > { %p867_p7 = scmp.ne.s32.totalorder %s231_s30, %s866_s15  ;;  %p875_p6 = scmp.lt.s32.totalorder %s866_s15, %s866_s15 }
  0x28   : > { %p869_p9 = pnand %p867_p7, %p1487_p12  ;;  %p876_p4 = por %p875_p6, %p874_p2 }
  0x2a   : > { %p870_p1 = pneg %p869_p9 }
  0x2c   : > { %p877_p8 = pnand %p876_p4, %p870_p1 }
  0x2e   : > { %880 = shalt.err (!%p877_p8)
}
  0x2f   : > { %s1482_s16 = smov 128   ;;  %s1484_s17 = smov 8  }
  0x30   : > { %774 = dma.hbm_to_vmem [thread:$0]  (!%p1190_p10), %s1507_s0, 256, %s231_s30, [#allocation4], %s1482_s16, %s1482_s16, %s1484_s17  }
  0x31   : > { %p41_p1 = scmp.ge.s32.totalorder %s39_s7, 4  ;;  %s104_s8 = sadd.s32 1, %s1077_s20 }
  0x32   : > { %p111_p2 = scmp.ne.s32.totalorder %s1077_s20, %s1073_s19  ;;  %p112_p4 = scmp.eq.s32.totalorder %s1089_s23, 0 }
  0x33   : > { %s1543_s7 = smov (%p41_p1, %s39_s7), 0  ;;  %p1510_p8 = scmp.eq.s32.totalorder %s1163_s24, 3 }
  0x34   : > { %1508 = sst [smem:[#allocation19_spill]] %s1543_s7  ;;  %p1226_p6 = por %p112_p4, %p111_p2 }
  0x35   : > { %p1232_p11 = por %p1510_p8, %p111_p2  ;;  %s99_s11 = ssub.s32 %s1085_s22, %s1543_s7 }
  0x36   : > { %p794_p13 = scmp.lt.s32.totalorder %s1089_s23, 4  ;;  %p102_p0 = scmp.eq.s32.totalorder %s99_s11, 0 }
  0x37   : > { %s1511_s10 = scalar_select %p1232_p11, 1, 0 }
  0x38   : > { %s261_s30 = sand.u32 1, %s1089_s23   ;;  %s1241_s12 = sand.u32 1, %s1077_s20  }
  0x39   : > { %s1244_s13 = scalar_select %p102_p0, %s1077_s20, %s104_s8  }
  0x3a   : > { %s706_s14 = sshll.u32 %s1085_s22, 4  ;;  %s1513_s2 = sld [smem:[#allocation22_spill]] }
  0x3b   : > { %1512 = sst [smem:[#allocation20_spill]] %s1244_s13  ;;  %s264_s16 = scalar_lea.vmem [#allocation8], %s1241_s12 }
  0x3c   : > { %s272_s11 = sshll.u32 %s264_s16, 4  ;;  %p1257_p3 = pnand %p794_p13, %p1226_p6  ;;  %s1253_s11 = int_to_ptr.vmem [resolvable:$true] %s272_s11 }
  0x3d   : > { %s710_s0 = sshll.u32 %s1241_s12, 5  ;;  %s1263_s7 = scalar_lea.sflag [#allocation4], %s261_s30 }
  0x3e   : > { %s1514_s17 = scalar_select %p1257_p3, 1, 0 }
  0x3f   : > { %p1269_p7 = pneg %p1257_p3 }
  0x40   : > { %s1250_s29 = scalar_lea.hbm %s1513_s2, %s706_s14  ;;  %s886_s25 = scalar_lea.hbm %s1513_s2, 64 }
  0x41   : > { %s881_s14 = scalar_lea.hbm %s1250_s29, 16  ;;  %p887_p2 = scmp.lt.u32.totalorder %s1250_s29, %s1513_s2 }
  0x42   : > { %p882_p5 = scmp.ne.s32.totalorder %s1250_s29, %s881_s14  ;;  %p888_p4 = scmp.lt.u32.totalorder %s886_s25, %s881_s14 }
  0x43   : > { %s1515_s15 = scalar_select %p1269_p7, 1, 0 }
  0x44   : > { %p884_p9 = pnand %p1269_p7, %p882_p5  ;;  %p889_p6 = por %p888_p4, %p887_p2 }
  0x45   : > { %p890_p8 = scmp.lt.u32.totalorder %s881_s14, %s1250_s29 }
  0x46   : > { %p885_p1 = pneg %p884_p9 }
  0x47   : > { %p891_p13 = por %p890_p8, %p889_p6 }
  0x49   : > { %p892_p0 = pnand %p891_p13, %p885_p1 }
  0x4b   : > { %895 = shalt.err (!%p892_p0)
}
  0x4c   : > { %s896_s30 = scalar_lea.vmem %s1253_s11, 16  ;;  %s1094_s16 = smov [#allocation8]  }
  0x4d   : > { %p897_p5 = scmp.ne.s32.totalorder %s1253_s11, %s896_s30  ;;  %s901_s9 = sshll.u32 %s1094_s16, 4  ;;  %s902_s9 = int_to_ptr.vmem [resolvable:$false] %s901_s9 }
  0x4e   : > { %s903_s13 = scalar_lea.vmem %s902_s9, 32  ;;  %p904_p11 = scmp.lt.s32.totalorder %s1253_s11, %s902_s9 }
  0x4f   : > { %p899_p9 = pnand %p897_p5, %p1269_p7  ;;  %p905_p10 = scmp.lt.s32.totalorder %s903_s13, %s896_s30 }
  0x51   : > { %p900_p12 = pneg %p899_p9  ;;  %p906_p2 = por %p905_p10, %p904_p11 }
  0x53   : > { %p907_p4 = pnand %p906_p2, %p900_p12 }
  0x55   : > { %910 = shalt.err (!%p907_p4)
}
  0x56   : > { %781 = dma.hbm_to_vmem [thread:$0]  (!%p1257_p3), %s1250_s29, 16, %s1253_s11, %s1263_s7  }
  0x57   : > { %s1516_s8 = sshll.u32 %s1241_s12, 4  ;;  %s307_s30 = scalar_lea.vmem [#allocation10], %s710_s0 }
  0x58   : > { %s283_s14 = scalar_lea.vmem [#allocation9], %s1516_s8  ;;  %s316_s16 = sshll.u32 %s307_s30, 4  ;;  %s1299_s16 = int_to_ptr.vmem [resolvable:$true] %s316_s16 }
  0x59   : > { %s293_s25 = sshll.u32 %s283_s14, 4  ;;  %s727_s9 = sshll.u32 %s1085_s22, 8  ;;  %s1295_s25 = int_to_ptr.vmem [resolvable:$true] %s293_s25 }
  0x5a   : > { %s1517_s3 = sld [smem:[#allocation23_spill]] }
  0x60   : > { %s1305_s20 = scalar_lea.hbm %s1517_s3, %s727_s9  ;;  %s916_s11 = scalar_lea.hbm %s1517_s3, 1024 }
  0x61   : > { %s911_s29 = scalar_lea.hbm %s1305_s20, 256  ;;  %p917_p1 = scmp.lt.u32.totalorder %s1305_s20, %s1517_s3 }
  0x62   : > { %p912_p10 = scmp.ne.s32.totalorder %s1305_s20, %s911_s29  ;;  %p918_p6 = scmp.lt.u32.totalorder %s916_s11, %s911_s29 }
  0x63   : > { %p920_p13 = scmp.lt.u32.totalorder %s911_s29, %s1305_s20 }
  0x64   : > { %p914_p12 = pnand %p912_p10, %p1269_p7  ;;  %p919_p8 = por %p918_p6, %p917_p1 }
  0x66   : > { %p915_p11 = pneg %p914_p12  ;;  %p921_p0 = por %p920_p13, %p919_p8 }
  0x68   : > { %p922_p5 = pnand %p921_p0, %p915_p11 }
  0x6a   : > { %925 = shalt.err (!%p922_p5)
}
  0x6b   : > { %s926_s2 = scalar_lea.vmem %s1295_s25, 256  ;;  %s1095_s30 = smov [#allocation9]  }
  0x6c   : > { %p927_p9 = scmp.ne.s32.totalorder %s1295_s25, %s926_s2  ;;  %s931_s9 = sshll.u32 %s1095_s30, 4  ;;  %s932_s9 = int_to_ptr.vmem [resolvable:$false] %s931_s9 }
  0x6d   : > { %s933_s13 = scalar_lea.vmem %s932_s9, 512  ;;  %p934_p10 = scmp.lt.s32.totalorder %s1295_s25, %s932_s9 }
  0x6e   : > { %p929_p2 = pnand %p927_p9, %p1269_p7  ;;  %p935_p12 = scmp.lt.s32.totalorder %s933_s13, %s926_s2 }
  0x70   : > { %p930_p4 = pneg %p929_p2  ;;  %p936_p1 = por %p935_p12, %p934_p10 }
  0x72   : > { %p937_p6 = pnand %p936_p1, %p930_p4 }
  0x74   : > { %940 = shalt.err (!%p937_p6)
}
  0x75   : > { %s1518_s29 = smov 8   ;;  %s1519_s12 = smov 128  }
  0x76   : > { %784 = dma.hbm_to_vmem [thread:$0]  (!%p1257_p3), %s1305_s20, 256, %s1295_s25, %s1263_s7, %s1519_s12, %s1519_s12, %s1518_s29  }
  0x77   : > { %s1096_s0 = smov [#allocation6]   ;;  %s728_s8 = sshll.u32 %s1085_s22, 9 }
  0x78   : > { %s247_s11 = sshll.u32 %s1096_s0, 4  ;;  %s1336_s30 = scalar_lea.hbm %s1477_s4, %s728_s8  ;;  %s248_s11 = int_to_ptr.vmem [resolvable:$true] %s247_s11 }
  0x79   : > { %s941_s3 = scalar_lea.hbm %s1474_s1, 256  ;;  %p1520_p8 = scmp.ne.s32.totalorder %s1506_s6, 0 }
  0x7a   : > { %p942_p11 = scmp.ne.s32.totalorder %s1474_s1, %s941_s3  ;;  %p948_p9 = scmp.lt.u32.totalorder %s941_s3, %s1474_s1 }
  0x7b   : > { %p1521_p13 = pneg %p1520_p8 }
  0x7d   : > { %p944_p0 = pnand %p942_p11, %p1521_p13 }
  0x7f   : > { %p945_p5 = pneg %p944_p0 }
  0x81   : > { %p950_p2 = pnand %p948_p9, %p945_p5 }
  0x83   : > { %953 = shalt.err (!%p950_p2)
}
  0x84   : > { %s954_s0 = scalar_lea.vmem %s248_s11, 256  ;;  %p1522_p10 = pmov %p1521_p13 }
  0x85   : > { %p955_p4 = scmp.ne.s32.totalorder %s248_s11, %s954_s0  ;;  %p962_p6 = scmp.lt.s32.totalorder %s248_s11, %s248_s11 }
  0x86   : > { %p963_p3 = scmp.lt.s32.totalorder %s954_s0, %s954_s0 }
  0x87   : > { %p957_p12 = pnand %p955_p4, %p1522_p10 }
  0x88   : > { %p964_p7 = por %p963_p3, %p962_p6 }
  0x89   : > { %p958_p1 = pneg %p957_p12 }
  0x8b   : > { %p965_p11 = pnand %p964_p7, %p958_p1 }
  0x8d   : > { %968 = shalt.err (!%p965_p11)
}
  0x8e   : > { %777 = dma.hbm_to_vmem [thread:$0]  (!%p1520_p8), %s1474_s1, 256, %s248_s11, [#allocation7], %s1519_s12, %s1519_s12, %s1518_s29  }
  0x8f   : > { %s969_s27 = scalar_lea.hbm %s1336_s30, 512  ;;  %p1523_p0 = scmp.ne.s32.totalorder %s1515_s15, 0 }
  0x90   : > { %p970_p13 = scmp.ne.s32.totalorder %s1336_s30, %s969_s27  ;;  %s974_s6 = scalar_lea.hbm %s1477_s4, 2048 }
  0x91   : > { %p975_p5 = scmp.lt.u32.totalorder %s1336_s30, %s1477_s4  ;;  %p976_p9 = scmp.lt.u32.totalorder %s974_s6, %s969_s27 }
  0x92   : > { %p972_p3 = pnand %p970_p13, %p1523_p0  ;;  %p978_p4 = scmp.lt.u32.totalorder %s969_s27, %s1336_s30 }
  0x93   : > { %p977_p2 = por %p976_p9, %p975_p5 }
  0x94   : > { %p973_p7 = pneg %p972_p3 }
  0x95   : > { %p979_p10 = por %p978_p4, %p977_p2 }
  0x97   : > { %p980_p12 = pnand %p979_p10, %p973_p7 }
  0x99   : > { %983 = shalt.err (!%p980_p12)
}
  0x9a   : > { %s984_s11 = scalar_lea.vmem %s1299_s16, 512  ;;  %s1097_s13 = smov [#allocation10]  }
  0x9b   : > { %p985_p8 = scmp.ne.s32.totalorder %s1299_s16, %s984_s11  ;;  %s989_s20 = sshll.u32 %s1097_s13, 4  ;;  %s990_s20 = int_to_ptr.vmem [resolvable:$false] %s989_s20 }
  0x9c   : > { %s991_s25 = scalar_lea.vmem %s990_s20, 1024  ;;  %p992_p11 = scmp.lt.s32.totalorder %s1299_s16, %s990_s20 }
  0x9d   : > { %p987_p1 = pnand %p985_p8, %p1523_p0  ;;  %p993_p13 = scmp.lt.s32.totalorder %s991_s25, %s984_s11 }
  0x9f   : > { %p988_p6 = pneg %p987_p1  ;;  %p994_p3 = por %p993_p13, %p992_p11 }
  0xa1   : > { %p995_p5 = pnand %p994_p3, %p988_p6 }
  0xa3   : > { %998 = shalt.err (!%p995_p5)
}
  0xa4   : > { %p1524_p7 = scmp.ne.s32.totalorder %s1514_s17, 0  ;;  %p1525_p0 = scmp.ne.s32.totalorder %s1505_s28, 0 }
  0xa5   : > { %p1526_p9 = scmp.eq.s32.totalorder (!%p1525_p0), %s1163_s24, 0 }
  0xa6   : > { %787 = dma.hbm_to_vmem [thread:$0]  (!%p1524_p7), %s1336_s30, 512, %s1299_s16, %s1263_s7, %s1519_s12, %s1519_s12, %s1518_s29  }
  0xa7   : > { %328 = sbr.rel (%p1525_p0) target bundleno = 435 (0x1b3), region = 40 }
  0xae   : > { %1052 = dma.done.wait (%p1526_p9), [#allocation4], 256   ;;  %p1527_p2 = pmov %p1526_p9 }
  0xb0   : > { %1054 = vsyncadd (%p1527_p2), [#allocation4], 4294967040  ;;  %p1528_p4 = pmov %p1527_p2 }
  0xb1   : > { %p1529_p10 = pmov %p1527_p2 }
  0xb2   : > { %1056 = dma.done.wait (%p1528_p4), [#allocation7], 256  }
  0xb3   : > { %1058 = vsyncadd (%p1529_p10), [#allocation7], 4294967040  ;;  %s338_s17 = sand.u32 1, %s1163_s24   ;;  %s1398_s7 = sand.u32 1, %s1073_s19  }
  0xb4   : > { %s339_s28 = scalar_lea.sflag [#allocation4], %s338_s17  ;;  %s341_s15 = scalar_lea.vmem [#allocation8], %s1398_s7 }
  0xb5   : > { %p1530_p12 = scmp.ne.s32.totalorder %s1502_s26, 0 }
  0xb7   : > { %1060 = dma.done.wait (%p1530_p12), %s339_s28, 784  }
  0xb8   : > { %1062 = vsyncadd (%p1530_p12), %s339_s28, 4294966512  ;;  %vm404_vm0 = vcmask 261120   ;;  %s717_s16 = sshll.u32 %s1398_s7, 5  ;;  %v1098_v0 = vmov 0.0   ;;  %s716_s24 = sshll.u32 %s1398_s7, 4  ;;  %v409_v6 = vld [vmem:[#allocation6] sm:$0xff] }
  0xb9   : > { %406 = vst.msk [vmem:[#allocation2 + $0x8] sm:$0xff] %vm404_vm0, %v1098_v0  ;;  %405 = vst.msk [vmem:[#allocation2] sm:$0xff] %vm404_vm0, %v1098_v0  ;;  %s359_s29 = scalar_lea.vmem [#allocation10], %s717_s16  ;;  %v719_v8 = vld [vmem:[%s341_s15] ss:$0 sm:$0xff]  ;;  %s350_s26 = scalar_lea.vmem [#allocation9], %s716_s24 }
  0xba   : > { %v428_v1 = vld [vmem:[%s359_s29] sm:$0xff]  ;;  %v429_v2 = vld [vmem:[%s359_s29 + $0x8] sm:$0xff]  ;;  %v430_v3 = vld [vmem:[%s359_s29 + $0x10] sm:$0xff]  ;;  %s394_s12 = scalar_lea.vmem [#allocation11], %s716_s24  ;;  %s729_s0 = sshll.u32 %s1081_s21, 8 }
  0xbb   : > { %v747_v4 = vpack.c.bf16 %v429_v2, %v428_v1  ;;  %v431_v5 = vld [vmem:[%s359_s29 + $0x18] sm:$0xff]  ;;  %v412_v9 = vld [vmem:[%s350_s26] sm:$0xff]  ;;  %s541_s30 = sshll.u32 %s394_s12, 4  ;;  %s1423_s27 = scalar_lea.hbm %s1478_s5, %s729_s0  ;;  %s1418_s30 = int_to_ptr.vmem [resolvable:$true] %s541_s30 }
  0xbc   : > { %v751_v7 = vpack.c.bf16 %v431_v5, %v430_v3  ;;  %v413_v10 = vld [vmem:[%s350_s26 + $0x8] sm:$0xff]  ;;  %v420_v11 = vadd.f32 %v719_v8, %v412_v9  ;;  %s526_s8 = scalar_lea.sflag [#allocation5], %s1398_s7  ;;  %s999_s14 = scalar_lea.vmem %s1418_s30, 256 }
  0xbd   : > { %748 = vmatprep.subr.bf16.mxu0 %v747_v4  ;;  %v421_v12 = vadd.f32 %v719_v8, %v413_v10  ;;  %v410_v13 = vld [vmem:[#allocation6 + $0x8] sm:$0xff]  ;;  %v407_v14 = vld [vmem:[#allocation3] sm:$0xff]  ;;  %v408_v15 = vld [vmem:[#allocation3 + $0x8] sm:$0xff]  ;;  %p1000_p8 = scmp.ne.s32.totalorder %s1418_s30, %s999_s14  ;;  %p1531_p1 = scmp.ne.s32.totalorder %s1511_s10, 0 }
  0xbe   : > { %750 = vmatpush3.bf16.msra.mxu0 %v747_v4  ;;  %v422_v16 = vmul.f32 %v420_v11, %v409_v6  ;;  %s1099_s21 = smov [#allocation11]  }
  0xbf   : > { %752 = vmatprep.subr.bf16.mxu0 %v751_v7  ;;  %v423_v17 = vmul.f32 %v421_v12, %v410_v13  ;;  %p1001_p6 = pnand %p1000_p8, %p1531_p1  ;;  %s1003_s6 = sshll.u32 %s1099_s21, 4  ;;  %s1004_s6 = int_to_ptr.vmem [resolvable:$false] %s1003_s6 }
  0xc0   : > { %v424_v18 = vadd.f32 %v422_v16, %v407_v14  ;;  %v427_v20 = vld [vmem:[#allocation2 + $0x8] sm:$0xff]  ;;  %v426_v21 = vld [vmem:[#allocation2] sm:$0xff]  ;;  %s1005_s2 = scalar_lea.vmem %s1004_s6, 512  ;;  %p1006_p13 = scmp.lt.s32.totalorder %s1418_s30, %s1004_s6 }
  0xc1   : > { %v425_v19 = vadd.f32 %v423_v17, %v408_v15  ;;  %p1002_p11 = pneg %p1001_p6  ;;  %p1007_p3 = scmp.lt.s32.totalorder %s1005_s2, %s999_s14 }
  0xc2   : > { %754 = vmatpush3.bf16.msra.mxu0 %v751_v7  ;;  %744 = vmatprep.mubr.msk.f32.mxu0 %vm404_vm0, %v424_v18 }
  0xc3   : > { %p1008_p5 = por %p1007_p3, %p1006_p13 }
  0xc5   : > { %745 = vmatmul.mubr.msk.f32.vlgmr.msra.gmra.mrb[0].mxu0 %vm404_vm0, %v425_v19  ;;  %p1009_p7 = pnand %p1008_p5, %p1002_p11 }
 0x198   : > { %v746_v22 = vpop.f32.mrb[0].mxu0 }
 0x199   : > { %v515_v23 = vadd.f32 %v746_v22, %v427_v20  ;;  %v505_v24 = vpop.f32.mrb[1].mxu0 }
 0x19a   : > { %v514_v25 = vadd.f32 %v505_v24, %v426_v21 }
 0x19b   : > { %517 = vst.msk [vmem:[#allocation2 + $0x8] sm:$0xff] %vm404_vm0, %v515_v23 }
 0x19c   : > { %516 = vst.msk [vmem:[#allocation2] sm:$0xff] %vm404_vm0, %v514_v25 }
 0x1a2   : > { %v522_v26 = vld [vmem:[#allocation2 + $0x8] sm:$0xff] }
 0x1a3   : > { %v521_v27 = vld [vmem:[#allocation2] sm:$0xff]  ;;  %524 = vst.msk [vmem:[%s394_s12 + $0x8] sm:$0xff] %vm404_vm0, %v522_v26 }
 0x1a4   : > { %523 = vst.msk [vmem:[%s394_s12] sm:$0xff] %vm404_vm0, %v521_v27 }
 0x1a5   : > { %1012 = shalt.err (!%p1009_p7)
}
 0x1a6   : > { %s1013_s9 = scalar_lea.hbm %s1423_s27, 256  ;;  %s1017_s20 = scalar_lea.hbm %s1478_s5, 1024 }
 0x1a7   : > { %p1014_p0 = scmp.ne.s32.totalorder %s1423_s27, %s1013_s9  ;;  %p1018_p4 = scmp.lt.u32.totalorder %s1423_s27, %s1478_s5 }
 0x1a8   : > { %p1019_p10 = scmp.lt.u32.totalorder %s1017_s20, %s1013_s9  ;;  %p1021_p8 = scmp.lt.u32.totalorder %s1013_s9, %s1423_s27 }
 0x1a9   : > { %p1015_p9 = pnand %p1014_p0, %p1531_p1 }
 0x1aa   : > { %p1020_p12 = por %p1019_p10, %p1018_p4 }
 0x1ab   : > { %p1016_p2 = pneg %p1015_p9 }
 0x1ac   : > { %p1022_p6 = por %p1021_p8, %p1020_p12 }
 0x1ae   : > { %p1023_p11 = pnand %p1022_p6, %p1016_p2 }
 0x1b0   : > { %1026 = shalt.err (!%p1023_p11)
}
 0x1b1   : > { %s1100_s28 = smov 128   ;;  %s1101_s15 = smov 8  }
 0x1b2   : > { %769 = dma.vmem_to_hbm [thread:$0]  (%p1531_p1), %s1418_s30, 256, %s1423_s27, %s526_s8, %s1100_s28, %s1100_s28, %s1101_s15  }
 0x1b3 PF: > { %s1532_s16 = sld [smem:[#allocation16_spill]]  ;;  %s1533_s24 = sld [smem:[#allocation18_spill]] }
 0x1b4   : > { %p797_p13 = scmp.ge.s32.totalorder %s1089_s23, 2 }
 0x1b9   : > { %s556_s29 = sand.u32 1, %s1532_s16   ;;  %p1534_p3 = scmp.ne.s32.totalorder %s1533_s24, 0 }
 0x1ba   : > { %s557_s26 = scalar_lea.sflag [#allocation5], %s556_s29 }
 0x1bb   : > { %p789_p5 = pnand %p797_p13, %p1534_p3 }
 0x1bd   : > { %1064 = dma.done.wait (!%p789_p5), %s557_s26, 256  }
 0x1be   : > { %1066 = vsyncadd (!%p789_p5), %s557_s26, 4294967040  ;;  %s20_s23 = sadd.s32 1, %s1089_s23   ;;  %s1535_s12 = sld [smem:[#allocation17_spill]] }
 0x1bf   : > { %p17_p7 = scmp.ge.s32.totalorder %s20_s23, 6   ;;  %s1536_s20 = sld [smem:[#allocation20_spill]] }
 0x1c0   : > { %s1537_s10 = sld [smem:[#allocation19_spill]]  ;;  %s1538_s18 = smov %s1073_s19 }
 0x1c1   : > { %s1540_s21 = smov %s1085_s22  ;;  %19 = sbr.rel (!%p17_p7) target bundleno = 10 (0xa), region = 124 }
 0x1c4   : > { %s1539_s19 = smov %s1535_s12 }
 0x1c6   : > { %s1541_s22 = smov %s1537_s10 }
 0x1c8   :  { %562 = vsyncpa [#allocation4], 1 }
 0x1c9   :  { %564 = vsyncpa [#allocation4 + $0x1], 1 }
 0x1ca   :  { %565 = vsyncpa [#allocation7], 1 }
 0x1cb   :  { %566 = vsyncpa [#allocation5], 1 }
 0x1cc   :  { %568 = vsyncpa [#allocation5 + $0x1], 1 }

// kernel: block_forward.10
= control target key start
LH: loop header
LB: loop body
LE: loop exit
PB: predicated region body
PF: predicated region fallthrough
CT: control target
= control target key end

     0   :  { %16 = vsyncpa [#allocation3], 0  ;;  %s1731_s0 = inlined_call_operand.hbm [shape: f32[16,32], index: 0, kind: input, shape index: {}]   ;;  %s1732_s1 = inlined_call_operand.hbm [shape: f32[16,32], index: 1, kind: input, shape index: {}]   ;;  %s1733_s2 = inlined_call_operand.hbm [shape: f32[1,32], index: 2, kind: input, shape index: {}]   ;;  %s1734_s3 = inlined_call_operand.hbm [shape: f32[1,32], index: 3, kind: input, shape index: {}]   ;;  %s1735_s4 = inlined_call_operand.hbm [shape: f32[1,32], index: 4, kind: input, shape index: {}]   ;;  %s1736_s5 = inlined_call_operand.hbm [shape: f32[32,160], index: 5, kind: input, shape index: {}]   ;;  %s1737_s6 = inlined_call_operand.hbm [shape: f32[5,32,32], index: 6, kind: input, shape index: {}]   ;;  %s1738_s7 = inlined_call_operand.hbm [shape: f32[32,64], index: 7, kind: input, shape index: {}]   ;;  %s1739_s8 = inlined_call_operand.hbm [shape: f32[64,32], index: 8, kind: input, shape index: {}]   ;;  %s1740_s9 = inlined_call_operand.hbm [shape: f32[4,16,32], index: 9, kind: output, shape index: {0}]   ;;  %s1741_s10 = inlined_call_operand.hbm [shape: f32[16,32], index: 10, kind: output, shape index: {1}]  }
   0x1   :  { %17 = vsyncpa [#allocation6], 0 }
   0x2   :  { %18 = vsyncpa [#allocation9], 0 }
   0x3   :  { %19 = vsyncpa [#allocation12], 0 }
   0x4   :  { %20 = vsyncpa [#allocation15], 0 }
   0x5   :  { %21 = vsyncpa [#allocation4], 0 }
   0x6   :  { %22 = vsyncpa [#allocation19], 0  ;;  %s1456_s13 = smov [#allocation5]   ;;  %s1457_s15 = smov [#allocation8]  }
   0x7   :  { %s40_s14 = sshll.u32 %s1456_s13, 4  ;;  %s63_s16 = sshll.u32 %s1457_s15, 4  ;;  %s41_s14 = int_to_ptr.vmem [resolvable:$true] %s40_s14  ;;  %s1530_s16 = int_to_ptr.vmem [resolvable:$true] %s63_s16 }
   0x8   :  { %s1200_s19 = scalar_lea.hbm %s1732_s1, 256 }
   0x9   :  { %p1201_p0 = scmp.ne.s32.totalorder %s1732_s1, %s1200_s19  ;;  %p1204_p1 = scmp.lt.u32.totalorder %s1200_s19, %s1732_s1 }
   0xb   :  { %p1206_p2 = pnand %p1204_p1, %p1201_p0 }
   0xd   :  { %1209 = shalt.err (!%p1206_p2)
}
   0xe   :  { %s1210_s24 = scalar_lea.vmem %s41_s14, 256  ;;  %p1215_p4 = scmp.lt.s32.totalorder %s41_s14, %s41_s14 }
   0xf   :  { %p1211_p3 = scmp.ne.s32.totalorder %s41_s14, %s1210_s24  ;;  %p1216_p5 = scmp.lt.s32.totalorder %s1210_s24, %s1210_s24 }
  0x11   :  { %p1217_p6 = por %p1216_p5, %p1215_p4 }
  0x13   :  { %p1218_p7 = pnand %p1217_p6, %p1211_p3 }
  0x15   :  { %1221 = shalt.err (!%p1218_p7)
}
  0x16   :  { %s1458_s25 = smov 128   ;;  %s1459_s26 = smov 8  }
  0x17   :  { %46 = dma.hbm_to_vmem [thread:$0]  %s1732_s1, 256, %s41_s14, [#allocation6], %s1458_s25, %s1458_s25, %s1459_s26  }
  0x18   :  { %s1222_s11 = scalar_lea.hbm %s1734_s3, 16 }
  0x19   :  { %p1223_p8 = scmp.ne.s32.totalorder %s1734_s3, %s1222_s11  ;;  %p1226_p9 = scmp.lt.u32.totalorder %s1222_s11, %s1734_s3 }
  0x1b   :  { %p1228_p10 = pnand %p1226_p9, %p1223_p8 }
  0x1d   :  { %1231 = shalt.err (!%p1228_p10)
}
  0x1e   :  { %s1232_s18 = scalar_lea.vmem %s1530_s16, 16  ;;  %s1236_s1 = scalar_lea.vmem %s1530_s16, 32 }
  0x1f   :  { %p1233_p11 = scmp.ne.s32.totalorder %s1530_s16, %s1232_s18  ;;  %p1237_p12 = scmp.lt.s32.totalorder %s1530_s16, %s1530_s16 }
  0x20   :  { %p1238_p13 = scmp.lt.s32.totalorder %s1236_s1, %s1232_s18 }
  0x22   :  { %p1239_p0 = por %p1238_p13, %p1237_p12 }
  0x24   :  { %p1240_p1 = pnand %p1239_p0, %p1233_p11 }
  0x26   :  { %1243 = shalt.err (!%p1240_p1)
}
  0x27   :  { %66 = dma.hbm_to_vmem [thread:$0]  %s1734_s3, 16, %s1530_s16, [#allocation9]  }
  0x28   :  { %s1460_s20 = smov [#allocation11]   ;;  %s1244_s24 = scalar_lea.hbm %s1736_s5, 1024 }
  0x29   :  { %s82_s21 = sshll.u32 %s1460_s20, 4  ;;  %p1245_p2 = scmp.ne.s32.totalorder %s1736_s5, %s1244_s24  ;;  %s83_s21 = int_to_ptr.vmem [resolvable:$true] %s82_s21 }
  0x2a   :  { %p1248_p3 = scmp.lt.u32.totalorder %s1244_s24, %s1736_s5 }
  0x2c   :  { %p1250_p4 = pnand %p1248_p3, %p1245_p2 }
  0x2e   :  { %1253 = shalt.err (!%p1250_p4)
}
  0x2f   :  { %s1254_s11 = scalar_lea.vmem %s83_s21, 1024  ;;  %p1259_p6 = scmp.lt.s32.totalorder %s83_s21, %s83_s21 }
  0x30   :  { %p1255_p5 = scmp.ne.s32.totalorder %s83_s21, %s1254_s11  ;;  %p1260_p7 = scmp.lt.s32.totalorder %s1254_s11, %s1254_s11 }
  0x32   :  { %p1261_p8 = por %p1260_p7, %p1259_p6 }
  0x34   :  { %p1262_p9 = pnand %p1261_p8, %p1255_p5 }
  0x36   :  { %1265 = shalt.err (!%p1262_p9)
}
  0x37   :  { %s1461_s3 = smov 256   ;;  %s1462_s16 = smov 16  }
  0x38   :  { %88 = dma.hbm_to_vmem [thread:$0]  %s1736_s5, 1024, %s83_s21, [#allocation12], %s1461_s3, %s1461_s3, %s1462_s16  }
  0x39   :  { %s1463_s15 = smov [#allocation14]   ;;  %s1464_s18 = smov [#allocation2]  }
  0x3a   :  { %s106_s17 = sshll.u32 %s1463_s15, 4  ;;  %s28_s1 = sshll.u32 %s1464_s18, 4  ;;  %s107_s17 = int_to_ptr.vmem [resolvable:$true] %s106_s17  ;;  %s29_s1 = int_to_ptr.vmem [resolvable:$true] %s28_s1 }
  0x3b   :  { %s1266_s20 = scalar_lea.hbm %s1738_s7, 512 }
  0x3c   :  { %p1267_p10 = scmp.ne.s32.totalorder %s1738_s7, %s1266_s20  ;;  %p1270_p11 = scmp.lt.u32.totalorder %s1266_s20, %s1738_s7 }
  0x3e   :  { %p1272_p12 = pnand %p1270_p11, %p1267_p10 }
  0x40   :  { %1275 = shalt.err (!%p1272_p12)
}
  0x41   :  { %s1276_s5 = scalar_lea.vmem %s107_s17, 512  ;;  %p1281_p0 = scmp.lt.s32.totalorder %s107_s17, %s107_s17 }
  0x42   :  { %p1277_p13 = scmp.ne.s32.totalorder %s107_s17, %s1276_s5  ;;  %p1282_p1 = scmp.lt.s32.totalorder %s1276_s5, %s1276_s5 }
  0x44   :  { %p1283_p2 = por %p1282_p1, %p1281_p0 }
  0x46   :  { %p1284_p3 = pnand %p1283_p2, %p1277_p13 }
  0x48   :  { %1287 = shalt.err (!%p1284_p3)
}
  0x49   :  { %112 = dma.hbm_to_vmem [thread:$0]  %s1738_s7, 512, %s107_s17, [#allocation15], %s1458_s25, %s1458_s25, %s1459_s26  }
  0x4a   :  { %s1288_s11 = scalar_lea.hbm %s1731_s0, 256 }
  0x4b   :  { %p1289_p4 = scmp.ne.s32.totalorder %s1731_s0, %s1288_s11  ;;  %p1292_p5 = scmp.lt.u32.totalorder %s1288_s11, %s1731_s0 }
  0x4d   :  { %p1294_p6 = pnand %p1292_p5, %p1289_p4 }
  0x4f   :  { %1297 = shalt.err (!%p1294_p6)
}
  0x50   :  { %s1298_s15 = scalar_lea.vmem %s29_s1, 256  ;;  %p1303_p8 = scmp.lt.s32.totalorder %s29_s1, %s29_s1 }
  0x51   :  { %p1299_p7 = scmp.ne.s32.totalorder %s29_s1, %s1298_s15  ;;  %p1304_p9 = scmp.lt.s32.totalorder %s1298_s15, %s1298_s15 }
  0x53   :  { %p1305_p10 = por %p1304_p9, %p1303_p8 }
  0x55   :  { %p1306_p11 = pnand %p1305_p10, %p1299_p7 }
  0x57   :  { %1309 = shalt.err (!%p1306_p11)
}
  0x58   :  { %34 = dma.hbm_to_vmem [thread:$0]  %s1731_s0, 256, %s29_s1, [#allocation3], %s1458_s25, %s1458_s25, %s1459_s26  }
  0x59   :  { %s1465_s18 = smov [#allocation7]   ;;  %s1466_s19 = smov [#allocation10]  }
  0x5a   :  { %s53_s14 = sshll.u32 %s1465_s18, 4  ;;  %s73_s20 = sshll.u32 %s1466_s19, 4  ;;  %s54_s14 = int_to_ptr.vmem [resolvable:$true] %s53_s14  ;;  %s74_s20 = int_to_ptr.vmem [resolvable:$true] %s73_s20 }
  0x5b   :  { %s1310_s24 = scalar_lea.hbm %s1733_s2, 16 }
  0x5c   :  { %p1311_p12 = scmp.ne.s32.totalorder %s1733_s2, %s1310_s24  ;;  %p1314_p13 = scmp.lt.u32.totalorder %s1310_s24, %s1733_s2 }
  0x5e   :  { %p1316_p0 = pnand %p1314_p13, %p1311_p12 }
  0x60   :  { %1319 = shalt.err (!%p1316_p0)
}
  0x61   :  { %s1320_s0 = scalar_lea.vmem %s54_s14, 16  ;;  %s1324_s1 = scalar_lea.vmem %s54_s14, 32 }
  0x62   :  { %p1321_p1 = scmp.ne.s32.totalorder %s54_s14, %s1320_s0  ;;  %p1325_p2 = scmp.lt.s32.totalorder %s54_s14, %s54_s14 }
  0x63   :  { %p1326_p3 = scmp.lt.s32.totalorder %s1324_s1, %s1320_s0 }
  0x65   :  { %p1327_p4 = por %p1326_p3, %p1325_p2 }
  0x67   :  { %p1328_p5 = pnand %p1327_p4, %p1321_p1 }
  0x69   :  { %1331 = shalt.err (!%p1328_p5)
}
  0x6a   :  { %56 = dma.hbm_to_vmem [thread:$0]  %s1733_s2, 16, %s54_s14, [#allocation6]  }
  0x6b   :  { %s1332_s16 = scalar_lea.hbm %s1735_s4, 16 }
  0x6c   :  { %p1333_p6 = scmp.ne.s32.totalorder %s1735_s4, %s1332_s16  ;;  %p1336_p7 = scmp.lt.u32.totalorder %s1332_s16, %s1735_s4 }
  0x6e   :  { %p1338_p8 = pnand %p1336_p7, %p1333_p6 }
  0x70   :  { %1341 = shalt.err (!%p1338_p8)
}
  0x71   :  { %s1342_s17 = scalar_lea.vmem %s74_s20, 16  ;;  %s1346_s18 = scalar_lea.vmem %s74_s20, 32 }
  0x72   :  { %p1343_p9 = scmp.ne.s32.totalorder %s74_s20, %s1342_s17  ;;  %p1347_p10 = scmp.lt.s32.totalorder %s74_s20, %s74_s20 }
  0x73   :  { %p1348_p11 = scmp.lt.s32.totalorder %s1346_s18, %s1342_s17 }
  0x75   :  { %p1349_p12 = por %p1348_p11, %p1347_p10 }
  0x77   :  { %p1350_p13 = pnand %p1349_p12, %p1343_p9 }
  0x79   :  { %1353 = shalt.err (!%p1350_p13)
}
  0x7a   :  { %76 = dma.hbm_to_vmem [thread:$0]  %s1735_s4, 16, %s74_s20, [#allocation9]  }
  0x7b   :  { %s1467_s19 = smov [#allocation13]   ;;  %s1468_s23 = smov [#allocation16]  }
  0x7c   :  { %s94_s22 = sshll.u32 %s1467_s19, 4  ;;  %s118_s24 = sshll.u32 %s1468_s23, 4  ;;  %s95_s22 = int_to_ptr.vmem [resolvable:$true] %s94_s22  ;;  %s119_s24 = int_to_ptr.vmem [resolvable:$true] %s118_s24 }
  0x7d   :  { %s1354_s21 = scalar_lea.hbm %s1737_s6, 2560 }
  0x7e   :  { %p1355_p0 = scmp.ne.s32.totalorder %s1737_s6, %s1354_s21  ;;  %p1358_p1 = scmp.lt.u32.totalorder %s1354_s21, %s1737_s6 }
  0x80   :  { %p1360_p2 = pnand %p1358_p1, %p1355_p0 }
  0x82   :  { %1363 = shalt.err (!%p1360_p2)
}
  0x83   :  { %s1364_s4 = scalar_lea.vmem %s95_s22, 2560  ;;  %p1369_p4 = scmp.lt.s32.totalorder %s95_s22, %s95_s22 }
  0x84   :  { %p1365_p3 = scmp.ne.s32.totalorder %s95_s22, %s1364_s4  ;;  %p1370_p5 = scmp.lt.s32.totalorder %s1364_s4, %s1364_s4 }
  0x86   :  { %p1371_p6 = por %p1370_p5, %p1369_p4 }
  0x88   :  { %p1372_p7 = pnand %p1371_p6, %p1365_p3 }
  0x8a   :  { %1375 = shalt.err (!%p1372_p7)
}
  0x8b   :  { %100 = dma.hbm_to_vmem [thread:$0]  %s1737_s6, 2560, %s95_s22, [#allocation12], %s1458_s25, %s1458_s25, %s1459_s26  }
  0x8c   :  { %s1376_s16 = scalar_lea.hbm %s1739_s8, 1024 }
  0x8d   :  { %p1377_p8 = scmp.ne.s32.totalorder %s1739_s8, %s1376_s16  ;;  %p1380_p9 = scmp.lt.u32.totalorder %s1376_s16, %s1739_s8 }
  0x8f   :  { %p1382_p10 = pnand %p1380_p9, %p1377_p8 }
  0x91   :  { %1385 = shalt.err (!%p1382_p10)
}
  0x92   :  { %s1386_s17 = scalar_lea.vmem %s119_s24, 1024  ;;  %p1391_p12 = scmp.lt.s32.totalorder %s119_s24, %s119_s24 }
  0x93   :  { %p1387_p11 = scmp.ne.s32.totalorder %s119_s24, %s1386_s17  ;;  %p1392_p13 = scmp.lt.s32.totalorder %s1386_s17, %s1386_s17 }
  0x95   :  { %p1393_p0 = por %p1392_p13, %p1391_p12 }
  0x97   :  { %p1394_p1 = pnand %p1393_p0, %p1387_p11 }
  0x99   :  { %1397 = shalt.err (!%p1394_p1)
}
  0x9a   :  { %124 = dma.hbm_to_vmem [thread:$0]  %s1739_s8, 1024, %s119_s24, [#allocation15], %s1458_s25, %s1458_s25, %s1459_s26  }
  0x9b   :  { %1442 = dma.done.wait [#allocation3], 256  }
  0x9c   :  { %1443 = vsyncadd [#allocation3], 4294967040 }
  0x9d   :  { %1444 = dma.done.wait [#allocation6], 272  }
  0x9e   :  { %1445 = vsyncadd [#allocation6], 4294967024 }
  0x9f   :  { %1446 = dma.done.wait [#allocation9], 32  }
  0xa0   :  { %1447 = vsyncadd [#allocation9], 4294967264 }
  0xa1   :  { %1448 = dma.done.wait [#allocation12], 3584  }
  0xa2   :  { %1449 = vsyncadd [#allocation12], 4294963712 }
  0xa3   :  { %1450 = dma.done.wait [#allocation15], 1536  }
  0xa4   :  { %1451 = vsyncadd [#allocation15], 4294965760  ;;  %v1469_v0 = vmov 0.0   ;;  %v168_v1 = vld [vmem:[#allocation11 + $0x8] sm:$0xff]  ;;  %v170_v2 = vld [vmem:[#allocation11 + $0x18] sm:$0xff]  ;;  %vm175_vm0 = vcmask 261120  }
  0xa5   :  { %246 = vmatprep.mubr.f32.mxu0 %v1469_v0  ;;  %v167_v3 = vld [vmem:[#allocation11] sm:$0xff]  ;;  %v1097_v4 = vpack.c.bf16 %v170_v2, %v168_v1  ;;  %v169_v5 = vld [vmem:[#allocation11 + $0x10] sm:$0xff]  ;;  %v172_v6 = vld [vmem:[#allocation11 + $0x28] sm:$0xff]  ;;  %s1470_s8 = smov 32   ;;  %s1471_s2 = smov 96   ;;  %vm818_vm1 = vcmask 523264  }
  0xa6   :  { %v174_v7 = vld [vmem:[#allocation11 + $0x38] sm:$0xff]  ;;  %v1099_v8 = vpack.c.bf16 %v169_v5, %v167_v3  ;;  %v171_v10 = vld [vmem:[#allocation11 + $0x20] sm:$0xff]  ;;  %v173_v11 = vld [vmem:[#allocation11 + $0x30] sm:$0xff]  ;;  %s1472_s14 = smov 64   ;;  %s1473_s19 = smov [#allocation17]  }
  0xa7   :  { %v1101_v9 = vpack.c.bf16 %v174_v7, %v172_v6  ;;  %1098 = vmatprep.subr.bf16.mxu0 %v1097_v4  ;;  %v1661_v12 = vld [vmem:[#allocation5] sm:$0xff]  ;;  %v947_v13 = vld [vmem:[#allocation7] ss:$0 sm:$0xff]  ;;  %v1103_v14 = vpack.c.bf16 %v173_v11, %v171_v10  ;;  %v1666_v17 = vld [vmem:[#allocation5 + $0x8] sm:$0xff]  ;;  %s915_s22 = sshll.u32 %s1473_s19, 4  ;;  %s916_s22 = int_to_ptr.vmem [resolvable:$true] %s915_s22 }
  0xa8   :  { %1100 = vmatpush1.bf16.msra.mxu0 %v1099_v8  ;;  %v1663_v15 = vld [vmem:[#allocation2] sm:$0xff]  ;;  %v163_v16 = vmul.f32 %v947_v13, %v1661_v12  ;;  %v164_v19 = vmul.f32 %v947_v13, %v1666_v17  ;;  %v1670_v20 = vld [vmem:[#allocation2 + $0x8] sm:$0xff]  ;;  %v266_v24 = vld [vmem:[#allocation13 + $0x30] sm:$0xff]  ;;  %s1398_s23 = scalar_lea.vmem %s916_s22, 1024  ;;  %p1403_p3 = scmp.lt.s32.totalorder %s916_s22, %s916_s22 }
  0xa9   :  { %1102 = vmatprep.subr.bf16.mxu0 %v1101_v9  ;;  %v264_v22 = vld [vmem:[#allocation13 + $0x20] sm:$0xff]  ;;  %v265_v23 = vld [vmem:[#allocation13 + $0x28] sm:$0xff]  ;;  %v267_v26 = vld [vmem:[#allocation13 + $0x38] sm:$0xff]  ;;  %p1399_p2 = scmp.ne.s32.totalorder %s916_s22, %s1398_s23  ;;  %p1404_p4 = scmp.lt.s32.totalorder %s1398_s23, %s1398_s23 }
  0xaa   :  { %v165_v18 = vadd.f32 %v163_v16, %v1663_v15  ;;  %v166_v21 = vadd.f32 %v164_v19, %v1670_v20  ;;  %v1105_v25 = vpack.c.bf16 %v265_v23, %v264_v22  ;;  %v1109_v27 = vpack.c.bf16 %v267_v26, %v266_v24  ;;  %v356_v28 = vld [vmem:[#allocation13 + $0x40] sm:$0xff]  ;;  %v357_v29 = vld [vmem:[#allocation13 + $0x48] sm:$0xff]  ;;  %v358_v35 = vld [vmem:[#allocation13 + $0x50] sm:$0xff] }
  0xab   :  { %v1113_v30 = vpack.c.bf16 %v357_v29, %v356_v28  ;;  %v447_v31 = vld [vmem:[#allocation13 + $0x60] sm:$0xff]  ;;  %v448_v32 = vld [vmem:[#allocation13 + $0x68] sm:$0xff]  ;;  %v359_v36 = vld [vmem:[#allocation13 + $0x58] sm:$0xff]  ;;  %p1405_p5 = por %p1404_p4, %p1403_p3 }
  0xac   :  { %1104 = vmatpush1.bf16.msra.mxu0 %v1103_v14  ;;  %1106 = vmatprep.subr.bf16.mxu1 %v1105_v25  ;;  %v1121_v34 = vpack.c.bf16 %v448_v32, %v447_v31  ;;  %v1117_v38 = vpack.c.bf16 %v359_v36, %v358_v35  ;;  %v538_v41 = vld [vmem:[#allocation13 + $0x80] sm:$0xff]  ;;  %v539_v42 = vld [vmem:[#allocation13 + $0x88] sm:$0xff]  ;;  %v449_v48 = vld [vmem:[#allocation13 + $0x70] sm:$0xff] }
  0xad   :  { %1108 = vmatpush3.bf16.msra.mxu1 %v1105_v25  ;;  %1114 = vmatprep.subr.bf16.mxu0 %v1113_v30  ;;  %v1129_v43 = vpack.c.bf16 %v539_v42, %v538_v41  ;;  %v450_v49 = vld [vmem:[#allocation13 + $0x78] sm:$0xff]  ;;  %v626_v53 = vld [vmem:[#allocation13] sm:$0xff]  ;;  %v627_v54 = vld [vmem:[#allocation13 + $0x8] sm:$0xff]  ;;  %p1406_p6 = pnand %p1405_p5, %p1399_p2 }
  0xae   :  { %1110 = vmatprep.subr.bf16.mxu1 %v1109_v27  ;;  %v1125_v50 = vpack.c.bf16 %v450_v49, %v449_v48  ;;  %v540_v55 = vld [vmem:[#allocation13 + $0x90] sm:$0xff]  ;;  %v541_v56 = vld [vmem:[#allocation13 + $0x98] sm:$0xff]  ;;  %v1137_v59 = vpack.c.bf16 %v627_v54, %v626_v53  ;;  %v722_v2 = vld [vmem:[#allocation14] sm:$0xff] }
  0xaf   :  { %948 = vmatmul.mubr.msk.f32.vlgmr.msra.gmra.mrb[0].mxu0 %vm175_vm0, %v165_v18  ;;  %v1133_v60 = vpack.c.bf16 %v541_v56, %v540_v55  ;;  %v628_v61 = vld [vmem:[#allocation13 + $0x10] sm:$0xff]  ;;  %v629_v62 = vld [vmem:[#allocation13 + $0x18] sm:$0xff]  ;;  %v723_v3 = vld [vmem:[#allocation14 + $0x8] sm:$0xff] }
  0xb0   :  { %252 = vmatprep.mubr.f32.mxu0 %v1469_v0  ;;  %1116 = vmatpush3.bf16.msra.mxu0 %v1113_v30  ;;  %v1141_v0 = vpack.c.bf16 %v629_v62, %v628_v61  ;;  %v1145_v4 = vpack.c.bf16 %v723_v3, %v722_v2  ;;  %v724_v5 = vld [vmem:[#allocation14 + $0x10] sm:$0xff]  ;;  %v725_v6 = vld [vmem:[#allocation14 + $0x18] sm:$0xff]  ;;  %v810_v8 = vld [vmem:[#allocation16] sm:$0xff] }
  0xb1   :  { %1112 = vmatpush3.bf16.msra.mxu1 %v1109_v27  ;;  %1118 = vmatprep.subr.bf16.mxu0 %v1117_v38  ;;  %v1149_v7 = vpack.c.bf16 %v725_v6, %v724_v5  ;;  %v811_v9 = vld [vmem:[#allocation16 + $0x8] sm:$0xff]  ;;  %v960_v23 = vld [vmem:[#allocation8] ss:$0 sm:$0xff]  ;;  %v812_v32 = vld [vmem:[#allocation16 + $0x10] sm:$0xff] }
  0xb2   :  { %1122 = vmatprep.subr.bf16.mxu1 %v1121_v34  ;;  %v1153_v10 = vpack.c.bf16 %v811_v9, %v810_v8  ;;  %v814_v35 = vld [vmem:[#allocation16 + $0x20] sm:$0xff]  ;;  %v815_v36 = vld [vmem:[#allocation16 + $0x28] sm:$0xff] }
  0xb3   :  { %949 = vmatmul.mubr.msk.f32.gmra.mrb[2].mxu0 %vm175_vm0, %v166_v21 }
  0xb4   :  { %1120 = vmatpush3.bf16.msra.mxu0 %v1117_v38  ;;  %v1161_v38 = vpack.c.bf16 %v815_v36, %v814_v35 }
  0xb5   :  { %1130 = vmatprep.subr.bf16.mxu0 %v1129_v43 }
 0x182   :  { %v248_v33 = vpop.f32.mrb[0].mxu0 }
 0x183   :  { %1188 = vtanh.f32 %v248_v33  ;;  %v250_v37 = vpop.f32.mrb[1].mxu0  ;;  %v813_v33 = vld [vmem:[#allocation16 + $0x18] sm:$0xff] }
 0x186   :  { %v254_v39 = vpop.f32.mrb[2].mxu0 }
 0x187   :  { %1190 = vtanh.f32 %v254_v39  ;;  %v256_v40 = vpop.f32.mrb[3].mxu0 }
 0x188   :  { %1192 = vtanh.f32 %v250_v37  ;;  %v816_v37 = vld [vmem:[#allocation16 + $0x30] sm:$0xff] }
 0x189   :  { %1194 = vtanh.f32 %v256_v40 }
 0x18d   :  { %v1189_v44 = vpop.eup %1188 }
 0x18e   :  { %451 = vrot.lane.b32.xlu1 %v1189_v44, %s1470_s8  ;;  %270 = vrot.lane.b32.xlu0 %v1189_v44, %s1471_s2 }
 0x191   :  { %v1191_v45 = vpop.eup %1190 }
 0x192   :  { %453 = vrot.lane.b32.xlu1 %v1191_v45, %s1470_s8  ;;  %272 = vrot.lane.b32.xlu0 %v1191_v45, %s1471_s2  ;;  %v1193_v63 = vpop.eup %1192 }
 0x193   :  { %v1195_v1 = vpop.eup %1194 }
 0x196   :  { %362 = vrot.lane.b32.xlu1 %v1191_v45, %s1472_s14  ;;  %360 = vrot.lane.b32.xlu0 %v1189_v44, %s1472_s14 }
 0x200   :  { %v452_v46 = vpop.permute.xlu1 %451  ;;  %v271_v47 = vpop.permute.xlu0 %270 }
 0x201   :  { %1020 = vmatprep.mubr.msk.f32.mxu1 %vm175_vm0, %v271_v47 }
 0x204   :  { %v454_v51 = vpop.permute.xlu1 %453  ;;  %v273_v52 = vpop.permute.xlu0 %272 }
 0x205   :  { %1021 = vmatmul.mubr.msk.f32.vlgmr.msra.gmra.mrb[0].mxu1 %vm175_vm0, %v273_v52 }
 0x206   :  { %1124 = vmatpush3.bf16.msra.mxu1 %v1121_v34  ;;  %1042 = vmatprep.mubr.msk.f32.mxu1 %vm175_vm0, %v452_v46  ;;  %v1157_v34 = vpack.c.bf16 %v813_v33, %v812_v32 }
 0x207   :  { %1126 = vmatprep.subr.bf16.mxu1 %v1125_v50 }
 0x208   :  { %v363_v57 = vpop.permute.xlu1 %362  ;;  %v361_v58 = vpop.permute.xlu0 %360 }
 0x209   :  { %1031 = vmatprep.mubr.msk.f32.mxu0 %vm175_vm0, %v361_v58 }
 0x20a   :  { %1128 = vmatpush3.bf16.msra.mxu1 %v1125_v50  ;;  %1032 = vmatmul.mubr.msk.f32.vlgmr.msra.gmra.mrb[4].mxu0 %vm175_vm0, %v363_v57 }
 0x20b   :  { %1132 = vmatpush3.bf16.msra.mxu0 %v1129_v43  ;;  %1053 = vmatprep.mubr.msk.f32.mxu0 %vm175_vm0, %v1193_v63 }
 0x20c   :  { %1138 = vmatprep.subr.bf16.mxu1 %v1137_v59  ;;  %1134 = vmatprep.subr.bf16.mxu0 %v1133_v60 }
 0x20d   :  { %1043 = vmatmul.mubr.msk.f32.vlgmr.msra.gmra.mrb[2].mxu1 %vm175_vm0, %v454_v51 }
 0x20e   :  { %1140 = vmatpush3.bf16.msra.mxu1 %v1137_v59  ;;  %1064 = vmatprep.mubr.msk.f32.mxu1 %vm175_vm0, %v1189_v44 }
 0x20f   :  { %1136 = vmatpush3.bf16.msra.mxu0 %v1133_v60  ;;  %1142 = vmatprep.subr.bf16.mxu1 %v1141_v0 }
 0x210   :  { %1146 = vmatprep.subr.bf16.mxu0 %v1145_v4 }
 0x212   :  { %1054 = vmatmul.mubr.msk.f32.vlgmr.msra.gmra.mrb[6].mxu0 %vm175_vm0, %v1195_v1  ;;  %1144 = vmatpush3.bf16.msra.mxu1 %v1141_v0 }
 0x213   :  { %1148 = vmatpush3.bf16.msra.mxu0 %v1145_v4  ;;  %1154 = vmatprep.subr.bf16.mxu1 %v1153_v10 }
 0x214   :  { %1150 = vmatprep.subr.bf16.mxu0 %v1149_v7 }
 0x215   :  { %1065 = vmatmul.mubr.msk.f32.vlgmr.msra.gmra.mrb[4].mxu1 %vm175_vm0, %v1191_v45 }
 0x216   :  { %1156 = vmatpush3.bf16.msra.mxu1 %v1153_v10 }
 0x217   :  { %1152 = vmatpush3.bf16.msra.mxu0 %v1149_v7  ;;  %1158 = vmatprep.subr.bf16.mxu1 %v1157_v34 }
 0x21a   :  { %1160 = vmatpush3.bf16.msra.mxu1 %v1157_v34 }
 0x21b   :  { %1162 = vmatprep.subr.bf16.mxu1 %v1161_v38 }
 0x21e   :  { %1164 = vmatpush3.bf16.msra.mxu1 %v1161_v38 }
 0x2d8   :  { %v1022_v11 = vpop.f32.mrb[0].mxu1 }
 0x2d9   :  { %354 = vst.msk [vmem:[#allocation17 + $0x8] sm:$0xff] %vm175_vm0, %v1022_v11  ;;  %v344_v13 = vpop.f32.mrb[1].mxu1 }
 0x2da   :  { %353 = vst.msk [vmem:[#allocation17] sm:$0xff] %vm175_vm0, %v344_v13 }
 0x2dd   :  { %v1033_v14 = vpop.f32.mrb[4].mxu0 }
 0x2de   :  { %445 = vst.msk [vmem:[#allocation17 + $0x18] sm:$0xff] %vm175_vm0, %v1033_v14  ;;  %v434_v16 = vpop.f32.mrb[5].mxu0 }
 0x2df   :  { %444 = vst.msk [vmem:[#allocation17 + $0x10] sm:$0xff] %vm175_vm0, %v434_v16 }
 0x2e0   :  { %v1044_v18 = vpop.f32.mrb[2].mxu1 }
 0x2e1   :  { %536 = vst.msk [vmem:[#allocation17 + $0x28] sm:$0xff] %vm175_vm0, %v1044_v18  ;;  %v525_v19 = vpop.f32.mrb[3].mxu1 }
 0x2e2   :  { %535 = vst.msk [vmem:[#allocation17 + $0x20] sm:$0xff] %vm175_vm0, %v525_v19 }
 0x2e5   :  { %v1055_v21 = vpop.f32.mrb[6].mxu0 }
 0x2e6   :  { %625 = vst.msk [vmem:[#allocation17 + $0x38] sm:$0xff] %vm175_vm0, %v1055_v21  ;;  %v614_v22 = vpop.f32.mrb[7].mxu0 }
 0x2e7   :  { %624 = vst.msk [vmem:[#allocation17 + $0x30] sm:$0xff] %vm175_vm0, %v614_v22 }
 0x2e8   :  { %v1066_v24 = vpop.f32.mrb[4].mxu1 }
 0x2e9   :  { %v717_v25 = vadd.f32 %v1066_v24, %v960_v23  ;;  %v700_v26 = vpop.f32.mrb[5].mxu1 }
 0x2ea   :  { %v716_v27 = vadd.f32 %v960_v23, %v700_v26 }
 0x2eb   :  { %v719_v28 = vmul.f32 %v717_v25, %v1666_v17  ;;  %v817_v17 = vld [vmem:[#allocation16 + $0x38] sm:$0xff] }
 0x2ec   :  { %v718_v29 = vmul.f32 %v716_v27, %v1661_v12  ;;  %v1165_v39 = vpack.c.bf16 %v817_v17, %v816_v37 }
 0x2ed   :  { %v721_v31 = vadd.f32 %v719_v28, %v1670_v20 }
 0x2ee   :  { %v720_v30 = vadd.f32 %v718_v29, %v1663_v15  ;;  %1166 = vmatprep.subr.bf16.mxu1 %v1165_v39 }
 0x2ef   :  { %1168 = vmatpush3.bf16.msra.mxu1 %v1165_v39 }
 0x2f0   :  { %1075 = vmatprep.mubr.msk.f32.mxu0 %vm175_vm0, %v720_v30 }
 0x2f1   :  { %1076 = vmatmul.mubr.msk.f32.vlgmr.msra.gmra.mrb[8].mxu0 %vm175_vm0, %v721_v31 }
 0x3c4   :  { %v1077_v12 = vpop.f32.mrb[8].mxu0 }
 0x3c5   :  { %v798_v15 = vpop.f32.mrb[9].mxu0 }
 0x3c6   :  { %1196 = vtanh.f32 %v798_v15 }
 0x3c7   :  { %1198 = vtanh.f32 %v1077_v12 }
 0x3d0   :  { %v1197_v20 = vpop.eup %1196 }
 0x3d1   :  { %v1199_v40 = vpop.eup %1198  ;;  %1094 = vmatprep.mubr.msk.f32.mxu1 %vm818_vm1, %v1197_v20 }
 0x3d2   :  { %1095 = vmatmul.mubr.msk.f32.vlgmr.msra.gmra.mrb[6].mxu1 %vm818_vm1, %v1199_v40 }
 0x3d3   :  { %1409 = shalt.err (!%p1406_p6)
}
 0x3d4   :  { %s1410_s5 = scalar_lea.hbm %s1740_s9, 1024 }
 0x3d5   :  { %p1411_p7 = scmp.ne.s32.totalorder %s1740_s9, %s1410_s5  ;;  %p1414_p8 = scmp.lt.u32.totalorder %s1410_s5, %s1740_s9 }
 0x3d7   :  { %p1416_p9 = pnand %p1414_p8, %p1411_p7 }
 0x3d9   :  { %1419 = shalt.err (!%p1416_p9)
}
 0x3da   :  { %921 = dma.vmem_to_hbm [thread:$0]  %s916_s22, 1024, %s1740_s9, [#allocation4], %s1458_s25, %s1458_s25, %s1459_s26   ;;  %v965_v41 = vld [vmem:[#allocation10] ss:$0 sm:$0xff] }
 0x3db   :  { %s1474_s20 = smov [#allocation18]  }
 0x3dc   :  { %s927_s30 = sshll.u32 %s1474_s20, 4  ;;  %s928_s30 = int_to_ptr.vmem [resolvable:$true] %s927_s30 }
 0x3dd   :  { %s1420_s11 = scalar_lea.vmem %s928_s30, 256  ;;  %p1425_p11 = scmp.lt.s32.totalorder %s928_s30, %s928_s30 }
 0x3de   :  { %p1421_p10 = scmp.ne.s32.totalorder %s928_s30, %s1420_s11  ;;  %p1426_p12 = scmp.lt.s32.totalorder %s1420_s11, %s1420_s11 }
 0x3e0   :  { %p1427_p13 = por %p1426_p12, %p1425_p11 }
 0x3e2   :  { %p1428_p0 = pnand %p1427_p13, %p1421_p10 }
 0x4a5   :  { %v1096_v42 = vpop.f32.mrb[6].mxu1 }
 0x4a6   :  { %v907_v43 = vadd.f32 %v1096_v42, %v965_v41  ;;  %v891_v44 = vpop.f32.mrb[7].mxu1 }
 0x4a7   :  { %v906_v45 = vadd.f32 %v965_v41, %v891_v44 }
 0x4a8   :  { %909 = vst.msk [vmem:[#allocation18 + $0x8] sm:$0xff] %vm175_vm0, %v907_v43 }
 0x4a9   :  { %908 = vst.msk [vmem:[#allocation18] sm:$0xff] %vm175_vm0, %v906_v45 }
 0x4aa   :  { %1431 = shalt.err (!%p1428_p0)
}
 0x4ab   :  { %s1432_s16 = scalar_lea.hbm %s1741_s10, 256 }
 0x4ac   :  { %p1433_p1 = scmp.ne.s32.totalorder %s1741_s10, %s1432_s16  ;;  %p1436_p2 = scmp.lt.u32.totalorder %s1432_s16, %s1741_s10 }
 0x4ae   :  { %p1438_p3 = pnand %p1436_p2, %p1433_p1 }
 0x4b0   :  { %1441 = shalt.err (!%p1438_p3)
}
 0x4b1   :  { %933 = dma.vmem_to_hbm [thread:$0]  %s928_s30, 256, %s1741_s10, [#allocation19], %s1458_s25, %s1458_s25, %s1459_s26  }
 0x4b2   :  { %1452 = dma.done.wait [#allocation4], 1024  }
 0x4b3   :  { %1453 = vsyncadd [#allocation4], 4294966272 }
 0x4b4   :  { %1454 = dma.done.wait [#allocation19], 256  }
 0x4b5   :  { %1455 = vsyncadd [#allocation19], 4294967040 }
 0x4b6   :  { %940 = vsyncpa [#allocation3], 1 }
 0x4b7   :  { %941 = vsyncpa [#allocation6], 1 }
 0x4b8   :  { %942 = vsyncpa [#allocation9], 1 }
 0x4b9   :  { %943 = vsyncpa [#allocation12], 1 }
 0x4ba   :  { %944 = vsyncpa [#allocation15], 1 }
 0x4bb   :  { %945 = vsyncpa [#allocation4], 1 }
 0x4bc   :  { %946 = vsyncpa [#allocation19], 1 }

// kernel: block_forward.14
= control target key start
LH: loop header
LB: loop body
LE: loop exit
PB: predicated region body
PF: predicated region fallthrough
CT: control target
= control target key end

     0   :  { %8 = vsyncpa [#allocation3], 0  ;;  %s116_s12 = smov [#allocation2]   ;;  %s169_s0 = inlined_call_operand.hbm [shape: f32[16,32], index: 0, kind: input, shape index: {}]   ;;  %s170_s1 = inlined_call_operand.vmem [shape: f32[1,32], index: 1, kind: input, shape index: {}]   ;;  %s171_s2 = inlined_call_operand.vmem [shape: f32[1,32], index: 2, kind: input, shape index: {}]   ;;  %s172_s3 = inlined_call_operand.vmem [shape: f32[16,32], index: 3, kind: output, shape index: {}]  }
   0x1   :  { %s14_s13 = sshll.u32 %s116_s12, 4  ;;  %s92_s16 = scalar_lea.hbm %s169_s0, 256  ;;  %s15_s13 = int_to_ptr.vmem [resolvable:$true] %s14_s13 }
   0x2   :  { %p93_p0 = scmp.ne.s32.totalorder %s169_s0, %s92_s16  ;;  %p96_p1 = scmp.lt.u32.totalorder %s92_s16, %s169_s0 }
   0x4   :  { %p98_p2 = pnand %p96_p1, %p93_p0 }
   0x6   :  { %101 = shalt.err (!%p98_p2)
}
   0x7   :  { %s102_s21 = scalar_lea.vmem %s15_s13, 256  ;;  %p107_p4 = scmp.lt.s32.totalorder %s15_s13, %s15_s13 }
   0x8   :  { %p103_p3 = scmp.ne.s32.totalorder %s15_s13, %s102_s21  ;;  %p108_p5 = scmp.lt.s32.totalorder %s102_s21, %s102_s21 }
   0xa   :  { %p109_p6 = por %p108_p5, %p107_p4 }
   0xc   :  { %p110_p7 = pnand %p109_p6, %p103_p3 }
   0xe   :  { %113 = shalt.err (!%p110_p7)
}
   0xf   :  { %s117_s22 = smov 128   ;;  %s118_s23 = smov 8  }
  0x10   :  { %20 = dma.hbm_to_vmem [thread:$0]  %s169_s0, 256, %s15_s13, [#allocation3], %s117_s22, %s117_s22, %s118_s23  }
  0x11   :  { %114 = dma.done.wait [#allocation3], 256  }
  0x12   :  { %115 = vsyncadd [#allocation3], 4294967040  ;;  %vm30_vm0 = vcmask 261120   ;;  %v28_v0 = vld [vmem:[#allocation2] sm:$0xff]  ;;  %v29_v1 = vld [vmem:[#allocation2 + $0x8] sm:$0xff] }
  0x13   :  { %v31_v2 = vsel %vm30_vm0, %v28_v0, 0.0  ;;  %v34_v3 = vsel %vm30_vm0, %v29_v1, 0.0  ;;  %v83_v21 = vld [vmem:[%s170_s1] ss:$0 sm:$0xff] }
  0x14   :  { %32 = vadd.xlane.f32.xlu0 %v31_v2  ;;  %v84_v23 = vld [vmem:[%s171_s2] ss:$0 sm:$0xff] }
  0x18   :  { %35 = vadd.xlane.f32.xlu0 %v34_v3 }
  0xa1   :  { %v33_v4 = vpop.xlane.xlu0 %32 }
  0xa2   :  { %v38_v5 = vmul.f32 0.03125, %v33_v4 }
  0xa4   :  { %v40_v6 = vsub.f32 %v28_v0, %v38_v5 }
  0xa5   :  { %v36_v7 = vpop.xlane.xlu0 %35 }
  0xa6   :  { %v39_v8 = vmul.f32 0.03125, %v36_v7  ;;  %v42_v9 = vmul.f32 %v40_v6, %v40_v6 }
  0xa8   :  { %v41_v10 = vsub.f32 %v29_v1, %v39_v8  ;;  %v44_v11 = vsel %vm30_vm0, %v42_v9, 0.0 }
  0xa9   :  { %45 = vadd.xlane.f32.xlu1 %v44_v11 }
  0xaa   :  { %v43_v12 = vmul.f32 %v41_v10, %v41_v10 }
  0xac   :  { %v47_v13 = vsel %vm30_vm0, %v43_v12, 0.0 }
  0xad   :  { %48 = vadd.xlane.f32.xlu1 %v47_v13 }
 0x136   :  { %v46_v14 = vpop.xlane.xlu1 %45 }
 0x137   :  { %v50_v15 = vmul.f32 0.03125, %v46_v14 }
 0x139   :  { %v52_v16 = vadd.f32 1e-05, %v50_v15 }
 0x13a   :  { %v49_v17 = vpop.xlane.xlu1 %48 }
 0x13b   :  { %88 = vrsqrt.f32 %v52_v16  ;;  %v51_v18 = vmul.f32 0.03125, %v49_v17 }
 0x13d   :  { %v53_v19 = vadd.f32 1e-05, %v51_v18 }
 0x13f   :  { %90 = vrsqrt.f32 %v53_v19 }
 0x145   :  { %v89_v20 = vpop.eup %88 }
 0x146   :  { %v56_v22 = vmul.f32 %v89_v20, %v40_v6 }
 0x148   :  { %v65_v24 = vmul.f32 %v83_v21, %v56_v22 }
 0x149   :  { %v91_v25 = vpop.eup %90 }
 0x14a   :  { %v74_v26 = vadd.f32 %v84_v23, %v65_v24  ;;  %v57_v27 = vmul.f32 %v91_v25, %v41_v10 }
 0x14c   :  { %76 = vst.msk [vmem:[%s172_s3] sm:$0xff] %vm30_vm0, %v74_v26  ;;  %v66_v28 = vmul.f32 %v83_v21, %v57_v27 }
 0x14e   :  { %v75_v29 = vadd.f32 %v84_v23, %v66_v28 }
 0x150   :  { %77 = vst.msk [vmem:[%s172_s3 + $0x8] sm:$0xff] %vm30_vm0, %v75_v29 }
 0x151   :  { %82 = vsyncpa [#allocation3], 1 }

// kernel: block_forward.15
= control target key start
LH: loop header
LB: loop body
LE: loop exit
PB: predicated region body
PF: predicated region fallthrough
CT: control target
= control target key end

     0   :  { %9 = vsyncpa [#allocation4], 0  ;;  %s495_s0 = inlined_call_operand.hbm [shape: f32[16,32], index: 0, kind: input, shape index: {}]   ;;  %s496_s1 = inlined_call_operand.hbm [shape: f32[16,32], index: 1, kind: input, shape index: {}]   ;;  %s497_s2 = inlined_call_operand.hbm [shape: f32[1,32], index: 2, kind: input, shape index: {}]   ;;  %s498_s3 = inlined_call_operand.hbm [shape: f32[32,112], index: 3, kind: input, shape index: {}]   ;;  %s499_s4 = inlined_call_operand.hbm [shape: f32[16,112], index: 4, kind: output, shape index: {}]  }
   0x1   :  { %10 = vsyncpa [#allocation7], 0 }
   0x2   :  { %11 = vsyncpa [#allocation10], 0 }
   0x3   :  { %12 = vsyncpa [#allocation5], 0  ;;  %s370_s15 = smov [#allocation6]   ;;  %s371_s17 = smov [#allocation3]  }
   0x4   :  { %s30_s16 = sshll.u32 %s370_s15, 4  ;;  %s18_s18 = sshll.u32 %s371_s17, 4  ;;  %s31_s16 = int_to_ptr.vmem [resolvable:$true] %s30_s16  ;;  %s403_s18 = int_to_ptr.vmem [resolvable:$true] %s18_s18 }
   0x5   :  { %s252_s21 = scalar_lea.hbm %s496_s1, 256 }
   0x6   :  { %p253_p0 = scmp.ne.s32.totalorder %s496_s1, %s252_s21  ;;  %p256_p1 = scmp.lt.u32.totalorder %s252_s21, %s496_s1 }
   0x8   :  { %p258_p2 = pnand %p256_p1, %p253_p0 }
   0xa   :  { %261 = shalt.err (!%p258_p2)
}
   0xb   :  { %s262_s26 = scalar_lea.vmem %s31_s16, 256  ;;  %p267_p4 = scmp.lt.s32.totalorder %s31_s16, %s31_s16 }
   0xc   :  { %p263_p3 = scmp.ne.s32.totalorder %s31_s16, %s262_s26  ;;  %p268_p5 = scmp.lt.s32.totalorder %s262_s26, %s262_s26 }
   0xe   :  { %p269_p6 = por %p268_p5, %p267_p4 }
  0x10   :  { %p270_p7 = pnand %p269_p6, %p263_p3 }
  0x12   :  { %273 = shalt.err (!%p270_p7)
}
  0x13   :  { %s372_s27 = smov 128   ;;  %s373_s28 = smov 8  }
  0x14   :  { %36 = dma.hbm_to_vmem [thread:$0]  %s496_s1, 256, %s31_s16, [#allocation7], %s372_s27, %s372_s27, %s373_s28  }
  0x15   :  { %s274_s7 = scalar_lea.hbm %s495_s0, 256 }
  0x16   :  { %p275_p8 = scmp.ne.s32.totalorder %s495_s0, %s274_s7  ;;  %p278_p9 = scmp.lt.u32.totalorder %s274_s7, %s495_s0 }
  0x18   :  { %p280_p10 = pnand %p278_p9, %p275_p8 }
  0x1a   :  { %283 = shalt.err (!%p280_p10)
}
  0x1b   :  { %s284_s12 = scalar_lea.vmem %s403_s18, 256  ;;  %p289_p12 = scmp.lt.s32.totalorder %s403_s18, %s403_s18 }
  0x1c   :  { %p285_p11 = scmp.ne.s32.totalorder %s403_s18, %s284_s12  ;;  %p290_p13 = scmp.lt.s32.totalorder %s284_s12, %s284_s12 }
  0x1e   :  { %p291_p0 = por %p290_p13, %p289_p12 }
  0x20   :  { %p292_p1 = pnand %p291_p0, %p285_p11 }
  0x22   :  { %295 = shalt.err (!%p292_p1)
}
  0x23   :  { %24 = dma.hbm_to_vmem [thread:$0]  %s495_s0, 256, %s403_s18, [#allocation4], %s372_s27, %s372_s27, %s373_s28  }
  0x24   :  { %s374_s14 = smov [#allocation8]   ;;  %s375_s16 = smov [#allocation9]  }
  0x25   :  { %s43_s15 = sshll.u32 %s374_s14, 4  ;;  %s52_s17 = sshll.u32 %s375_s16, 4  ;;  %s44_s15 = int_to_ptr.vmem [resolvable:$true] %s43_s15  ;;  %s440_s17 = int_to_ptr.vmem [resolvable:$true] %s52_s17 }
  0x26   :  { %s296_s21 = scalar_lea.hbm %s497_s2, 16 }
  0x27   :  { %p297_p2 = scmp.ne.s32.totalorder %s497_s2, %s296_s21  ;;  %p300_p3 = scmp.lt.u32.totalorder %s296_s21, %s497_s2 }
  0x29   :  { %p302_p4 = pnand %p300_p3, %p297_p2 }
  0x2b   :  { %305 = shalt.err (!%p302_p4)
}
  0x2c   :  { %s306_s0 = scalar_lea.vmem %s44_s15, 16  ;;  %s310_s18 = scalar_lea.vmem %s44_s15, 32 }
  0x2d   :  { %p307_p5 = scmp.ne.s32.totalorder %s44_s15, %s306_s0  ;;  %p311_p6 = scmp.lt.s32.totalorder %s44_s15, %s44_s15 }
  0x2e   :  { %p312_p7 = scmp.lt.s32.totalorder %s310_s18, %s306_s0 }
  0x30   :  { %p313_p8 = por %p312_p7, %p311_p6 }
  0x32   :  { %p314_p9 = pnand %p313_p8, %p307_p5 }
  0x34   :  { %317 = shalt.err (!%p314_p9)
}
  0x35   :  { %46 = dma.hbm_to_vmem [thread:$0]  %s497_s2, 16, %s44_s15, [#allocation7]  }
  0x36   :  { %s318_s6 = scalar_lea.hbm %s498_s3, 512 }
  0x37   :  { %p319_p10 = scmp.ne.s32.totalorder %s498_s3, %s318_s6  ;;  %p322_p11 = scmp.lt.u32.totalorder %s318_s6, %s498_s3 }
  0x39   :  { %p324_p12 = pnand %p322_p11, %p319_p10 }
  0x3b   :  { %327 = shalt.err (!%p324_p12)
}
  0x3c   :  { %s328_s11 = scalar_lea.vmem %s440_s17, 512  ;;  %p333_p0 = scmp.lt.s32.totalorder %s440_s17, %s440_s17 }
  0x3d   :  { %p329_p13 = scmp.ne.s32.totalorder %s440_s17, %s328_s11  ;;  %p334_p1 = scmp.lt.s32.totalorder %s328_s11, %s328_s11 }
  0x3f   :  { %p335_p2 = por %p334_p1, %p333_p0 }
  0x41   :  { %p336_p3 = pnand %p335_p2, %p329_p13 }
  0x43   :  { %339 = shalt.err (!%p336_p3)
}
  0x44   :  { %58 = dma.hbm_to_vmem [thread:$0]  %s498_s3, 512, %s440_s17, [#allocation10], %s372_s27, %s372_s27, %s373_s28  }
  0x45   :  { %362 = dma.done.wait [#allocation4], 256  }
  0x46   :  { %363 = vsyncadd [#allocation4], 4294967040 }
  0x47   :  { %364 = dma.done.wait [#allocation7], 272  }
  0x48   :  { %365 = vsyncadd [#allocation7], 4294967024 }
  0x49   :  { %366 = dma.done.wait [#allocation10], 512  }
  0x4a   :  { %367 = vsyncadd [#allocation10], 4294966784  ;;  %vm75_vm0 = vcmask 916480   ;;  %v376_v0 = vmov 0.0   ;;  %v95_v1 = vld [vmem:[#allocation9] sm:$0xff]  ;;  %v96_v2 = vld [vmem:[#allocation9 + $0x8] sm:$0xff] }
  0x4b   :  { %77 = vst.msk [vmem:[#allocation2 + $0x8] sm:$0xff] %vm75_vm0, %v376_v0  ;;  %76 = vst.msk [vmem:[#allocation2] sm:$0xff] %vm75_vm0, %v376_v0  ;;  %v97_v3 = vld [vmem:[#allocation9 + $0x10] sm:$0xff]  ;;  %v236_v4 = vpack.c.bf16 %v96_v2, %v95_v1  ;;  %v98_v5 = vld [vmem:[#allocation9 + $0x18] sm:$0xff]  ;;  %vm99_vm1 = vcmask 261120   ;;  %s377_s3 = smov [#allocation11]  }
  0x4c   :  { %v80_v6 = vld [vmem:[#allocation6] sm:$0xff]  ;;  %v240_v7 = vpack.c.bf16 %v98_v5, %v97_v3  ;;  %v78_v8 = vld [vmem:[#allocation3] sm:$0xff]  ;;  %v81_v9 = vld [vmem:[#allocation6 + $0x8] sm:$0xff]  ;;  %s202_s1 = sshll.u32 %s377_s3, 4  ;;  %s203_s1 = int_to_ptr.vmem [resolvable:$true] %s202_s1 }
  0x4d   :  { %v216_v10 = vld [vmem:[#allocation8] ss:$0 sm:$0xff]  ;;  %237 = vmatprep.subr.bf16.mxu0 %v236_v4  ;;  %v79_v13 = vld [vmem:[#allocation3 + $0x8] sm:$0xff]  ;;  %s340_s13 = scalar_lea.vmem %s203_s1, 256  ;;  %p345_p5 = scmp.lt.s32.totalorder %s203_s1, %s203_s1 }
  0x4e   :  { %v89_v11 = vmul.f32 %v216_v10, %v80_v6  ;;  %v90_v12 = vmul.f32 %v216_v10, %v81_v9  ;;  %239 = vmatpush3.bf16.msra.mxu0 %v236_v4  ;;  %p341_p4 = scmp.ne.s32.totalorder %s203_s1, %s340_s13  ;;  %p346_p6 = scmp.lt.s32.totalorder %s340_s13, %s340_s13 }
  0x4f   :  { %241 = vmatprep.subr.bf16.mxu0 %v240_v7 }
  0x50   :  { %v91_v14 = vadd.f32 %v89_v11, %v78_v8  ;;  %v92_v15 = vadd.f32 %v90_v12, %v79_v13  ;;  %p347_p7 = por %p346_p6, %p345_p5 }
  0x52   :  { %233 = vmatprep.mubr.msk.f32.mxu0 %vm99_vm1, %v91_v14  ;;  %243 = vmatpush3.bf16.msra.mxu0 %v240_v7  ;;  %v94_v16 = vld [vmem:[#allocation2 + $0x8] sm:$0xff]  ;;  %v93_v17 = vld [vmem:[#allocation2] sm:$0xff]  ;;  %p348_p8 = pnand %p347_p7, %p341_p4 }
  0x55   :  { %234 = vmatmul.mubr.msk.f32.vlgmr.msra.gmra.mrb[0].mxu0 %vm99_vm1, %v92_v15 }
 0x128   :  { %v235_v18 = vpop.f32.mrb[0].mxu0 }
 0x129   :  { %v182_v19 = vadd.f32 %v235_v18, %v94_v16  ;;  %v172_v20 = vpop.f32.mrb[1].mxu0 }
 0x12a   :  { %v181_v21 = vadd.f32 %v172_v20, %v93_v17 }
 0x12b   :  { %185 = vst.msk [vmem:[#allocation2 + $0x8] sm:$0xff] %vm75_vm0, %v182_v19 }
 0x12c   :  { %184 = vst.msk [vmem:[#allocation2] sm:$0xff] %vm75_vm0, %v181_v21 }
 0x132   :  { %v190_v22 = vld [vmem:[#allocation2 + $0x8] sm:$0xff] }
 0x133   :  { %v189_v23 = vld [vmem:[#allocation2] sm:$0xff]  ;;  %v192_v24 = vmax.f32 %v190_v22, 0.0 }
 0x134   :  { %v191_v25 = vmax.f32 %v189_v23, 0.0 }
 0x135   :  { %v194_v26 = vmul.f32 %v192_v24, %v192_v24 }
 0x136   :  { %v193_v27 = vmul.f32 %v191_v25, %v191_v25 }
 0x137   :  { %196 = vst.msk [vmem:[#allocation11 + $0x8] sm:$0xff] %vm75_vm0, %v194_v26 }
 0x138   :  { %195 = vst.msk [vmem:[#allocation11] sm:$0xff] %vm75_vm0, %v193_v27 }
 0x139   :  { %351 = shalt.err (!%p348_p8)
}
 0x13a   :  { %s352_s16 = scalar_lea.hbm %s499_s4, 256 }
 0x13b   :  { %p353_p9 = scmp.ne.s32.totalorder %s499_s4, %s352_s16  ;;  %p356_p10 = scmp.lt.u32.totalorder %s352_s16, %s499_s4 }
 0x13d   :  { %p358_p11 = pnand %p356_p10, %p353_p9 }
 0x13f   :  { %361 = shalt.err (!%p358_p11)
}
 0x140   :  { %208 = dma.vmem_to_hbm [thread:$0]  %s203_s1, 256, %s499_s4, [#allocation5], %s372_s27, %s372_s27, %s373_s28  }
 0x141   :  { %368 = dma.done.wait [#allocation5], 256  }
 0x142   :  { %369 = vsyncadd [#allocation5], 4294967040 }
 0x143   :  { %212 = vsyncpa [#allocation4], 1 }
 0x144   :  { %213 = vsyncpa [#allocation7], 1 }
 0x145   :  { %214 = vsyncpa [#allocation10], 1 }
 0x146   :  { %215 = vsyncpa [#allocation5], 1 }

// kernel: block_forward.13
= control target key start
LH: loop header
LB: loop body
LE: loop exit
PB: predicated region body
PF: predicated region fallthrough
CT: control target
= control target key end

     0   :  { %13 = vsyncpa [#allocation4], 0  ;;  %s1191_s0 = inlined_call_operand.hbm [shape: f32[16,32], index: 0, kind: input, shape index: {}]   ;;  %s1192_s1 = inlined_call_operand.hbm [shape: f32[4,16,32], index: 1, kind: input, shape index: {}]   ;;  %s1193_s2 = inlined_call_operand.hbm [shape: f32[16,32], index: 2, kind: input, shape index: {}]   ;;  %s1194_s3 = inlined_call_operand.hbm [shape: f32[1,32], index: 3, kind: input, shape index: {}]   ;;  %s1195_s4 = inlined_call_operand.hbm [shape: f32[1,32], index: 4, kind: input, shape index: {}]   ;;  %s1196_s5 = inlined_call_operand.hbm [shape: f32[32,2], index: 5, kind: input, shape index: {}]   ;;  %s1197_s6 = inlined_call_operand.hbm [shape: f32[2,32], index: 6, kind: input, shape index: {}]   ;;  %s1198_s7 = inlined_call_operand.hbm [shape: f32[32,32], index: 7, kind: input, shape index: {}]   ;;  %s1199_s8 = inlined_call_operand.hbm [shape: f32[16,32], index: 8, kind: output, shape index: {}]  }
   0x1   :  { %14 = vsyncpa [#allocation7], 0 }
   0x2   :  { %15 = vsyncpa [#allocation10], 0 }
   0x3   :  { %16 = vsyncpa [#allocation13], 0 }
   0x4   :  { %17 = vsyncpa [#allocation16], 0 }
   0x5   :  { %18 = vsyncpa [#allocation5], 0  ;;  %s36_s29 = scalar_lea.hbm %s1192_s1, 768  ;;  %s995_s30 = smov [#allocation6]  }
   0x6   :  { %s37_s9 = sshll.u32 %s995_s30, 4  ;;  %s996_s10 = smov [#allocation9]   ;;  %s38_s9 = int_to_ptr.vmem [resolvable:$true] %s37_s9 }
   0x7   :  { %s62_s11 = sshll.u32 %s996_s10, 4  ;;  %s806_s14 = scalar_lea.hbm %s1192_s1, 1024  ;;  %s63_s11 = int_to_ptr.vmem [resolvable:$true] %s62_s11 }
   0x8   :  { %p783_p0 = scmp.ne.s32.totalorder %s36_s29, %s806_s14  ;;  %p785_p1 = scmp.lt.u32.totalorder %s36_s29, %s1192_s1 }
   0x9   :  { %p786_p2 = scmp.lt.u32.totalorder %s806_s14, %s806_s14  ;;  %p788_p4 = scmp.lt.u32.totalorder %s806_s14, %s36_s29 }
   0xb   :  { %p787_p3 = por %p786_p2, %p785_p1 }
   0xd   :  { %p789_p5 = por %p788_p4, %p787_p3 }
   0xf   :  { %p790_p6 = pnand %p789_p5, %p783_p0 }
  0x11   :  { %793 = shalt.err (!%p790_p6)
}
  0x12   :  { %s794_s17 = scalar_lea.vmem %s38_s9, 256  ;;  %p799_p8 = scmp.lt.s32.totalorder %s38_s9, %s38_s9 }
  0x13   :  { %p795_p7 = scmp.ne.s32.totalorder %s38_s9, %s794_s17  ;;  %p800_p9 = scmp.lt.s32.totalorder %s794_s17, %s794_s17 }
  0x15   :  { %p801_p10 = por %p800_p9, %p799_p8 }
  0x17   :  { %p802_p11 = pnand %p801_p10, %p795_p7 }
  0x19   :  { %805 = shalt.err (!%p802_p11)
}
  0x1a   :  { %s997_s18 = smov 128   ;;  %s998_s19 = smov 8  }
  0x1b   :  { %43 = dma.hbm_to_vmem [thread:$0]  %s36_s29, 256, %s38_s9, [#allocation7], %s997_s18, %s997_s18, %s998_s19  }
  0x1c   :  { %s807_s21 = scalar_lea.hbm %s1194_s3, 16 }
  0x1d   :  { %p808_p12 = scmp.ne.s32.totalorder %s1194_s3, %s807_s21  ;;  %p811_p13 = scmp.lt.u32.totalorder %s807_s21, %s1194_s3 }
  0x1f   :  { %p813_p0 = pnand %p811_p13, %p808_p12 }
  0x21   :  { %816 = shalt.err (!%p813_p0)
}
  0x22   :  { %s817_s26 = scalar_lea.vmem %s63_s11, 16  ;;  %s821_s27 = scalar_lea.vmem %s63_s11, 32 }
  0x23   :  { %p818_p1 = scmp.ne.s32.totalorder %s63_s11, %s817_s26  ;;  %p822_p2 = scmp.lt.s32.totalorder %s63_s11, %s63_s11 }
  0x24   :  { %p823_p3 = scmp.lt.s32.totalorder %s821_s27, %s817_s26 }
  0x26   :  { %p824_p4 = por %p823_p3, %p822_p2 }
  0x28   :  { %p825_p5 = pnand %p824_p4, %p818_p1 }
  0x2a   :  { %828 = shalt.err (!%p825_p5)
}
  0x2b   :  { %65 = dma.hbm_to_vmem [thread:$0]  %s1194_s3, 16, %s63_s11, [#allocation10]  }
  0x2c   :  { %s999_s30 = smov [#allocation12]   ;;  %s1000_s10 = smov [#allocation3]  }
  0x2d   :  { %s81_s9 = sshll.u32 %s999_s30, 4  ;;  %s24_s12 = sshll.u32 %s1000_s10, 4  ;;  %s82_s9 = int_to_ptr.vmem [resolvable:$true] %s81_s9  ;;  %s25_s12 = int_to_ptr.vmem [resolvable:$true] %s24_s12 }
  0x2e   :  { %s829_s15 = scalar_lea.hbm %s1196_s5, 512 }
  0x2f   :  { %p830_p6 = scmp.ne.s32.totalorder %s1196_s5, %s829_s15  ;;  %p833_p7 = scmp.lt.u32.totalorder %s829_s15, %s1196_s5 }
  0x31   :  { %p835_p8 = pnand %p833_p7, %p830_p6 }
  0x33   :  { %838 = shalt.err (!%p835_p8)
}
  0x34   :  { %s839_s3 = scalar_lea.vmem %s82_s9, 512  ;;  %p844_p10 = scmp.lt.s32.totalorder %s82_s9, %s82_s9 }
  0x35   :  { %p840_p9 = scmp.ne.s32.totalorder %s82_s9, %s839_s3  ;;  %p845_p11 = scmp.lt.s32.totalorder %s839_s3, %s839_s3 }
  0x37   :  { %p846_p12 = por %p845_p11, %p844_p10 }
  0x39   :  { %p847_p13 = pnand %p846_p12, %p840_p9 }
  0x3b   :  { %850 = shalt.err (!%p847_p13)
}
  0x3c   :  { %87 = dma.hbm_to_vmem [thread:$0]  %s1196_s5, 512, %s82_s9, [#allocation13], %s997_s18, %s997_s18, %s998_s19  }
  0x3d   :  { %s851_s24 = scalar_lea.hbm %s1191_s0, 256 }
  0x3e   :  { %p852_p0 = scmp.ne.s32.totalorder %s1191_s0, %s851_s24  ;;  %p855_p1 = scmp.lt.u32.totalorder %s851_s24, %s1191_s0 }
  0x40   :  { %p857_p2 = pnand %p855_p1, %p852_p0 }
  0x42   :  { %860 = shalt.err (!%p857_p2)
}
  0x43   :  { %s861_s29 = scalar_lea.vmem %s25_s12, 256  ;;  %p866_p4 = scmp.lt.s32.totalorder %s25_s12, %s25_s12 }
  0x44   :  { %p862_p3 = scmp.ne.s32.totalorder %s25_s12, %s861_s29  ;;  %p867_p5 = scmp.lt.s32.totalorder %s861_s29, %s861_s29 }
  0x46   :  { %p868_p6 = por %p867_p5, %p866_p4 }
  0x48   :  { %p869_p7 = pnand %p868_p6, %p862_p3 }
  0x4a   :  { %872 = shalt.err (!%p869_p7)
}
  0x4b   :  { %30 = dma.hbm_to_vmem [thread:$0]  %s1191_s0, 256, %s25_s12, [#allocation4], %s997_s18, %s997_s18, %s998_s19  }
  0x4c   :  { %s1001_s9 = smov [#allocation8]   ;;  %s1002_s13 = smov [#allocation11]  }
  0x4d   :  { %s49_s10 = sshll.u32 %s1001_s9, 4  ;;  %s72_s14 = sshll.u32 %s1002_s13, 4  ;;  %s50_s10 = int_to_ptr.vmem [resolvable:$true] %s49_s10  ;;  %s73_s14 = int_to_ptr.vmem [resolvable:$true] %s72_s14 }
  0x4e   :  { %s873_s17 = scalar_lea.hbm %s1193_s2, 256 }
  0x4f   :  { %p874_p8 = scmp.ne.s32.totalorder %s1193_s2, %s873_s17  ;;  %p877_p9 = scmp.lt.u32.totalorder %s873_s17, %s1193_s2 }
  0x51   :  { %p879_p10 = pnand %p877_p9, %p874_p8 }
  0x53   :  { %882 = shalt.err (!%p879_p10)
}
  0x54   :  { %s883_s0 = scalar_lea.vmem %s50_s10, 256  ;;  %p888_p12 = scmp.lt.s32.totalorder %s50_s10, %s50_s10 }
  0x55   :  { %p884_p11 = scmp.ne.s32.totalorder %s50_s10, %s883_s0  ;;  %p889_p13 = scmp.lt.s32.totalorder %s883_s0, %s883_s0 }
  0x57   :  { %p890_p0 = por %p889_p13, %p888_p12 }
  0x59   :  { %p891_p1 = pnand %p890_p0, %p884_p11 }
  0x5b   :  { %894 = shalt.err (!%p891_p1)
}
  0x5c   :  { %55 = dma.hbm_to_vmem [thread:$0]  %s1193_s2, 256, %s50_s10, [#allocation7], %s997_s18, %s997_s18, %s998_s19  }
  0x5d   :  { %s895_s24 = scalar_lea.hbm %s1195_s4, 16 }
  0x5e   :  { %p896_p2 = scmp.ne.s32.totalorder %s1195_s4, %s895_s24  ;;  %p899_p3 = scmp.lt.u32.totalorder %s895_s24, %s1195_s4 }
  0x60   :  { %p901_p4 = pnand %p899_p3, %p896_p2 }
  0x62   :  { %904 = shalt.err (!%p901_p4)
}
  0x63   :  { %s905_s29 = scalar_lea.vmem %s73_s14, 16  ;;  %s909_s5 = scalar_lea.vmem %s73_s14, 32 }
  0x64   :  { %p906_p5 = scmp.ne.s32.totalorder %s73_s14, %s905_s29  ;;  %p910_p6 = scmp.lt.s32.totalorder %s73_s14, %s73_s14 }
  0x65   :  { %p911_p7 = scmp.lt.s32.totalorder %s909_s5, %s905_s29 }
  0x67   :  { %p912_p8 = por %p911_p7, %p910_p6 }
  0x69   :  { %p913_p9 = pnand %p912_p8, %p906_p5 }
  0x6b   :  { %916 = shalt.err (!%p913_p9)
}
  0x6c   :  { %75 = dma.hbm_to_vmem [thread:$0]  %s1195_s4, 16, %s73_s14, [#allocation10]  }
  0x6d   :  { %s1003_s9 = smov [#allocation14]   ;;  %s1004_s13 = smov [#allocation15]  }
  0x6e   :  { %s94_s10 = sshll.u32 %s1003_s9, 4  ;;  %s103_s15 = sshll.u32 %s1004_s13, 4  ;;  %s95_s10 = int_to_ptr.vmem [resolvable:$true] %s94_s10  ;;  %s104_s15 = int_to_ptr.vmem [resolvable:$true] %s103_s15 }
  0x6f   :  { %s917_s1 = scalar_lea.hbm %s1197_s6, 32 }
  0x70   :  { %p918_p10 = scmp.ne.s32.totalorder %s1197_s6, %s917_s1  ;;  %p921_p11 = scmp.lt.u32.totalorder %s917_s1, %s1197_s6 }
  0x72   :  { %p923_p12 = pnand %p921_p11, %p918_p10 }
  0x74   :  { %926 = shalt.err (!%p923_p12)
}
  0x75   :  { %s927_s4 = scalar_lea.vmem %s95_s10, 32  ;;  %p932_p0 = scmp.lt.s32.totalorder %s95_s10, %s95_s10 }
  0x76   :  { %p928_p13 = scmp.ne.s32.totalorder %s95_s10, %s927_s4  ;;  %p933_p1 = scmp.lt.s32.totalorder %s927_s4, %s927_s4 }
  0x78   :  { %p934_p2 = por %p933_p1, %p932_p0 }
  0x7a   :  { %p935_p3 = pnand %p934_p2, %p928_p13 }
  0x7c   :  { %938 = shalt.err (!%p935_p3)
}
  0x7d   :  { %97 = dma.hbm_to_vmem [thread:$0]  %s1197_s6, 32, %s95_s10, [#allocation13]  }
  0x7e   :  { %s939_s23 = scalar_lea.hbm %s1198_s7, 512 }
  0x7f   :  { %p940_p4 = scmp.ne.s32.totalorder %s1198_s7, %s939_s23  ;;  %p943_p5 = scmp.lt.u32.totalorder %s939_s23, %s1198_s7 }
  0x81   :  { %p945_p6 = pnand %p943_p5, %p940_p4 }
  0x83   :  { %948 = shalt.err (!%p945_p6)
}
  0x84   :  { %s949_s28 = scalar_lea.vmem %s104_s15, 512  ;;  %p954_p8 = scmp.lt.s32.totalorder %s104_s15, %s104_s15 }
  0x85   :  { %p950_p7 = scmp.ne.s32.totalorder %s104_s15, %s949_s28  ;;  %p955_p9 = scmp.lt.s32.totalorder %s949_s28, %s949_s28 }
  0x87   :  { %p956_p10 = por %p955_p9, %p954_p8 }
  0x89   :  { %p957_p11 = pnand %p956_p10, %p950_p7 }
  0x8b   :  { %960 = shalt.err (!%p957_p11)
}
  0x8c   :  { %109 = dma.hbm_to_vmem [thread:$0]  %s1198_s7, 512, %s104_s15, [#allocation16], %s997_s18, %s997_s18, %s998_s19  }
  0x8d   :  { %983 = dma.done.wait [#allocation4], 256  }
  0x8e   :  { %984 = vsyncadd [#allocation4], 4294967040 }
  0x8f   :  { %985 = dma.done.wait [#allocation7], 512  }
  0x90   :  { %986 = vsyncadd [#allocation7], 4294966784 }
  0x91   :  { %987 = dma.done.wait [#allocation10], 32  }
  0x92   :  { %988 = vsyncadd [#allocation10], 4294967264 }
  0x93   :  { %989 = dma.done.wait [#allocation13], 544  }
  0x94   :  { %990 = vsyncadd [#allocation13], 4294966752 }
  0x95   :  { %991 = dma.done.wait [#allocation16], 512  }
  0x96   :  { %992 = vsyncadd [#allocation16], 4294966784  ;;  %vm138_vm0 = vcmask 261120   ;;  %v143_v0 = vld [vmem:[#allocation12] sm:$0xff]  ;;  %v144_v1 = vld [vmem:[#allocation12 + $0x8] sm:$0xff]  ;;  %vm239_vm1 = vcmask 1041408  }
  0x97   :  { %v145_v2 = vld [vmem:[#allocation12 + $0x10] sm:$0xff]  ;;  %v734_v3 = vpack.c.bf16 %v144_v1, %v143_v0  ;;  %v146_v4 = vld [vmem:[#allocation12 + $0x18] sm:$0xff]  ;;  %v147_v8 = vld [vmem:[#allocation14] sm:$0x3]  ;;  %vm232_vm2 = vcmask 15360   ;;  %v1005_v33 = vmov 0.0  }
  0x98   :  { %v141_v5 = vld [vmem:[#allocation3] sm:$0xff]  ;;  %v738_v6 = vpack.c.bf16 %v146_v4, %v145_v2  ;;  %v142_v7 = vld [vmem:[#allocation3 + $0x8] sm:$0xff]  ;;  %v530_v27 = vld [vmem:[#allocation15] sm:$0xff]  ;;  %140 = vst.msk [vmem:[#allocation2 + $0x8] sm:$0xff] %vm138_vm0, %v1005_v33  ;;  %s1006_s7 = smov [#allocation17]  }
  0x99   :  { %699 = vmatprep.mubr.msk.f32.mxu0 %vm138_vm0, %v141_v5  ;;  %735 = vmatprep.subr.bf16.mxu0 %v734_v3  ;;  %v531_v28 = vld [vmem:[#allocation15 + $0x8] sm:$0xff]  ;;  %v532_v30 = vld [vmem:[#allocation15 + $0x10] sm:$0xff]  ;;  %v533_v31 = vld [vmem:[#allocation15 + $0x18] sm:$0xff]  ;;  %139 = vst.msk [vmem:[#allocation2] sm:$0xff] %vm138_vm0, %v1005_v33  ;;  %s635_s5 = sshll.u32 %s1006_s7, 4  ;;  %s636_s5 = int_to_ptr.vmem [resolvable:$true] %s635_s5 }
  0x9a   :  { %743 = vmatprep.subr.bf16.mxu1 %v734_v3  ;;  %737 = vmatpush3.bf16.msra.mxu0 %v734_v3  ;;  %v750_v29 = vpack.c.bf16 %v531_v28, %v530_v27  ;;  %v754_v32 = vpack.c.bf16 %v533_v31, %v532_v30  ;;  %v510_v34 = vld [vmem:[#allocation6] sm:$0xff]  ;;  %v511_v35 = vld [vmem:[#allocation6 + $0x8] sm:$0xff]  ;;  %v625_v0 = vld [vmem:[#allocation8 + $0x8] sm:$0xff]  ;;  %s961_s2 = scalar_lea.vmem %s636_s5, 256  ;;  %p966_p13 = scmp.lt.s32.totalorder %s636_s5, %s636_s5 }
  0x9b   :  { %745 = vmatpush3.bf16.msra.mxu1 %v734_v3  ;;  %739 = vmatprep.subr.bf16.mxu0 %v738_v6  ;;  %v663_v36 = vmul.f32 -1.442695, %v510_v34  ;;  %v664_v37 = vmul.f32 -1.442695, %v511_v35  ;;  %v661_v43 = vld [vmem:[#allocation9] ss:$0 sm:$0xff]  ;;  %p962_p12 = scmp.ne.s32.totalorder %s636_s5, %s961_s2  ;;  %p967_p0 = scmp.lt.s32.totalorder %s961_s2, %s961_s2 }
  0x9c   :  { %747 = vmatprep.subr.bf16.mxu1 %v738_v6  ;;  %v662_v48 = vld [vmem:[#allocation11] ss:$0 sm:$0xff]  ;;  %v624_v1 = vld [vmem:[#allocation8] sm:$0xff] }
  0x9d   :  { %p968_p1 = por %p967_p0, %p966_p13 }
  0x9e   :  { %741 = vmatpush3.bf16.msra.mxu0 %v738_v6 }
  0x9f   :  { %749 = vmatpush3.bf16.msra.mxu1 %v738_v6  ;;  %702 = vmatprep.subr.msk.mxu0 %vm239_vm1, %v147_v8  ;;  %v529_v58 = vld [vmem:[#allocation2 + $0x8] sm:$0xff]  ;;  %p969_p2 = pnand %p968_p1, %p962_p12 }
  0xa0   :  { %751 = vmatprep.subr.bf16.mxu1 %v750_v29  ;;  %v528_v59 = vld [vmem:[#allocation2] sm:$0xff] }
  0xa1   :  { %700 = vmatmul.mubr.msk.f32.vlgmr.msra.gmra.mrb[0].mxu0 %vm138_vm0, %v142_v7 }
  0xa2   :  { %703 = vmatpush3.msk.msra.mxu0 %vm239_vm1, %v147_v8 }
  0xa3   :  { %718 = vmatprep.subr.msk.mxu0 %vm239_vm1, %v147_v8 }
 0x174   :  { %v701_v9 = vpop.f32.mrb[0].mxu0 }
 0x175   :  { %v221_v10 = vpop.f32.mrb[1].mxu0  ;;  %v231_v12 = vmul.f32 0.0625, %v701_v9 }
 0x176   :  { %v230_v11 = vmul.f32 0.0625, %v221_v10 }
 0x178   :  { %704 = vmatprep.mubr.msk.f32.mxu0 %vm232_vm2, %v230_v11 }
 0x179   :  { %705 = vmatmul.mubr.msk.f32.vlgmr.msra.gmra.mrb[2].mxu0 %vm232_vm2, %v231_v12 }
 0x17a   :  { %719 = vmatpush3.msk.msra.mxu0 %vm239_vm1, %v147_v8 }
 0x24c   :  { %v706_v13 = vpop.f32.mrb[2].mxu0 }
 0x24d   :  { %v319_v14 = vsub.f32 %v142_v7, %v706_v13  ;;  %v309_v15 = vpop.f32.mrb[3].mxu0 }
 0x24e   :  { %v318_v16 = vsub.f32 %v141_v5, %v309_v15 }
 0x24f   :  { %v321_v18 = vmul.f32 %v319_v14, %v319_v14 }
 0x250   :  { %v320_v17 = vmul.f32 %v318_v16, %v318_v16 }
 0x252   :  { %715 = vmatprep.mubr.msk.f32.mxu1 %vm138_vm0, %v320_v17 }
 0x253   :  { %716 = vmatmul.mubr.msk.f32.vlgmr.msra.gmra.mrb[0].mxu1 %vm138_vm0, %v321_v18 }
 0x254   :  { %753 = vmatpush3.bf16.msra.mxu1 %v750_v29 }
 0x255   :  { %755 = vmatprep.subr.bf16.mxu1 %v754_v32 }
 0x258   :  { %757 = vmatpush3.bf16.msra.mxu1 %v754_v32 }
 0x326   :  { %v717_v19 = vpop.f32.mrb[0].mxu1 }
 0x327   :  { %v404_v20 = vmul.f32 0.0625, %v717_v19  ;;  %v394_v21 = vpop.f32.mrb[1].mxu1 }
 0x328   :  { %v403_v22 = vmul.f32 0.0625, %v394_v21 }
 0x329   :  { %v406_v23 = vadd.f32 0.00064, %v404_v20 }
 0x32a   :  { %v405_v24 = vadd.f32 0.00064, %v403_v22 }
 0x32c   :  { %770 = vrsqrt.f32 %v405_v24 }
 0x32d   :  { %772 = vrsqrt.f32 %v406_v23 }
 0x32e   :  { %774 = vpow2.f32 %v663_v36 }
 0x32f   :  { %776 = vpow2.f32 %v664_v37 }
 0x336   :  { %v771_v25 = vpop.eup %770 }
 0x337   :  { %v773_v26 = vpop.eup %772  ;;  %720 = vmatprep.mubr.msk.f32.mxu0 %vm232_vm2, %v771_v25 }
 0x338   :  { %721 = vmatmul.mubr.msk.f32.vlgmr.msra.gmra.mrb[4].mxu0 %vm232_vm2, %v773_v26  ;;  %v775_v38 = vpop.eup %774 }
 0x339   :  { %v777_v39 = vpop.eup %776  ;;  %v518_v40 = vadd.f32 1.0, %v775_v38 }
 0x33a   :  { %v519_v41 = vadd.f32 1.0, %v777_v39 }
 0x33b   :  { %778 = vrcp.f32 %v518_v40 }
 0x33c   :  { %780 = vrcp.f32 %v519_v41 }
 0x345   :  { %v779_v44 = vpop.eup %778 }
 0x346   :  { %v781_v47 = vpop.eup %780  ;;  %v524_v52 = vmul.f32 %v779_v44, %v510_v34 }
 0x347   :  { %v525_v54 = vmul.f32 %v781_v47, %v511_v35 }
 0x40b   :  { %v722_v42 = vpop.f32.mrb[4].mxu0 }
 0x40c   :  { %v491_v45 = vmul.f32 %v722_v42, %v319_v14  ;;  %v481_v46 = vpop.f32.mrb[5].mxu0 }
 0x40d   :  { %v490_v49 = vmul.f32 %v481_v46, %v318_v16 }
 0x40e   :  { %v500_v50 = vmul.f32 %v661_v43, %v491_v45 }
 0x40f   :  { %v499_v51 = vmul.f32 %v661_v43, %v490_v49 }
 0x410   :  { %v509_v53 = vadd.f32 %v662_v48, %v500_v50 }
 0x411   :  { %v508_v55 = vadd.f32 %v662_v48, %v499_v51 }
 0x412   :  { %v527_v57 = vmul.f32 %v525_v54, %v509_v53 }
 0x413   :  { %v526_v56 = vmul.f32 %v524_v52, %v508_v55 }
 0x415   :  { %731 = vmatprep.mubr.msk.f32.mxu1 %vm138_vm0, %v526_v56 }
 0x416   :  { %732 = vmatmul.mubr.msk.f32.vlgmr.msra.gmra.mrb[2].mxu1 %vm138_vm0, %v527_v57 }
 0x4e9   :  { %v733_v60 = vpop.f32.mrb[2].mxu1 }
 0x4ea   :  { %v616_v61 = vadd.f32 %v733_v60, %v529_v58  ;;  %v606_v62 = vpop.f32.mrb[3].mxu1 }
 0x4eb   :  { %v615_v63 = vadd.f32 %v606_v62, %v528_v59 }
 0x4ec   :  { %618 = vst.msk [vmem:[#allocation2 + $0x8] sm:$0xff] %vm138_vm0, %v616_v61 }
 0x4ed   :  { %617 = vst.msk [vmem:[#allocation2] sm:$0xff] %vm138_vm0, %v615_v63 }
 0x4f3   :  { %v623_v2 = vld [vmem:[#allocation2 + $0x8] sm:$0xff] }
 0x4f4   :  { %v622_v3 = vld [vmem:[#allocation2] sm:$0xff]  ;;  %v627_v4 = vadd.f32 %v625_v0, %v623_v2 }
 0x4f5   :  { %v626_v5 = vadd.f32 %v624_v1, %v622_v3 }
 0x4f6   :  { %629 = vst.msk [vmem:[#allocation17 + $0x8] sm:$0xff] %vm138_vm0, %v627_v4 }
 0x4f7   :  { %628 = vst.msk [vmem:[#allocation17] sm:$0xff] %vm138_vm0, %v626_v5 }
 0x4f8   :  { %972 = shalt.err (!%p969_p2)
}
 0x4f9   :  { %s973_s10 = scalar_lea.hbm %s1199_s8, 256 }
 0x4fa   :  { %p974_p3 = scmp.ne.s32.totalorder %s1199_s8, %s973_s10  ;;  %p977_p4 = scmp.lt.u32.totalorder %s973_s10, %s1199_s8 }
 0x4fc   :  { %p979_p5 = pnand %p977_p4, %p974_p3 }
 0x4fe   :  { %982 = shalt.err (!%p979_p5)
}
 0x4ff   :  { %641 = dma.vmem_to_hbm [thread:$0]  %s636_s5, 256, %s1199_s8, [#allocation5], %s997_s18, %s997_s18, %s998_s19  }
 0x500   :  { %993 = dma.done.wait [#allocation5], 256  }
 0x501   :  { %994 = vsyncadd [#allocation5], 4294967040 }
 0x502   :  { %645 = vsyncpa [#allocation4], 1 }
 0x503   :  { %646 = vsyncpa [#allocation7], 1 }
 0x504   :  { %647 = vsyncpa [#allocation10], 1 }
 0x505   :  { %648 = vsyncpa [#allocation13], 1 }
 0x506   :  { %649 = vsyncpa [#allocation16], 1 }
 0x507   :  { %650 = vsyncpa [#allocation5], 1 }

// kernel: block_forward.12
= control target key start
LH: loop header
LB: loop body
LE: loop exit
PB: predicated region body
PF: predicated region fallthrough
CT: control target
= control target key end

     0   :  { %s3210_s0 = inlined_call_operand.hbm [shape: f32[4,2,8,2,16], index: 0, kind: input, shape index: {}, may-alias: {0,1,2}]   ;;  %s3211_s1 = inlined_call_operand.hbm [shape: f32[4,2,8,2,16], index: 1, kind: input, shape index: {}, may-alias: {0,1,2}]   ;;  %s3212_s2 = inlined_call_operand.hbm [shape: f32[4,2,8,2,16], index: 2, kind: input, shape index: {}, may-alias: {0,1,2}]   ;;  %s3213_s3 = inlined_call_operand.hbm [shape: f32[2,8,2,16], index: 3, kind: input, shape index: {}]   ;;  %s3214_s4 = inlined_call_operand.hbm [shape: f32[2,16], index: 4, kind: input, shape index: {}]   ;;  %s3215_s5 = inlined_call_operand.hbm [shape: f32[2,8,2,16], index: 5, kind: output, shape index: {0}]   ;;  %s3216_s6 = inlined_call_operand.hbm [shape: f32[2,2,16,16], index: 6, kind: output, shape index: {1}]  }
   0x1   :  { %3229 = sst [smem:[#allocation25_spill]] %s3210_s0 }
   0x2   :  { %3230 = sst [smem:[#allocation26_spill]] %s3211_s1 }
   0x3   :  { %3231 = sst [smem:[#allocation27_spill]] %s3214_s4 }
   0x4   :  { %12 = vsyncpa [#allocation4], 0 }
   0x5   :  { %14 = vsyncpa [#allocation4 + $0x1], 0 }
   0x6   :  { %15 = vsyncpa [#allocation7], 0 }
   0x7   :  { %17 = vsyncpa [#allocation7 + $0x1], 0 }
   0x8   :  { %18 = vsyncpa [#allocation10], 0 }
   0x9   :  { %20 = vsyncpa [#allocation10 + $0x1], 0 }
   0xa   :  { %21 = vsyncpa [#allocation5], 0 }
   0xb   :  { %23 = vsyncpa [#allocation5 + $0x1], 0 }
   0xc   :  { %24 = vsyncpa [#allocation14], 0 }
   0xd   :  { %26 = vsyncpa [#allocation14 + $0x1], 0  ;;  %s2635_s21 = smov 0   ;;  %s2637_s22 = smov 0  }
   0xe   :  { %s2639_s23 = smov 0   ;;  %s2641_s24 = smov 0  }
   0xf   :  { %s2643_s25 = smov 0   ;;  %s2645_s26 = smov 0  }
  0x10 LB: > { %3232 = sst [smem:[#allocation21_spill]] %s2575_s25  ;;  %s2666_s27 = sadd.s32 4294967295, %s2579_s26   ;;  %s2579_s26 = sphi %s2645_s26, %s32_s26   ;;  %s2575_s25 = sphi %s2643_s25, %s3264_s25   ;;  %s2571_s24 = sphi %s2641_s24, %s3263_s24   ;;  %s2567_s23 = sphi %s2639_s23, %s3267_s23   ;;  %s2563_s22 = sphi %s2637_s22, %s3266_s22   ;;  %s2559_s21 = sphi %s2635_s21, %s3265_s21  }
  0x11   : > { %s1999_s28 = sadd.s32 4294967294, %s2579_s26   ;;  %p60_p0 = scmp.ne.s32.totalorder %s2567_s23, %s2563_s22 }
  0x12   : > { %p61_p1 = scmp.eq.s32.totalorder %s2579_s26, 0  ;;  %p66_p2 = scmp.ne.s32.totalorder %s2563_s22, %s2559_s21 }
  0x13   : > { %p3218_p3 = scmp.eq.s32.totalorder %s2666_s27, 0  ;;  %p197_p4 = scmp.eq.s32.totalorder %s2666_s27, 1 }
  0x14   : > { %p2677_p5 = por %p61_p1, %p60_p0  ;;  %p203_p6 = scmp.eq.s32.totalorder %s1999_s28, 1 }
  0x15   : > { %p2683_p7 = por %p3218_p3, %p66_p2  ;;  %p2687_p8 = por %p197_p4, %p60_p0 }
  0x16   : > { %p2691_p9 = por %p203_p6, %p66_p2  ;;  %p2000_p10 = scmp.ge.s32.totalorder %s2579_s26, 1 }
  0x17   : > { %s3234_s7 = scalar_select %p2683_p7, 1, 0 }
  0x18   : > { %s3235_s8 = scalar_select %p2687_p8, 1, 0 }
  0x19   : > { %s3236_s9 = scalar_select %p2691_p9, 1, 0 }
  0x1a   : > { %p236_p11 = scmp.lt.s32.totalorder %s2579_s26, 3  ;;  %s2581_s11 = smov [#allocation11]  }
  0x1b   : > { %3237 = sst [smem:[#allocation22_spill]] %s3236_s9  ;;  %s249_s12 = sshll.u32 %s2581_s11, 4  ;;  %s250_s12 = int_to_ptr.vmem [resolvable:$true] %s249_s12 }
  0x1c   : > { %p2698_p13 = pnand %p2000_p10, %p236_p11  ;;  %p2183_p1 = scmp.lt.s32.totalorder %s2579_s26, 2 }
  0x1d   : > { %s44_s15 = sadd.s32 1, %s2575_s25  ;;  %s3223_s17 = sand.u32 1, %s2567_s23  }
  0x1e   : > { %s3238_s10 = scalar_select %p2698_p13, 1, 0 }
  0x1f   : > { %p2158_p0 = pneg %p2698_p13  ;;  %p2707_p4 = pnand %p2183_p1, %p2677_p5 }
  0x20   : > { %p2718_p6 = scmp.ge.s32.totalorder %s44_s15, 2  ;;  %s3242_s4 = sld [smem:[#allocation27_spill]] }
  0x21   : > { %s3239_s13 = scalar_select %p2707_p4, 1, 0 }
  0x22   : > { %p2713_p2 = pnand %p2158_p0, %p3218_p3 }
  0x23   : > { %s3241_s16 = scalar_select %p2718_p6, 1, 0 }
  0x24   : > { %p2305_p10 = pneg %p2713_p2 }
  0x26   : > { %s2303_s20 = scalar_lea.hbm %s3242_s4, 32 }
  0x27   : > { %p2304_p5 = scmp.ne.s32.totalorder %s3242_s4, %s2303_s20  ;;  %p2310_p0 = scmp.lt.u32.totalorder %s2303_s20, %s3242_s4 }
  0x29   : > { %p2306_p11 = pnand %p2305_p10, %p2304_p5 }
  0x2b   : > { %p2307_p1 = pneg %p2306_p11 }
  0x2d   : > { %p2312_p12 = pnand %p2310_p0, %p2307_p1 }
  0x2f   : > { %2315 = shalt.err (!%p2312_p12)
}
  0x30   : > { %s2316_s9 = scalar_lea.vmem %s250_s12, 32  ;;  %p2324_p7 = scmp.lt.s32.totalorder %s250_s12, %s250_s12 }
  0x31   : > { %p2317_p3 = scmp.ne.s32.totalorder %s250_s12, %s2316_s9  ;;  %p2325_p13 = scmp.lt.s32.totalorder %s2316_s9, %s2316_s9 }
  0x33   : > { %p2319_p9 = pnand %p2317_p3, %p2305_p10  ;;  %p2326_p4 = por %p2325_p13, %p2324_p7 }
  0x35   : > { %p2320_p8 = pneg %p2319_p9 }
  0x37   : > { %p2327_p6 = pnand %p2326_p4, %p2320_p8 }
  0x39   : > { %2330 = shalt.err (!%p2327_p6)
}
  0x3a   : > { %2161 = dma.hbm_to_vmem [thread:$0]  (!%p2713_p2), %s3242_s4, 32, %s250_s12, [#allocation10]  }
  0x3b   : > { %p3243_p3 = scmp.ne.s32.totalorder %s3241_s16, 0  ;;  %s2745_s29 = sshll.u32 %s3223_s17, 4 }
  0x3c   : > { %s2748_s9 = sshll.u32 %s2575_s25, 8  ;;  %s3226_s20 = sand.u32 1, %s2579_s26  }
  0x3d   : > { %s3269_s15 = smov (%p3243_p3, %s44_s15), 0  ;;  %s3245_s28 = sadd.s32 1, %s2567_s23 }
  0x3e   : > { %3244 = sst [smem:[#allocation23_spill]] %s3269_s15  ;;  %s48_s14 = ssub.s32 %s2575_s25, %s3269_s15 }
  0x3f   : > { %p51_p7 = scmp.eq.s32.totalorder %s48_s14, 0  ;;  %s3247_s1 = sld [smem:[#allocation26_spill]] }
  0x40   : > { %s287_s19 = scalar_lea.vmem [#allocation6], %s2745_s29  ;;  %s2769_s4 = scalar_lea.sflag [#allocation7], %s3226_s20 }
  0x41   : > { %s2756_s30 = scalar_select %p51_p7, %s2567_s23, %s3245_s28  }
  0x42   : > { %s297_s17 = sshll.u32 %s287_s19, 4  ;;  %p3248_p9 = scmp.ne.s32.totalorder %s3239_s13, 0  ;;  %s2765_s17 = int_to_ptr.vmem [resolvable:$true] %s297_s17 }
  0x43   : > { %3246 = sst [smem:[#allocation24_spill]] %s2756_s30 }
  0x44   : > { %p2774_p12 = pneg %p3248_p9 }
  0x45   : > { %s1853_s16 = scalar_lea.hbm %s3247_s1, %s2748_s9  ;;  %s2336_s19 = scalar_lea.hbm %s3247_s1, 2048 }
  0x46   : > { %s2762_s18 = scalar_lea.hbm %s1853_s16, 512  ;;  %s2361_s14 = scalar_lea.hbm %s1853_s16, 768 }
  0x47   : > { %p2332_p8 = scmp.ne.s32.totalorder %s2762_s18, %s2361_s14  ;;  %p2337_p2 = scmp.lt.u32.totalorder %s2762_s18, %s3247_s1 }
  0x48   : > { %p2338_p6 = scmp.lt.u32.totalorder %s2336_s19, %s2361_s14  ;;  %p2340_p10 = scmp.lt.u32.totalorder %s2361_s14, %s2762_s18 }
  0x49   : > { %p2334_p13 = pnand %p2774_p12, %p2332_p8 }
  0x4a   : > { %p2339_p5 = por %p2338_p6, %p2337_p2 }
  0x4b   : > { %p2335_p4 = pneg %p2334_p13 }
  0x4c   : > { %p2341_p11 = por %p2340_p10, %p2339_p5 }
  0x4e   : > { %p2342_p1 = pnand %p2341_p11, %p2335_p4 }
  0x50   : > { %2345 = shalt.err (!%p2342_p1)
}
  0x51   : > { %s2346_s16 = scalar_lea.vmem %s2765_s17, 256  ;;  %s2582_s11 = smov [#allocation6]  }
  0x52   : > { %p2347_p0 = scmp.ne.s32.totalorder %s2765_s17, %s2346_s16  ;;  %s2351_s12 = sshll.u32 %s2582_s11, 4  ;;  %s2352_s12 = int_to_ptr.vmem [resolvable:$false] %s2351_s12 }
  0x53   : > { %s2353_s25 = scalar_lea.vmem %s2352_s12, 512  ;;  %p2354_p8 = scmp.lt.s32.totalorder %s2765_s17, %s2352_s12 }
  0x54   : > { %p2349_p3 = pnand %p2347_p0, %p2774_p12  ;;  %p2355_p13 = scmp.lt.s32.totalorder %s2353_s25, %s2346_s16 }
  0x56   : > { %p2350_p7 = pneg %p2349_p3  ;;  %p2356_p2 = por %p2355_p13, %p2354_p8 }
  0x58   : > { %p2357_p6 = pnand %p2356_p2, %p2350_p7 }
  0x5a   : > { %2360 = shalt.err (!%p2357_p6)
}
  0x5b   : > { %s3227_s15 = smov 32   ;;  %s2584_s14 = smov 2  }
  0x5c   : > { %2168 = dma.hbm_to_vmem [thread:$0]  (!%p3248_p9), %s2762_s18, 256, %s2765_s17, %s2769_s4, %s3227_s15, %s3227_s15, %s2584_s14  }
  0x5d   : > { %s3250_s0 = sld [smem:[#allocation25_spill]]  ;;  %s264_s12 = scalar_lea.vmem [#allocation3], %s2745_s29 }
  0x5e   : > { %s273_s25 = sshll.u32 %s264_s12, 4  ;;  %s3251_s20 = sand.u32 1, %s2567_s23   ;;  %s2808_s25 = int_to_ptr.vmem [resolvable:$true] %s273_s25 }
  0x5f   : > { %s2812_s1 = scalar_lea.sflag [#allocation4], %s3251_s20 }
  0x63   : > { %s2805_s11 = scalar_lea.hbm %s3250_s0, %s2748_s9  ;;  %s2367_s19 = scalar_lea.hbm %s3250_s0, 2048 }
  0x64   : > { %s2362_s30 = scalar_lea.hbm %s2805_s11, 256  ;;  %p2368_p11 = scmp.lt.u32.totalorder %s2805_s11, %s3250_s0 }
  0x65   : > { %p2363_p4 = scmp.ne.s32.totalorder %s2805_s11, %s2362_s30  ;;  %p2369_p1 = scmp.lt.u32.totalorder %s2367_s19, %s2362_s30 }
  0x66   : > { %p2371_p3 = scmp.lt.u32.totalorder %s2362_s30, %s2805_s11 }
  0x67   : > { %p2365_p5 = pnand %p2363_p4, %p2774_p12  ;;  %p2370_p0 = por %p2369_p1, %p2368_p11 }
  0x69   : > { %p2366_p10 = pneg %p2365_p5  ;;  %p2372_p7 = por %p2371_p3, %p2370_p0 }
  0x6b   : > { %p2373_p8 = pnand %p2372_p7, %p2366_p10 }
  0x6d   : > { %2376 = shalt.err (!%p2373_p8)
}
  0x6e   : > { %s2377_s20 = scalar_lea.vmem %s2808_s25, 256  ;;  %s2585_s12 = smov [#allocation3]  }
  0x6f   : > { %p2378_p13 = scmp.ne.s32.totalorder %s2808_s25, %s2377_s20  ;;  %s2382_s17 = sshll.u32 %s2585_s12, 4  ;;  %s2383_s17 = int_to_ptr.vmem [resolvable:$false] %s2382_s17 }
  0x70   : > { %s2384_s15 = scalar_lea.vmem %s2383_s17, 512  ;;  %p2385_p4 = scmp.lt.s32.totalorder %s2808_s25, %s2383_s17 }
  0x71   : > { %p2380_p2 = pnand %p2378_p13, %p2774_p12  ;;  %p2386_p5 = scmp.lt.s32.totalorder %s2384_s15, %s2377_s20 }
  0x73   : > { %p2381_p6 = pneg %p2380_p2  ;;  %p2387_p11 = por %p2386_p5, %p2385_p4 }
  0x75   : > { %p2388_p1 = pnand %p2387_p11, %p2381_p6 }
  0x77   : > { %2391 = shalt.err (!%p2388_p1)
}
  0x78   : > { %s3252_s30 = smov 32   ;;  %s1862_s16 = scalar_lea.hbm %s3212_s2, %s2748_s9 }
  0x79   : > { %2165 = dma.hbm_to_vmem [thread:$0]  (!%p3248_p9), %s2805_s11, 256, %s2808_s25, %s2812_s1, %s3252_s30, %s3252_s30, %s2584_s14  }
  0x7a   : > { %s311_s20 = scalar_lea.vmem [#allocation8], %s2745_s29  ;;  %s2844_s17 = scalar_lea.hbm %s1862_s16, 1024 }
  0x7b   : > { %s321_s12 = sshll.u32 %s311_s20, 4  ;;  %s2422_s15 = scalar_lea.hbm %s1862_s16, 1280  ;;  %s2846_s12 = int_to_ptr.vmem [resolvable:$true] %s321_s12 }
  0x7c   : > { %p2393_p10 = scmp.ne.s32.totalorder %s2844_s17, %s2422_s15  ;;  %s2397_s11 = scalar_lea.hbm %s3212_s2, 2048 }
  0x7d   : > { %p2398_p7 = scmp.lt.u32.totalorder %s2844_s17, %s3212_s2  ;;  %p2399_p8 = scmp.lt.u32.totalorder %s2397_s11, %s2422_s15 }
  0x7e   : > { %p2395_p0 = pnand %p2393_p10, %p2774_p12  ;;  %p2401_p2 = scmp.lt.u32.totalorder %s2422_s15, %s2844_s17 }
  0x7f   : > { %p2400_p13 = por %p2399_p8, %p2398_p7 }
  0x80   : > { %p2396_p3 = pneg %p2395_p0 }
  0x81   : > { %p2402_p6 = por %p2401_p2, %p2400_p13 }
  0x83   : > { %p2403_p4 = pnand %p2402_p6, %p2396_p3 }
  0x85   : > { %2406 = shalt.err (!%p2403_p4)
}
  0x86   : > { %s2407_s19 = scalar_lea.vmem %s2846_s12, 256  ;;  %s2586_s0 = smov [#allocation8]  }
  0x87   : > { %p2408_p5 = scmp.ne.s32.totalorder %s2846_s12, %s2407_s19  ;;  %s2412_s16 = sshll.u32 %s2586_s0, 4  ;;  %s2413_s16 = int_to_ptr.vmem [resolvable:$false] %s2412_s16 }
  0x88   : > { %s2414_s20 = scalar_lea.vmem %s2413_s16, 512  ;;  %p2415_p10 = scmp.lt.s32.totalorder %s2846_s12, %s2413_s16 }
  0x89   : > { %p2410_p11 = pnand %p2408_p5, %p2774_p12  ;;  %p2416_p0 = scmp.lt.s32.totalorder %s2414_s20, %s2407_s19 }
  0x8b   : > { %p2411_p1 = pneg %p2410_p11  ;;  %p2417_p7 = por %p2416_p0, %p2415_p10 }
  0x8d   : > { %p2418_p8 = pnand %p2417_p7, %p2411_p1 }
  0x8f   : > { %2421 = shalt.err (!%p2418_p8)
}
  0x90   : > { %2171 = dma.hbm_to_vmem [thread:$0]  (!%p3248_p9), %s2844_s17, 256, %s2846_s12, %s2769_s4, %s3252_s30, %s3252_s30, %s2584_s14  }
  0x91   : > { %s2876_s11 = scalar_lea.hbm %s3213_s3, %s2748_s9  ;;  %s335_s25 = scalar_lea.vmem [#allocation9], %s2745_s29 }
  0x92   : > { %s344_s18 = sshll.u32 %s335_s25, 4  ;;  %s3253_s19 = sand.u32 1, %s2579_s26   ;;  %s2879_s18 = int_to_ptr.vmem [resolvable:$true] %s344_s18 }
  0x93   : > { %s2883_s0 = scalar_lea.sflag [#allocation10], %s3253_s19  ;;  %s2423_s16 = scalar_lea.hbm %s2876_s11, 256 }
  0x94   : > { %p2424_p3 = scmp.ne.s32.totalorder %s2876_s11, %s2423_s16  ;;  %s2428_s9 = scalar_lea.hbm %s3213_s3, 512 }
  0x95   : > { %p2429_p6 = scmp.lt.u32.totalorder %s2876_s11, %s3213_s3  ;;  %p2430_p4 = scmp.lt.u32.totalorder %s2428_s9, %s2423_s16 }
  0x96   : > { %p2426_p13 = pnand %p2424_p3, %p2774_p12  ;;  %p2432_p11 = scmp.lt.u32.totalorder %s2423_s16, %s2876_s11 }
  0x97   : > { %p2431_p5 = por %p2430_p4, %p2429_p6 }
  0x98   : > { %p2427_p2 = pneg %p2426_p13 }
  0x99   : > { %p2433_p1 = por %p2432_p11, %p2431_p5 }
  0x9b   : > { %p2434_p10 = pnand %p2433_p1, %p2427_p2 }
  0x9d   : > { %2437 = shalt.err (!%p2434_p10)
}
  0x9e   : > { %s2438_s29 = scalar_lea.vmem %s2879_s18, 256  ;;  %s2587_s15 = smov [#allocation9]  }
  0x9f   : > { %p2439_p0 = scmp.ne.s32.totalorder %s2879_s18, %s2438_s29  ;;  %s2443_s1 = sshll.u32 %s2587_s15, 4  ;;  %s2444_s1 = int_to_ptr.vmem [resolvable:$false] %s2443_s1 }
  0xa0   : > { %s2445_s25 = scalar_lea.vmem %s2444_s1, 512  ;;  %p2446_p3 = scmp.lt.s32.totalorder %s2879_s18, %s2444_s1 }
  0xa1   : > { %p2441_p7 = pnand %p2439_p0, %p2774_p12  ;;  %p2447_p13 = scmp.lt.s32.totalorder %s2445_s25, %s2438_s29 }
  0xa3   : > { %p2442_p8 = pneg %p2441_p7  ;;  %p2448_p6 = por %p2447_p13, %p2446_p3 }
  0xa5   : > { %p2449_p4 = pnand %p2448_p6, %p2442_p8 }
  0xa7   : > { %2452 = shalt.err (!%p2449_p4)
}
  0xa8   : > { %2174 = dma.hbm_to_vmem [thread:$0]  (!%p3248_p9), %s2876_s11, 256, %s2879_s18, %s2883_s0, %s3252_s30, %s3252_s30, %s2584_s14  }
  0xa9   : > { %p3254_p12 = scmp.ne.s32.totalorder %s3238_s10, 0 }
  0xaa   : > { %s2913_s28 = sand.u32 (!%p3254_p12), 1, %s2563_s22   ;;  %p3255_p2 = scmp.ne.s32.totalorder (!%p3254_p12), %s3234_s7, 0 }
  0xab   : > { %356 = sbr.rel (%p3254_p12) target bundleno = 942 (0x3ae), region = 40  ;;  %s2916_s19 = sshll.u32 (!%p3254_p12), %s2913_s28, 4 }
  0xac   : > { %s359_s13 = scalar_lea.sflag (!%p3254_p12), [#allocation4], %s2913_s28  ;;  %s2920_s16 = scalar_lea.vmem (!%p3254_p12), [#allocation3], %s2916_s19 }
  0xb2   : > { %2534 = dma.done.wait (%p3255_p2), %s359_s13, 256  }
  0xb3   : > { %2536 = vsyncadd (%p3255_p2), %s359_s13, 4294967040  ;;  %s367_s10 = sand.u32 1, %s2666_s27   ;;  %s2928_s30 = scalar_lea.vmem [#allocation6], %s2916_s19 }
  0xb4   : > { %s368_s14 = scalar_lea.sflag [#allocation7], %s367_s10 }
  0xb5   : > { %2538 = dma.done.wait (%p3255_p2), %s368_s14, 512  }
  0xb6   : > { %2540 = vsyncadd (%p3255_p2), %s368_s14, 4294966784  ;;  %s2935_s11 = scalar_lea.vmem [#allocation8], %s2916_s19  ;;  %s386_s18 = scalar_lea.sflag [#allocation10], %s367_s10 }
  0xb7   : > { %s2938_s0 = scalar_lea.vmem [#allocation9], %s2916_s19 }
  0xb8   : > { %2542 = dma.done.wait (%p3255_p2), %s386_s18, 256  }
  0xb9   : > { %2544 = vsyncadd (%p3255_p2), %s386_s18, 4294967040  ;;  %p3256_p9 = scmp.eq.s32.totalorder %s2666_s27, 0 }
  0xbb   : > { %2546 = dma.done.wait (%p3256_p9), [#allocation10], 32   ;;  %p3257_p5 = pmov %p3256_p9 }
  0xbc   : > { %v469_v0 = vlaneseq  ;;  %v2588_v1 = vmov 0.0   ;;  %v2589_v2 = vmov 1983009808   ;;  %vm451_vm0 = vcmask 130048   ;;  %s2022_s27 = sshll.u32 %s2913_s28, 5  ;;  %s2052_s7 = sshll.u32 %s2571_s24, 8 }
  0xbd   : > { %2548 = vsyncadd (%p3257_p5), [#allocation10], 4294967264  ;;  %2078 = vmatprep.subr.mxu0 %v2588_v1  ;;  %2083 = vmatprep.subr.mxu1 %v2588_v1  ;;  %v503_v3 = vunpack.c.l.s4 %v2589_v2  ;;  %vm2590_vm1 = vmmov 0   ;;  %452 = vst.msk [vmem:[#allocation2] sm:$0xff] %vm451_vm0, %v2588_v1  ;;  %v2591_v6 = vmov 1966171168   ;;  %s3102_s20 = scalar_lea.hbm %s3215_s5, %s2052_s7 }
  0xbe   : > { %2080 = vmatprep.mubr.msk.f32.mxu0 %vm2590_vm1, %v2588_v1  ;;  %2085 = vmatprep.mubr.msk.f32.mxu1 %vm2590_vm1, %v2588_v1  ;;  %453 = vst.msk [vmem:[#allocation2 + $0x8] sm:$0xff] %vm451_vm0, %v2588_v1  ;;  %454 = vst.msk [vmem:[#allocation2 + $0x10] sm:$0xff] %vm451_vm0, %v2588_v1  ;;  %v2963_v4 = vshrl.u32 %v469_v0, 7  ;;  %v467_v7 = vunpack.c.l.s4 %v2591_v6  ;;  %v2592_v8 = vmov 1934713408   ;;  %v3002_v56 = vand.u32 127, %v469_v0 }
  0xbf   : > { %455 = vst.msk [vmem:[#allocation2 + $0x18] sm:$0xff] %vm451_vm0, %v2588_v1  ;;  %v504_v5 = vunpack.c.0.s8 %v503_v3  ;;  %v535_v9 = vunpack.c.l.s4 %v2592_v8  ;;  %v2287_v14 = vld.sshfl [vmem:[%s2938_s0] sm:$0xf pattern:$0x76325410]  ;;  %vm736_vm3 = vcmask 64512  }
  0xc0   : > { %v1071_v10 = vsub.s32 0, %v2963_v4  ;;  %v468_v12 = vunpack.c.0.s8 %v467_v7  ;;  %v2288_v15 = vld.sshfl [vmem:[%s2938_s0 + $0x2] sm:$0xf pattern:$0x76325410]  ;;  %vm484_vm2 = vcmp.ge.s32.totalorder %v2963_v4, %v3002_v56  ;;  %v1467_v6 = vsub.s32 7, %v2963_v4 }
  0xc1   : > { %v2967_v11 = vsub.s32 %v504_v5, %v2963_v4  ;;  %v536_v13 = vunpack.c.0.s8 %v535_v9  ;;  %v2289_v16 = vld.sshfl [vmem:[%s2938_s0 + $0x8] sm:$0xf pattern:$0x76325410]  ;;  %v710_v21 = vcombine.low %v2287_v14, %v2288_v15  ;;  %v2024_v0 = vsel %vm484_vm2, 1.0, %v2588_v1  ;;  %s434_s4 = scalar_lea.vmem [#allocation12], %s2916_s19 }
  0xc2   : > { %v2290_v17 = vld.sshfl [vmem:[%s2938_s0 + $0xa] sm:$0xf pattern:$0x76325410]  ;;  %v471_v19 = vsub.s32 %v468_v12, %v2963_v4  ;;  %v894_v7 = vsub.s32 4, %v2963_v4  ;;  %vm488_vm4 = vcmp.eq.s32.totalorder %v2963_v4, %v3002_v56  ;;  %vm487_vm5 = vcmp.gt.s32.totalorder %v2963_v4, %v3002_v56  ;;  %s1777_s12 = sshll.u32 %s434_s4, 4  ;;  %s3104_s12 = int_to_ptr.vmem [resolvable:$true] %s1777_s12 }
  0xc3   : > { %v2023_v18 = vld.sshfl [vmem:[#allocation11] sm:$0x11 pattern:$0x75316420]  ;;  %v2975_v20 = vsub.s32 %v536_v13, %v2963_v4  ;;  %v718_v22 = vcombine.low %v2289_v16, %v2290_v17  ;;  %vm1456_vm6 = vcmask 123904   ;;  %s2053_s29 = sshll.u32 %s2571_s24, 9 }
  0xc4   : > { %v2291_v23 = vld.sshfl [vmem:[%s2935_s11] sm:$0xf pattern:$0x76325410]  ;;  %v465_v25 = vcombine.high %v2023_v18, %v2023_v18  ;;  %v472_v26 = vrot.slane %v2023_v18, %v471_v19  ;;  %s3115_s15 = scalar_lea.vmem [#allocation13], %s2022_s27  ;;  %s1757_s25 = scalar_lea.sflag [#allocation5], %s2913_s28 }
  0xc5   : > { %v2292_v24 = vld.sshfl [vmem:[%s2935_s11 + $0x2] sm:$0xf pattern:$0x76325410]  ;;  %v717_v29 = vrot.slane %v710_v21, %v2975_v20  ;;  %v725_v30 = vrot.slane %v718_v22, %v2975_v20  ;;  %s1793_s1 = sshll.u32 %s3115_s15, 4  ;;  %s2453_s19 = scalar_lea.vmem %s3104_s12, 256  ;;  %s3155_s1 = int_to_ptr.vmem [resolvable:$true] %s1793_s1 }
  0xc6   : > { %v2293_v27 = vld.sshfl [vmem:[%s2935_s11 + $0x8] sm:$0xf pattern:$0x76325410]  ;;  %v533_v33 = vcombine.low %v2291_v23, %v2292_v24  ;;  %v479_v36 = vrot.slane %v465_v25, %v471_v19  ;;  %v1072_v40 = vrot.slane %v472_v26, %v1071_v10  ;;  %p2454_p11 = scmp.ne.s32.totalorder %s3104_s12, %s2453_s19  ;;  %p3258_p1 = scmp.ne.s32.totalorder %s3235_s8, 0 }
  0xc7   : > { %v2294_v28 = vld.sshfl [vmem:[%s2935_s11 + $0xa] sm:$0xf pattern:$0x76325410]  ;;  %v726_v31 = vcombine.low %v717_v29, %v725_v30  ;;  %v727_v32 = vcombine.high %v717_v29, %v725_v30  ;;  %s2594_s13 = smov [#allocation12]  }
  0xc8   : > { %v2295_v34 = vld.sshfl [vmem:[%s2920_s16] sm:$0xf pattern:$0x76325410]  ;;  %v541_v37 = vcombine.low %v2293_v27, %v2294_v28  ;;  %v540_v43 = vrot.slane %v533_v33, %v2975_v20  ;;  %v1076_v45 = vrot.slane %v479_v36, %v1071_v10  ;;  %p2455_p10 = pnand %p2454_p11, %p3258_p1 }
  0xc9   : > { %v2296_v35 = vld.sshfl [vmem:[%s2920_s16 + $0x2] sm:$0xf pattern:$0x76325410]  ;;  %v728_v41 = vmul.f32 1.442695, %v726_v31 }
  0xca   : > { %v2297_v38 = vld.sshfl [vmem:[%s2920_s16 + $0x8] sm:$0xf pattern:$0x76325410]  ;;  %v730_v42 = vmul.f32 1.442695, %v727_v32  ;;  %v548_v44 = vrot.slane %v541_v37, %v2975_v20  ;;  %v592_v47 = vcombine.low %v2295_v34, %v2296_v35  ;;  %p2456_p0 = pneg %p2455_p10 }
  0xcb   : > { %v2298_v39 = vld.sshfl [vmem:[%s2920_s16 + $0xa] sm:$0xf pattern:$0x76325410]  ;;  %2263 = vpow2.f32 %v728_v41  ;;  %s2457_s16 = sshll.u32 %s2594_s13, 4  ;;  %s2458_s16 = int_to_ptr.vmem [resolvable:$false] %s2457_s16 }
  0xcc   : > { %2265 = vpow2.f32 %v730_v42  ;;  %v2989_v46 = vcombine.low %v540_v43, %v548_v44  ;;  %v600_v48 = vcombine.low %v2297_v38, %v2298_v39  ;;  %v2991_v49 = vcombine.high %v540_v43, %v548_v44  ;;  %s2459_s10 = scalar_lea.vmem %s2458_s16, 512  ;;  %p2460_p7 = scmp.lt.s32.totalorder %s3104_s12, %s2458_s16 }
  0xcd   : > { %v599_v50 = vrot.slane %v592_v47, %v2975_v20  ;;  %p2461_p8 = scmp.lt.s32.totalorder %s2459_s10, %s2453_s19 }
  0xce   : > { %v607_v51 = vrot.slane %v600_v48, %v2975_v20  ;;  %v1079_v52 = vmul.f32 %v1072_v40, %v2989_v46  ;;  %v1080_v53 = vmul.f32 %v1076_v45, %v2991_v49 }
  0xcf   : > { %p2462_p3 = por %p2461_p8, %p2460_p7 }
  0xd0   : > { %v2997_v54 = vcombine.low %v599_v50, %v607_v51  ;;  %v2999_v55 = vcombine.high %v599_v50, %v607_v51 }
  0xd1   : > { %p2463_p13 = pnand %p2462_p3, %p2456_p0 }
  0xd2   : > { %v1081_v57 = vmul.f32 %v1079_v52, %v2997_v54  ;;  %v1082_v58 = vmul.f32 %v1080_v53, %v2999_v55  ;;  %v2299_v52 = vld.sshfl [vmem:[%s2928_s30] sm:$0xf pattern:$0x76325410] }
  0xd3   : > { %v2300_v53 = vld.sshfl [vmem:[%s2928_s30 + $0x2] sm:$0xf pattern:$0x76325410] }
  0xd4   : > { %v1083_v59 = vsel %vm451_vm0, %v1081_v57, 0.0  ;;  %v1086_v63 = vsel %vm451_vm0, %v1082_v58, 0.0  ;;  %v651_v57 = vcombine.low %v2299_v52, %v2300_v53 }
  0xd5   : > { %v2264_v60 = vpop.eup %2263  ;;  %1084 = vadd.xlane.f32.xlu0 %v1083_v59 }
  0xd6   : > { %v2266_v61 = vpop.eup %2265  ;;  %v732_v62 = vsub.f32 0.0, %v2264_v60  ;;  %v658_v59 = vrot.slane %v651_v57, %v2975_v20 }
  0xd7   : > { %v733_v2 = vsub.f32 0.0, %v2266_v61 }
  0xd8   : > { %v734_v3 = vmax.f32 %v732_v62, -5.2983174 }
  0xd9   : > { %v735_v5 = vmax.f32 %v733_v2, -5.2983174  ;;  %1087 = vadd.xlane.f32.xlu0 %v1086_v63  ;;  %v2593_v63 = vmov 0.0|0.0  }
  0xda   : > { %2079 = vmatpush3.msra.mxu0 %v734_v3 }
  0xdb   : > { %2084 = vmatpush3.msra.mxu1 %v735_v5  ;;  %2081 = vmatmul.mubr.msk.f32.vlgmr.msra.gmra.mrb[0].mxu0 %vm736_vm3, %v2024_v0 }
  0xdc   : > { %2086 = vmatmul.mubr.msk.f32.vlgmr.msra.gmra.mrb[0].mxu1 %vm736_vm3, %v2024_v0  ;;  %2088 = vmatprep.subr.mxu0 %v2588_v1 }
  0xdd   : > { %2093 = vmatprep.subr.mxu1 %v2588_v1  ;;  %2090 = vmatprep.mubr.msk.f32.mxu0 %vm2590_vm1, %v2588_v1 }
  0xde   : > { %2095 = vmatprep.mubr.msk.f32.mxu1 %vm2590_vm1, %v2588_v1 }
 0x1ae   : > { %v806_v8 = vpop.f32.mrb[0].mxu0 }
 0x1af   : > { %v3021_v9 = vsub.f32 %v806_v8, %v734_v3  ;;  %v1468_v10 = vrot.slane %v806_v8, %v1467_v6  ;;  %v1707_v12 = vmul.f32 1.442695, %v806_v8  ;;  %v876_v13 = vpop.f32.mrb[0].mxu1  ;;  %v2082_v14 = vpop.f32.mrb[1].mxu0 }
 0x1b0   : > { %v3023_v15 = vsub.f32 %v876_v13, %v735_v5  ;;  %v1472_v16 = vrot.slane %v876_v13, %v1467_v6  ;;  %v1709_v17 = vmul.f32 1.442695, %v876_v13  ;;  %v2087_v18 = vpop.f32.mrb[1].mxu1  ;;  %v1085_v3 = vpop.xlane.xlu0 %1084  ;;  %v2025_v5 = vsel %vm488_vm4, 1.0, %v2588_v1 }
 0x1b1   : > { %v895_v19 = vrot.slane %v3021_v9, %v894_v7  ;;  %v1473_v21 = vsub.f32 %v1468_v10, %v806_v8  ;;  %2267 = vpow2.f32 %v1707_v12  ;;  %v886_v2 = vmul.f32 1.442695, %v3021_v9  ;;  %v882_v12 = vld [vmem:[#allocation2] sm:$0xff]  ;;  %v885_v18 = vld [vmem:[#allocation2 + $0x18] sm:$0xff] }
 0x1b2   : > { %v899_v22 = vrot.slane %v3023_v15, %v894_v7  ;;  %v1474_v23 = vsub.f32 %v1472_v16, %v876_v13  ;;  %2269 = vpow2.f32 %v1709_v17  ;;  %v888_v0 = vmul.f32 1.442695, %v3023_v15  ;;  %v884_v17 = vld [vmem:[#allocation2 + $0x10] sm:$0xff] }
 0x1b3   : > { %v900_v24 = vsub.f32 %v3021_v9, %v895_v19  ;;  %v908_v25 = vsub.f32 %v895_v19, %v806_v8  ;;  %v1475_v26 = vmul.f32 1.442695, %v1473_v21  ;;  %v1093_v8 = vmul.f32 %v2025_v5, %v1085_v3 }
 0x1b4   : > { %v901_v27 = vsub.f32 %v3023_v15, %v899_v22  ;;  %v909_v28 = vsub.f32 %v899_v22, %v876_v13  ;;  %v1477_v29 = vmul.f32 1.442695, %v1474_v23  ;;  %v883_v13 = vld [vmem:[#allocation2 + $0x8] sm:$0xff]  ;;  %v2136_v22 = vpack.c.bf16 %v885_v18, %v884_v17 }
 0x1b5   : > { %v902_v30 = vmul.f32 1.442695, %v900_v24  ;;  %v910_v31 = vmul.f32 1.442695, %v908_v25  ;;  %2271 = vpow2.f32 %v1475_v26  ;;  %v2133_v14 = vpack.c.bf16 %v883_v13, %v882_v12 }
 0x1b6   : > { %v912_v32 = vmul.f32 1.442695, %v909_v28  ;;  %v904_v33 = vmul.f32 1.442695, %v901_v27  ;;  %2273 = vpow2.f32 %v1477_v29 }
 0x1b7   : > { %2275 = vpow2.f32 %v910_v31 }
 0x1b8   : > { %2277 = vpow2.f32 %v902_v30 }
 0x1b9   : > { %2279 = vpow2.f32 %v912_v32 }
 0x1ba   : > { %2281 = vpow2.f32 %v904_v33 }
 0x1bb   : > { %v2268_v34 = vpop.eup %2267  ;;  %2283 = vpow2.f32 %v886_v2 }
 0x1bc   : > { %v1714_v35 = vrot.slane %v2268_v34, %v1467_v6  ;;  %v2270_v36 = vpop.eup %2269  ;;  %2285 = vpow2.f32 %v888_v0 }
 0x1bd   : > { %v1725_v39 = vrot.slane %v2270_v36, %v1467_v6  ;;  %v1088_v6 = vpop.xlane.xlu0 %1087 }
 0x1be   : > { %1716 = vbcast.lane.b32.xlu0 %v1714_v35, 256  ;;  %v1094_v10 = vmul.f32 %v2025_v5, %v1088_v6 }
 0x1bf   : > { %v2272_v37 = vpop.eup %2271 }
 0x1c0   : > { %v1479_v38 = vmul.f32 %v2272_v37, %v2997_v54  ;;  %v2274_v40 = vpop.eup %2273 }
 0x1c1   : > { %v2276_v41 = vpop.eup %2275  ;;  %v1480_v48 = vmul.f32 %v2274_v40, %v2999_v55 }
 0x1c2   : > { %1481 = vxpose.xlu1.b32.start.end [1/1] (short) (narrow) %v1479_v38, 16  ;;  %1727 = vbcast.lane.b32.xlu0 %v1725_v39, 256  ;;  %v2278_v42 = vpop.eup %2277  ;;  %v914_v43 = vmul.f32 %v2276_v41, %v2997_v54  ;;  %v2301_v54 = vld.sshfl [vmem:[%s2928_s30 + $0x8] sm:$0xf pattern:$0x76325410] }
 0x1c3   : > { %v2280_v44 = vpop.eup %2279  ;;  %v906_v50 = vmul.f32 %v2278_v42, %v2989_v46 }
 0x1c4   : > { %v2282_v45 = vpop.eup %2281  ;;  %2089 = vmatpush3.xpose.msk.msra.mxu0 %vm451_vm0, %v914_v43  ;;  %v915_v47 = vmul.f32 %v2280_v44, %v2999_v55  ;;  %v2302_v55 = vld.sshfl [vmem:[%s2928_s30 + $0xa] sm:$0xf pattern:$0x76325410] }
 0x1c5   : > { %2098 = vmatprep.subr.mxu0 %v2588_v1  ;;  %v907_v51 = vmul.f32 %v2282_v45, %v2991_v49  ;;  %v659_v58 = vcombine.low %v2301_v54, %v2302_v55  ;;  %v2284_v27 = vpop.eup %2283 }
 0x1c6   : > { %1731 = vbcast.lane.b32.xlu0 %v1725_v39, 264  ;;  %2094 = vmatpush3.xpose.msk.msra.mxu1 %vm451_vm0, %v915_v47  ;;  %v2286_v4 = vpop.eup %2285  ;;  %v890_v56 = vmul.f32 %v2284_v27, %v2989_v46 }
 0x1c7   : > { %1594 = vxpose.xlu1.b32.start.end [1/1] (short) (narrow) %v1480_v48, 16  ;;  %2091 = vmatmul.mubr.msk.f32.vlgmr.msra.gmra.mrb[2].mxu0 %vm451_vm0, %v906_v50  ;;  %v666_v60 = vrot.slane %v659_v58, %v2975_v20  ;;  %v891_v29 = vmul.f32 %v2286_v4, %v2991_v49 }
 0x1c8   : > { %2103 = vmatprep.subr.mxu1 %v2588_v1  ;;  %2100 = vmatprep.mubr.msk.f32.mxu0 %vm2590_vm1, %v2588_v1 }
 0x1c9   : > { %2096 = vmatmul.mubr.msk.f32.vlgmr.msra.gmra.mrb[2].mxu1 %vm451_vm0, %v907_v51  ;;  %v667_v61 = vcombine.low %v658_v59, %v666_v60  ;;  %v668_v62 = vcombine.high %v658_v59, %v666_v60 }
 0x1ca   : > { %2105 = vmatprep.mubr.msk.f32.mxu1 %vm2590_vm1, %v2588_v1 }
 0x1cb   : > { %2099 = vmatpush3.msra.mxu0 %v667_v61  ;;  %2104 = vmatpush3.msra.mxu1 %v668_v62 }
 0x1cc   : > { %2132 = vmatprep.subr.bf16.mxu0 %v2593_v63  ;;  %2135 = vmatprep.subr.bf16.mxu1 %v2593_v63 }
 0x1e9   : > { %1720 = vbcast.lane.b32.xlu1 %v1714_v35, 264 }
 0x230   : > { %v1717_v31 = vpop.permute.xlu0 %1716 }
 0x231   : > { %v1733_v43 = vmul.f32 %v1717_v31, %v882_v12 }
 0x234   : > { %v1728_v46 = vpop.permute.xlu0 %1727 }
 0x235   : > { %v1735_v52 = vmul.f32 %v1728_v46, %v884_v17 }
 0x238   : > { %v1732_v37 = vpop.permute.xlu0 %1731 }
 0x239   : > { %v1736_v53 = vmul.f32 %v1732_v37, %v885_v18 }
 0x242   : > { %v1497_v7 = vpop.trf.xlu1 }
 0x246   : > { %v1498_v26 = vpop.trf.xlu1 }
 0x24a   : > { %v1610_v28 = vpop.trf.xlu1 }
 0x24e   : > { %v1611_v30 = vpop.trf.xlu1 }
 0x25b   : > { %v1721_v32 = vpop.permute.xlu1 %1720 }
 0x25c   : > { %v1734_v38 = vmul.f32 %v1721_v32, %v883_v13 }
 0x29a   : > { %v989_v9 = vpop.f32.mrb[2].mxu0 }
 0x29b   : > { %v1091_v16 = vsel %vm487_vm5, %v989_v9, 0.0  ;;  %v2092_v15 = vpop.f32.mrb[3].mxu0 }
 0x29c   : > { %v1095_v19 = vadd.f32 %v1093_v8, %v1091_v16  ;;  %v1065_v21 = vpop.f32.mrb[2].mxu1 }
 0x29d   : > { %v1092_v23 = vsel %vm487_vm5, %v1065_v21, 0.0  ;;  %v2097_v24 = vpop.f32.mrb[3].mxu1 }
 0x29e   : > { %v1096_v25 = vadd.f32 %v1094_v10, %v1092_v23  ;;  %2101 = vmatmul.mubr.msk.f32.vlgmr.msra.gmra.mrb[4].mxu0 %vm736_vm3, %v1095_v19 }
 0x29f   : > { %2134 = vmatpush3.bf16.msra.mxu0 %v2133_v14  ;;  %2112 = vmatprep.mubr.msk.f32.mxu0 %vm2590_vm1, %v2588_v1 }
 0x2a0   : > { %2106 = vmatmul.mubr.msk.f32.vlgmr.msra.gmra.mrb[4].mxu1 %vm736_vm3, %v1096_v25  ;;  %2122 = vmatprep.subr.mxu0 %v667_v61 }
 0x2a1   : > { %2137 = vmatpush3.bf16.msra.mxu1 %v2136_v22  ;;  %2119 = vmatprep.mubr.msk.f32.mxu1 %vm2590_vm1, %v2588_v1 }
 0x2a2   : > { %2127 = vmatprep.subr.mxu1 %v668_v62 }
 0x2a6   : > { %2113 = vmatmul.mubr.msk.f32.vlgmr.msra.gmra.mrb[4].mxu0 %vm451_vm0, %v890_v56 }
 0x2a7   : > { %2123 = vmatpush3.msra.mxu0 %v667_v61  ;;  %2124 = vmatprep.mubr.msk.f32.mxu0 %vm736_vm3, %v1497_v7 }
 0x2a8   : > { %2120 = vmatmul.mubr.msk.f32.vlgmr.msra.gmra.mrb[4].mxu1 %vm451_vm0, %v891_v29 }
 0x2a9   : > { %2128 = vmatpush3.msra.mxu1 %v668_v62  ;;  %2129 = vmatprep.mubr.msk.f32.mxu1 %vm736_vm3, %v1610_v28 }
 0x2aa   : > { %2125 = vmatmul.mubr.msk.f32.vlgmr.msra.gmra.mrb[6].mxu0 %vm736_vm3, %v1498_v26 }
 0x2ac   : > { %2130 = vmatmul.mubr.msk.f32.vlgmr.msra.gmra.mrb[6].mxu1 %vm736_vm3, %v1611_v30 }
 0x379   : > { %v1312_v33 = vpop.f32.mrb[4].mxu0 }
 0x37a   : > { %v1389_v34 = vcombine.high %v1312_v33, %v2588_v1  ;;  %v1396_v49 = vrot.slane %v1312_v33, %v2967_v11  ;;  %v2114_v35 = vpop.f32.mrb[5].mxu0 }
 0x37b   : > { %v1385_v36 = vpop.f32.mrb[4].mxu1 }
 0x37c   : > { %v1403_v39 = vrot.slane %v1389_v34, %v2967_v11  ;;  %v1404_v40 = vcombine.high %v1385_v36, %v2588_v1  ;;  %v1411_v41 = vrot.slane %v1385_v36, %v2967_v11  ;;  %v2121_v42 = vpop.f32.mrb[5].mxu1 }
 0x37d   : > { %v2126_v44 = vpop.f32.mrb[6].mxu0 }
 0x37e   : > { %v1418_v45 = vrot.slane %v1404_v40, %v2967_v11  ;;  %v1419_v47 = vcombine.low %v1396_v49, %v1411_v41  ;;  %v1420_v48 = vcombine.high %v1396_v49, %v1411_v41  ;;  %v1738_v50 = vadd.f32 %v2126_v44, %v1734_v38  ;;  %v1585_v51 = vpop.f32.mrb[7].mxu0 }
 0x37f   : > { %v2131_v54 = vpop.f32.mrb[6].mxu1  ;;  %v1737_v55 = vadd.f32 %v1733_v43, %v1585_v51 }
 0x380   : > { %v1427_v57 = vrot.slane %v1419_v47, %v2975_v20  ;;  %v1434_v58 = vrot.slane %v1420_v48, %v2975_v20  ;;  %v1435_v59 = vcombine.low %v1403_v39, %v1418_v45  ;;  %v1436_v60 = vcombine.high %v1403_v39, %v1418_v45  ;;  %1742 = vst.msk [vmem:[#allocation2 + $0x8] sm:$0xff] %vm451_vm0, %v1738_v50  ;;  %v1698_v11 = vpop.f32.mrb[7].mxu1 }
 0x381   : > { %v1740_v61 = vadd.f32 %v2131_v54, %v1736_v53  ;;  %1741 = vst.msk [vmem:[#allocation2] sm:$0xff] %vm451_vm0, %v1737_v55  ;;  %v1739_v62 = vadd.f32 %v1735_v52, %v1698_v11 }
 0x382   : > { %v1443_v63 = vrot.slane %v1435_v59, %v2975_v20  ;;  %v1450_v2 = vrot.slane %v1436_v60, %v2975_v20  ;;  %v1451_v3 = vcombine.high %v1427_v57, %v2588_v1  ;;  %v1452_v0 = vcombine.high %v1434_v58, %v2588_v1  ;;  %1457 = vst.msk [vmem:[%s434_s4] sm:$0x3] %vm1456_vm6, %v1427_v57 }
 0x383   : > { %1459 = vst.msk [vmem:[%s434_s4 + $0x4] sm:$0x3] %vm1456_vm6, %v1434_v58 }
 0x384   : > { %1744 = vst.msk [vmem:[#allocation2 + $0x18] sm:$0xff] %vm451_vm0, %v1740_v61  ;;  %1743 = vst.msk [vmem:[#allocation2 + $0x10] sm:$0xff] %vm451_vm0, %v1739_v62  ;;  %v1453_v20 = vcombine.high %v1443_v63, %v2588_v1  ;;  %v1454_v5 = vcombine.high %v1450_v2, %v2588_v1 }
 0x385   : > { %1458 = vst.msk [vmem:[%s434_s4 + $0x2] sm:$0x3] %vm1456_vm6, %v1451_v3  ;;  %1460 = vst.msk [vmem:[%s434_s4 + $0x6] sm:$0x3] %vm1456_vm6, %v1452_v0 }
 0x386   : > { %1461 = vst.msk [vmem:[%s434_s4 + $0x8] sm:$0x3] %vm1456_vm6, %v1443_v63  ;;  %1463 = vst.msk [vmem:[%s434_s4 + $0xc] sm:$0x3] %vm1456_vm6, %v1450_v2 }
 0x387   : > { %1462 = vst.msk [vmem:[%s434_s4 + $0xa] sm:$0x3] %vm1456_vm6, %v1453_v20  ;;  %1464 = vst.msk [vmem:[%s434_s4 + $0xe] sm:$0x3] %vm1456_vm6, %v1454_v5 }
 0x388   : > { %2466 = shalt.err (!%p2463_p13)
}
 0x389   : > { %s2467_s14 = scalar_lea.hbm %s3102_s20, 256  ;;  %s2471_s18 = scalar_lea.hbm %s3215_s5, 512 }
 0x38a   : > { %p2468_p6 = scmp.ne.s32.totalorder %s3102_s20, %s2467_s14  ;;  %p2472_p2 = scmp.lt.u32.totalorder %s3102_s20, %s3215_s5 }
 0x38b   : > { %p2473_p9 = scmp.lt.u32.totalorder %s2471_s18, %s2467_s14  ;;  %p2475_p11 = scmp.lt.u32.totalorder %s2467_s14, %s3102_s20 }
 0x38c   : > { %p2469_p4 = pnand %p2468_p6, %p3258_p1 }
 0x38d   : > { %p2474_p5 = por %p2473_p9, %p2472_p2 }
 0x38e   : > { %p2470_p12 = pneg %p2469_p4 }
 0x38f   : > { %p2476_p10 = por %p2475_p11, %p2474_p5 }
 0x391   : > { %p2477_p0 = pnand %p2476_p10, %p2470_p12 }
 0x393   : > { %2480 = shalt.err (!%p2477_p0)
}
 0x394   : > { %s2595_s7 = smov 32   ;;  %s2596_s4 = smov 2   ;;  %v1749_v1 = vld [vmem:[#allocation2 + $0x8] sm:$0xff]  ;;  %v1748_v6 = vld [vmem:[#allocation2] sm:$0xff]  ;;  %v1750_v7 = vld [vmem:[#allocation2 + $0x10] sm:$0xff] }
 0x395   : > { %2154 = dma.vmem_to_hbm [thread:$0]  (%p3258_p1), %s3104_s12, 256, %s3102_s20, %s1757_s25, %s2595_s7, %s2595_s7, %s2596_s4   ;;  %v1751_v8 = vld [vmem:[#allocation2 + $0x18] sm:$0xff] }
 0x396   : > { %1753 = vst.msk [vmem:[%s3115_s15 + $0x8] sm:$0xff] %vm451_vm0, %v1749_v1  ;;  %s3151_s19 = scalar_lea.hbm %s3216_s6, %s2053_s29  ;;  %1752 = vst.msk [vmem:[%s3115_s15] sm:$0xff] %vm451_vm0, %v1748_v6  ;;  %s1762_s24 = scalar_lea.sflag [#allocation14], %s2913_s28 }
 0x397   : > { %1754 = vst.msk [vmem:[%s3115_s15 + $0x10] sm:$0xff] %vm451_vm0, %v1750_v7  ;;  %1755 = vst.msk [vmem:[%s3115_s15 + $0x18] sm:$0xff] %vm451_vm0, %v1751_v8  ;;  %s2481_s12 = scalar_lea.vmem %s3155_s1, 512  ;;  %s2597_s20 = smov [#allocation13]  }
 0x398   : > { %p2482_p7 = scmp.ne.s32.totalorder %s3155_s1, %s2481_s12  ;;  %s2485_s29 = sshll.u32 %s2597_s20, 4  ;;  %s2486_s29 = int_to_ptr.vmem [resolvable:$false] %s2485_s29 }
 0x399   : > { %s2487_s25 = scalar_lea.vmem %s2486_s29, 1024  ;;  %p2488_p13 = scmp.lt.s32.totalorder %s3155_s1, %s2486_s29 }
 0x39a   : > { %p2483_p8 = pnand %p2482_p7, %p3258_p1  ;;  %p2489_p6 = scmp.lt.s32.totalorder %s2487_s25, %s2481_s12 }
 0x39c   : > { %p2484_p3 = pneg %p2483_p8  ;;  %p2490_p4 = por %p2489_p6, %p2488_p13 }
 0x39e   : > { %p2491_p12 = pnand %p2490_p4, %p2484_p3 }
 0x3a0   : > { %2494 = shalt.err (!%p2491_p12)
}
 0x3a1   : > { %s2495_s15 = scalar_lea.hbm %s3151_s19, 512  ;;  %s2499_s10 = scalar_lea.hbm %s3216_s6, 1024 }
 0x3a2   : > { %p2496_p2 = scmp.ne.s32.totalorder %s3151_s19, %s2495_s15  ;;  %p2500_p11 = scmp.lt.u32.totalorder %s3151_s19, %s3216_s6 }
 0x3a3   : > { %p2501_p10 = scmp.lt.u32.totalorder %s2499_s10, %s2495_s15  ;;  %p2503_p7 = scmp.lt.u32.totalorder %s2495_s15, %s3151_s19 }
 0x3a4   : > { %p2497_p9 = pnand %p2496_p2, %p3258_p1 }
 0x3a5   : > { %p2502_p0 = por %p2501_p10, %p2500_p11 }
 0x3a6   : > { %p2498_p5 = pneg %p2497_p9 }
 0x3a7   : > { %p2504_p8 = por %p2503_p7, %p2502_p0 }
 0x3a9   : > { %p2505_p3 = pnand %p2504_p8, %p2498_p5 }
 0x3ab   : > { %2508 = shalt.err (!%p2505_p3)
}
 0x3ac   : > { %s2598_s11 = smov 128   ;;  %s2599_s18 = smov 8  }
 0x3ad   : > { %2155 = dma.vmem_to_hbm [thread:$0]  (%p3258_p1), %s3155_s1, 512, %s3151_s19, %s1762_s24, %s2598_s11, %s2598_s11, %s2599_s18  }
 0x3ae PF: > { %s3259_s0 = sld [smem:[#allocation22_spill]]  ;;  %s1808_s27 = sand.u32 1, %s2559_s21  }
 0x3af   : > { %p3261_p6 = scmp.ge.s32.totalorder %s2579_s26, 2  ;;  %s1809_s7 = scalar_lea.sflag [#allocation5], %s1808_s27 }
 0x3b4   : > { %p3260_p13 = scmp.ne.s32.totalorder %s3259_s0, 0 }
 0x3b6   : > { %p2176_p4 = pnand %p3261_p6, %p3260_p13 }
 0x3b8   : > { %2550 = dma.done.wait (!%p2176_p4), %s1809_s7, 256  }
 0x3b9   : > { %2552 = vsyncadd (!%p2176_p4), %s1809_s7, 4294967040  ;;  %s1818_s4 = scalar_lea.sflag [#allocation14], %s1808_s27 }
 0x3ba   : > { %2554 = dma.done.wait (!%p2176_p4), %s1818_s4, 512  }
 0x3bb   : > { %2556 = vsyncadd (!%p2176_p4), %s1818_s4, 4294966784  ;;  %s32_s26 = sadd.s32 1, %s2579_s26   ;;  %s3262_s8 = sld [smem:[#allocation24_spill]] }
 0x3bc   : > { %p29_p12 = scmp.ge.s32.totalorder %s32_s26, 4   ;;  %s3263_s24 = sld [smem:[#allocation21_spill]] }
 0x3bd   : > { %s3264_s25 = sld [smem:[#allocation23_spill]]  ;;  %s3265_s21 = smov %s2563_s22 }
 0x3be   : > { %s3266_s22 = smov %s2567_s23  ;;  %31 = sbr.rel (!%p29_p12) target bundleno = 16 (0x10), region = 156 }
 0x3c1   : > { %s3267_s23 = smov %s3262_s8 }
 0x3c5   :  { %1823 = vsyncpa [#allocation4], 1 }
 0x3c6   :  { %1825 = vsyncpa [#allocation4 + $0x1], 1 }
 0x3c7   :  { %1826 = vsyncpa [#allocation7], 1 }
 0x3c8   :  { %1828 = vsyncpa [#allocation7 + $0x1], 1 }
 0x3c9   :  { %1829 = vsyncpa [#allocation10], 1 }
 0x3ca   :  { %1831 = vsyncpa [#allocation10 + $0x1], 1 }
 0x3cb   :  { %1832 = vsyncpa [#allocation5], 1 }
 0x3cc   :  { %1834 = vsyncpa [#allocation5 + $0x1], 1 }
 0x3cd   :  { %1835 = vsyncpa [#allocation14], 1 }
 0x3ce   :  { %1837 = vsyncpa [#allocation14 + $0x1], 1 }

// kernel: block_forward.16
= control target key start
LH: loop header
LB: loop body
LE: loop exit
PB: predicated region body
PF: predicated region fallthrough
CT: control target
= control target key end

     0   :  { %7 = vsyncpa [#allocation4], 0  ;;  %s406_s0 = inlined_call_operand.hbm [shape: f32[16,112], index: 0, kind: input, shape index: {}]   ;;  %s407_s1 = inlined_call_operand.hbm [shape: f32[112,32], index: 1, kind: input, shape index: {}]   ;;  %s408_s2 = inlined_call_operand.hbm [shape: f32[16,32], index: 2, kind: output, shape index: {}]  }
   0x1   :  { %8 = vsyncpa [#allocation7], 0 }
   0x2   :  { %9 = vsyncpa [#allocation5], 0  ;;  %s332_s9 = smov [#allocation3]   ;;  %s260_s13 = scalar_lea.hbm %s406_s0, 256 }
   0x3   :  { %s15_s10 = sshll.u32 %s332_s9, 4  ;;  %p261_p0 = scmp.ne.s32.totalorder %s406_s0, %s260_s13  ;;  %s16_s10 = int_to_ptr.vmem [resolvable:$true] %s15_s10 }
   0x4   :  { %p264_p1 = scmp.lt.u32.totalorder %s260_s13, %s406_s0 }
   0x6   :  { %p266_p2 = pnand %p264_p1, %p261_p0 }
   0x8   :  { %269 = shalt.err (!%p266_p2)
}
   0x9   :  { %s270_s18 = scalar_lea.vmem %s16_s10, 256  ;;  %p275_p4 = scmp.lt.s32.totalorder %s16_s10, %s16_s10 }
   0xa   :  { %p271_p3 = scmp.ne.s32.totalorder %s16_s10, %s270_s18  ;;  %p276_p5 = scmp.lt.s32.totalorder %s270_s18, %s270_s18 }
   0xc   :  { %p277_p6 = por %p276_p5, %p275_p4 }
   0xe   :  { %p278_p7 = pnand %p277_p6, %p271_p3 }
  0x10   :  { %281 = shalt.err (!%p278_p7)
}
  0x11   :  { %s333_s19 = smov 128   ;;  %s334_s20 = smov 8  }
  0x12   :  { %21 = dma.hbm_to_vmem [thread:$0]  %s406_s0, 256, %s16_s10, [#allocation4], %s333_s19, %s333_s19, %s334_s20  }
  0x13   :  { %s335_s23 = smov [#allocation6]   ;;  %s282_s27 = scalar_lea.hbm %s407_s1, 1792 }
  0x14   :  { %s27_s24 = sshll.u32 %s335_s23, 4  ;;  %p283_p8 = scmp.ne.s32.totalorder %s407_s1, %s282_s27  ;;  %s28_s24 = int_to_ptr.vmem [resolvable:$true] %s27_s24 }
  0x15   :  { %p286_p9 = scmp.lt.u32.totalorder %s282_s27, %s407_s1 }
  0x17   :  { %p288_p10 = pnand %p286_p9, %p283_p8 }
  0x19   :  { %291 = shalt.err (!%p288_p10)
}
  0x1a   :  { %s292_s4 = scalar_lea.vmem %s28_s24, 1792  ;;  %p297_p12 = scmp.lt.s32.totalorder %s28_s24, %s28_s24 }
  0x1b   :  { %p293_p11 = scmp.ne.s32.totalorder %s28_s24, %s292_s4  ;;  %p298_p13 = scmp.lt.s32.totalorder %s292_s4, %s292_s4 }
  0x1d   :  { %p299_p0 = por %p298_p13, %p297_p12 }
  0x1f   :  { %p300_p1 = pnand %p299_p0, %p293_p11 }
  0x21   :  { %303 = shalt.err (!%p300_p1)
}
  0x22   :  { %33 = dma.hbm_to_vmem [thread:$0]  %s407_s1, 1792, %s28_s24, [#allocation7], %s333_s19, %s333_s19, %s334_s20  }
  0x23   :  { %326 = dma.done.wait [#allocation4], 256  }
  0x24   :  { %327 = vsyncadd [#allocation4], 4294967040 }
  0x25   :  { %328 = dma.done.wait [#allocation7], 1792  }
  0x26   :  { %329 = vsyncadd [#allocation7], 4294965504  ;;  %vm44_vm0 = vcmask 261120   ;;  %v336_v0 = vmov 0.0   ;;  %v51_v1 = vld [vmem:[#allocation6] sm:$0xff]  ;;  %v52_v2 = vld [vmem:[#allocation6 + $0x8] sm:$0xff] }
  0x27   :  { %46 = vst.msk [vmem:[#allocation2 + $0x8] sm:$0xff] %vm44_vm0, %v336_v0  ;;  %45 = vst.msk [vmem:[#allocation2] sm:$0xff] %vm44_vm0, %v336_v0  ;;  %v53_v3 = vld [vmem:[#allocation6 + $0x10] sm:$0xff]  ;;  %v226_v4 = vpack.c.bf16 %v52_v2, %v51_v1  ;;  %v54_v5 = vld [vmem:[#allocation6 + $0x18] sm:$0xff]  ;;  %vm65_vm1 = vcmask 916480   ;;  %s337_s1 = smov [#allocation8]  }
  0x28   :  { %v230_v6 = vpack.c.bf16 %v54_v5, %v53_v3  ;;  %v55_v7 = vld [vmem:[#allocation6 + $0x20] sm:$0xff]  ;;  %v56_v8 = vld [vmem:[#allocation6 + $0x28] sm:$0xff]  ;;  %v47_v9 = vld [vmem:[#allocation3] sm:$0xff]  ;;  %s164_s6 = sshll.u32 %s337_s1, 4  ;;  %s165_s6 = int_to_ptr.vmem [resolvable:$true] %s164_s6 }
  0x29   :  { %227 = vmatprep.subr.bf16.mxu0 %v226_v4  ;;  %v234_v10 = vpack.c.bf16 %v56_v8, %v55_v7  ;;  %223 = vmatprep.mubr.msk.f32.mxu0 %vm65_vm1, %v47_v9  ;;  %v57_v11 = vld [vmem:[#allocation6 + $0x30] sm:$0xff]  ;;  %v58_v12 = vld [vmem:[#allocation6 + $0x38] sm:$0xff]  ;;  %v59_v14 = vld [vmem:[#allocation6 + $0x40] sm:$0xff]  ;;  %s304_s7 = scalar_lea.vmem %s165_s6, 256  ;;  %p309_p3 = scmp.lt.s32.totalorder %s165_s6, %s165_s6 }
  0x2a   :  { %229 = vmatpush3.bf16.msra.mxu0 %v226_v4  ;;  %v238_v13 = vpack.c.bf16 %v58_v12, %v57_v11  ;;  %v60_v15 = vld [vmem:[#allocation6 + $0x48] sm:$0xff]  ;;  %v61_v17 = vld [vmem:[#allocation6 + $0x50] sm:$0xff]  ;;  %v62_v18 = vld [vmem:[#allocation6 + $0x58] sm:$0xff]  ;;  %p305_p2 = scmp.ne.s32.totalorder %s165_s6, %s304_s7  ;;  %p310_p4 = scmp.lt.s32.totalorder %s304_s7, %s304_s7 }
  0x2b   :  { %231 = vmatprep.subr.bf16.mxu0 %v230_v6  ;;  %v242_v16 = vpack.c.bf16 %v60_v15, %v59_v14  ;;  %v246_v19 = vpack.c.bf16 %v62_v18, %v61_v17  ;;  %v63_v20 = vld [vmem:[#allocation6 + $0x60] sm:$0xff]  ;;  %v64_v21 = vld [vmem:[#allocation6 + $0x68] sm:$0xff]  ;;  %v48_v23 = vld [vmem:[#allocation3 + $0x8] sm:$0xff] }
  0x2c   :  { %v250_v22 = vpack.c.bf16 %v64_v21, %v63_v20  ;;  %p311_p5 = por %p310_p4, %p309_p3 }
  0x2e   :  { %233 = vmatpush3.bf16.msra.mxu0 %v230_v6  ;;  %v50_v24 = vld [vmem:[#allocation2 + $0x8] sm:$0xff]  ;;  %v49_v25 = vld [vmem:[#allocation2] sm:$0xff]  ;;  %p312_p6 = pnand %p311_p5, %p305_p2 }
  0x2f   :  { %235 = vmatprep.subr.bf16.mxu0 %v234_v10 }
  0x32   :  { %237 = vmatpush3.bf16.msra.mxu0 %v234_v10 }
  0x33   :  { %239 = vmatprep.subr.bf16.mxu0 %v238_v13 }
  0x36   :  { %241 = vmatpush3.bf16.msra.mxu0 %v238_v13 }
  0x37   :  { %243 = vmatprep.subr.bf16.mxu0 %v242_v16 }
  0x3a   :  { %245 = vmatpush3.bf16.msra.mxu0 %v242_v16 }
  0x3b   :  { %247 = vmatprep.subr.bf16.mxu0 %v246_v19 }
  0x3e   :  { %249 = vmatpush3.bf16.msra.mxu0 %v246_v19 }
  0x3f   :  { %251 = vmatprep.subr.bf16.mxu0 %v250_v22 }
  0x42   :  { %253 = vmatpush3.bf16.msra.mxu0 %v250_v22 }
  0x45   :  { %224 = vmatmul.mubr.msk.f32.vlgmr.msra.gmra.mrb[0].mxu0 %vm65_vm1, %v48_v23 }
 0x118   :  { %v225_v26 = vpop.f32.mrb[0].mxu0 }
 0x119   :  { %v148_v27 = vadd.f32 %v225_v26, %v50_v24  ;;  %v138_v28 = vpop.f32.mrb[1].mxu0 }
 0x11a   :  { %v147_v29 = vadd.f32 %v138_v28, %v49_v25 }
 0x11b   :  { %151 = vst.msk [vmem:[#allocation2 + $0x8] sm:$0xff] %vm44_vm0, %v148_v27 }
 0x11c   :  { %150 = vst.msk [vmem:[#allocation2] sm:$0xff] %vm44_vm0, %v147_v29 }
 0x122   :  { %v156_v30 = vld [vmem:[#allocation2 + $0x8] sm:$0xff] }
 0x123   :  { %v155_v31 = vld [vmem:[#allocation2] sm:$0xff]  ;;  %158 = vst.msk [vmem:[#allocation8 + $0x8] sm:$0xff] %vm44_vm0, %v156_v30 }
 0x124   :  { %157 = vst.msk [vmem:[#allocation8] sm:$0xff] %vm44_vm0, %v155_v31 }
 0x125   :  { %315 = shalt.err (!%p312_p6)
}
 0x126   :  { %s316_s10 = scalar_lea.hbm %s408_s2, 256 }
 0x127   :  { %p317_p7 = scmp.ne.s32.totalorder %s408_s2, %s316_s10  ;;  %p320_p8 = scmp.lt.u32.totalorder %s316_s10, %s408_s2 }
 0x129   :  { %p322_p9 = pnand %p320_p8, %p317_p7 }
 0x12b   :  { %325 = shalt.err (!%p322_p9)
}
 0x12c   :  { %170 = dma.vmem_to_hbm [thread:$0]  %s165_s6, 256, %s408_s2, [#allocation5], %s333_s19, %s333_s19, %s334_s20  }
 0x12d   :  { %330 = dma.done.wait [#allocation5], 256  }
 0x12e   :  { %331 = vsyncadd [#allocation5], 4294967040 }
 0x12f   :  { %174 = vsyncpa [#allocation4], 1 }
 0x130   :  { %175 = vsyncpa [#allocation7], 1 }
 0x131   :  { %176 = vsyncpa [#allocation5], 1 }

// kernel: block_forward.17
= control target key start
LH: loop header
LB: loop body
LE: loop exit
PB: predicated region body
PF: predicated region fallthrough
CT: control target
= control target key end

     0   :  { %11 = vsyncpa [#allocation4], 0  ;;  %s646_s0 = inlined_call_operand.hbm [shape: f32[16,32], index: 0, kind: input, shape index: {}]   ;;  %s647_s1 = inlined_call_operand.hbm [shape: f32[16,32], index: 1, kind: input, shape index: {}]   ;;  %s648_s2 = inlined_call_operand.hbm [shape: f32[1,32], index: 2, kind: input, shape index: {}]   ;;  %s649_s3 = inlined_call_operand.hbm [shape: f32[32,32], index: 3, kind: input, shape index: {}]   ;;  %s650_s4 = inlined_call_operand.hbm [shape: f32[16,32], index: 4, kind: input, shape index: {}]   ;;  %s651_s5 = inlined_call_operand.hbm [shape: f32[16,32], index: 5, kind: input, shape index: {}]   ;;  %s652_s6 = inlined_call_operand.hbm [shape: f32[16,32], index: 6, kind: output, shape index: {}]  }
   0x1   :  { %12 = vsyncpa [#allocation7], 0 }
   0x2   :  { %13 = vsyncpa [#allocation10], 0 }
   0x3   :  { %14 = vsyncpa [#allocation13], 0 }
   0x4   :  { %15 = vsyncpa [#allocation5], 0  ;;  %s477_s21 = smov [#allocation6]   ;;  %s478_s23 = smov [#allocation9]  }
   0x5   :  { %s33_s22 = sshll.u32 %s477_s21, 4  ;;  %s55_s24 = sshll.u32 %s478_s23, 4  ;;  %s34_s22 = int_to_ptr.vmem [resolvable:$true] %s33_s22  ;;  %s522_s24 = int_to_ptr.vmem [resolvable:$true] %s55_s24 }
   0x6   :  { %s313_s27 = scalar_lea.hbm %s647_s1, 256 }
   0x7   :  { %p314_p0 = scmp.ne.s32.totalorder %s647_s1, %s313_s27  ;;  %p317_p1 = scmp.lt.u32.totalorder %s313_s27, %s647_s1 }
   0x9   :  { %p319_p2 = pnand %p317_p1, %p314_p0 }
   0xb   :  { %322 = shalt.err (!%p319_p2)
}
   0xc   :  { %s323_s8 = scalar_lea.vmem %s34_s22, 256  ;;  %p328_p4 = scmp.lt.s32.totalorder %s34_s22, %s34_s22 }
   0xd   :  { %p324_p3 = scmp.ne.s32.totalorder %s34_s22, %s323_s8  ;;  %p329_p5 = scmp.lt.s32.totalorder %s323_s8, %s323_s8 }
   0xf   :  { %p330_p6 = por %p329_p5, %p328_p4 }
  0x11   :  { %p331_p7 = pnand %p330_p6, %p324_p3 }
  0x13   :  { %334 = shalt.err (!%p331_p7)
}
  0x14   :  { %s479_s9 = smov 128   ;;  %s480_s10 = smov 8  }
  0x15   :  { %39 = dma.hbm_to_vmem [thread:$0]  %s647_s1, 256, %s34_s22, [#allocation7], %s479_s9, %s479_s9, %s480_s10  }
  0x16   :  { %s335_s15 = scalar_lea.hbm %s649_s3, 512 }
  0x17   :  { %p336_p8 = scmp.ne.s32.totalorder %s649_s3, %s335_s15  ;;  %p339_p9 = scmp.lt.u32.totalorder %s335_s15, %s649_s3 }
  0x19   :  { %p341_p10 = pnand %p339_p9, %p336_p8 }
  0x1b   :  { %344 = shalt.err (!%p341_p10)
}
  0x1c   :  { %s345_s20 = scalar_lea.vmem %s522_s24, 512  ;;  %p350_p12 = scmp.lt.s32.totalorder %s522_s24, %s522_s24 }
  0x1d   :  { %p346_p11 = scmp.ne.s32.totalorder %s522_s24, %s345_s20  ;;  %p351_p13 = scmp.lt.s32.totalorder %s345_s20, %s345_s20 }
  0x1f   :  { %p352_p0 = por %p351_p13, %p350_p12 }
  0x21   :  { %p353_p1 = pnand %p352_p0, %p346_p11 }
  0x23   :  { %356 = shalt.err (!%p353_p1)
}
  0x24   :  { %61 = dma.hbm_to_vmem [thread:$0]  %s649_s3, 512, %s522_s24, [#allocation10], %s479_s9, %s479_s9, %s480_s10  }
  0x25   :  { %s481_s22 = smov [#allocation3]   ;;  %s482_s25 = smov [#allocation8]  }
  0x26   :  { %s21_s23 = sshll.u32 %s481_s22, 4  ;;  %s46_s26 = sshll.u32 %s482_s25, 4  ;;  %s22_s23 = int_to_ptr.vmem [resolvable:$true] %s21_s23  ;;  %s47_s26 = int_to_ptr.vmem [resolvable:$true] %s46_s26 }
  0x27   :  { %s357_s29 = scalar_lea.hbm %s646_s0, 256 }
  0x28   :  { %p358_p2 = scmp.ne.s32.totalorder %s646_s0, %s357_s29  ;;  %p361_p3 = scmp.lt.u32.totalorder %s357_s29, %s646_s0 }
  0x2a   :  { %p363_p4 = pnand %p361_p3, %p358_p2 }
  0x2c   :  { %366 = shalt.err (!%p363_p4)
}
  0x2d   :  { %s367_s3 = scalar_lea.vmem %s22_s23, 256  ;;  %p372_p6 = scmp.lt.s32.totalorder %s22_s23, %s22_s23 }
  0x2e   :  { %p368_p5 = scmp.ne.s32.totalorder %s22_s23, %s367_s3  ;;  %p373_p7 = scmp.lt.s32.totalorder %s367_s3, %s367_s3 }
  0x30   :  { %p374_p8 = por %p373_p7, %p372_p6 }
  0x32   :  { %p375_p9 = pnand %p374_p8, %p368_p5 }
  0x34   :  { %378 = shalt.err (!%p375_p9)
}
  0x35   :  { %27 = dma.hbm_to_vmem [thread:$0]  %s646_s0, 256, %s22_s23, [#allocation4], %s479_s9, %s479_s9, %s480_s10  }
  0x36   :  { %s379_s15 = scalar_lea.hbm %s648_s2, 16 }
  0x37   :  { %p380_p10 = scmp.ne.s32.totalorder %s648_s2, %s379_s15  ;;  %p383_p11 = scmp.lt.u32.totalorder %s379_s15, %s648_s2 }
  0x39   :  { %p385_p12 = pnand %p383_p11, %p380_p10 }
  0x3b   :  { %388 = shalt.err (!%p385_p12)
}
  0x3c   :  { %s389_s20 = scalar_lea.vmem %s47_s26, 16  ;;  %s393_s1 = scalar_lea.vmem %s47_s26, 32 }
  0x3d   :  { %p390_p13 = scmp.ne.s32.totalorder %s47_s26, %s389_s20  ;;  %p394_p0 = scmp.lt.s32.totalorder %s47_s26, %s47_s26 }
  0x3e   :  { %p395_p1 = scmp.lt.s32.totalorder %s393_s1, %s389_s20 }
  0x40   :  { %p396_p2 = por %p395_p1, %p394_p0 }
  0x42   :  { %p397_p3 = pnand %p396_p2, %p390_p13 }
  0x44   :  { %400 = shalt.err (!%p397_p3)
}
  0x45   :  { %49 = dma.hbm_to_vmem [thread:$0]  %s648_s2, 16, %s47_s26, [#allocation7]  }
  0x46   :  { %s483_s22 = smov [#allocation11]   ;;  %s484_s25 = smov [#allocation12]  }
  0x47   :  { %s67_s23 = sshll.u32 %s483_s22, 4  ;;  %s79_s27 = sshll.u32 %s484_s25, 4  ;;  %s68_s23 = int_to_ptr.vmem [resolvable:$true] %s67_s23  ;;  %s586_s27 = int_to_ptr.vmem [resolvable:$true] %s79_s27 }
  0x48   :  { %s401_s30 = scalar_lea.hbm %s650_s4, 256 }
  0x49   :  { %p402_p4 = scmp.ne.s32.totalorder %s650_s4, %s401_s30  ;;  %p405_p5 = scmp.lt.u32.totalorder %s401_s30, %s650_s4 }
  0x4b   :  { %p407_p6 = pnand %p405_p5, %p402_p4 }
  0x4d   :  { %410 = shalt.err (!%p407_p6)
}
  0x4e   :  { %s411_s2 = scalar_lea.vmem %s68_s23, 256  ;;  %p416_p8 = scmp.lt.s32.totalorder %s68_s23, %s68_s23 }
  0x4f   :  { %p412_p7 = scmp.ne.s32.totalorder %s68_s23, %s411_s2  ;;  %p417_p9 = scmp.lt.s32.totalorder %s411_s2, %s411_s2 }
  0x51   :  { %p418_p10 = por %p417_p9, %p416_p8 }
  0x53   :  { %p419_p11 = pnand %p418_p10, %p412_p7 }
  0x55   :  { %422 = shalt.err (!%p419_p11)
}
  0x56   :  { %73 = dma.hbm_to_vmem [thread:$0]  %s650_s4, 256, %s68_s23, [#allocation10], %s479_s9, %s479_s9, %s480_s10  }
  0x57   :  { %s423_s14 = scalar_lea.hbm %s651_s5, 256 }
  0x58   :  { %p424_p12 = scmp.ne.s32.totalorder %s651_s5, %s423_s14  ;;  %p427_p13 = scmp.lt.u32.totalorder %s423_s14, %s651_s5 }
  0x5a   :  { %p429_p0 = pnand %p427_p13, %p424_p12 }
  0x5c   :  { %432 = shalt.err (!%p429_p0)
}
  0x5d   :  { %s433_s19 = scalar_lea.vmem %s586_s27, 256  ;;  %p438_p2 = scmp.lt.s32.totalorder %s586_s27, %s586_s27 }
  0x5e   :  { %p434_p1 = scmp.ne.s32.totalorder %s586_s27, %s433_s19  ;;  %p439_p3 = scmp.lt.s32.totalorder %s433_s19, %s433_s19 }
  0x60   :  { %p440_p4 = por %p439_p3, %p438_p2 }
  0x62   :  { %p441_p5 = pnand %p440_p4, %p434_p1 }
  0x64   :  { %444 = shalt.err (!%p441_p5)
}
  0x65   :  { %85 = dma.hbm_to_vmem [thread:$0]  %s651_s5, 256, %s586_s27, [#allocation13], %s479_s9, %s479_s9, %s480_s10  }
  0x66   :  { %467 = dma.done.wait [#allocation4], 256  }
  0x67   :  { %468 = vsyncadd [#allocation4], 4294967040 }
  0x68   :  { %469 = dma.done.wait [#allocation7], 272  }
  0x69   :  { %470 = vsyncadd [#allocation7], 4294967024 }
  0x6a   :  { %471 = dma.done.wait [#allocation10], 768  }
  0x6b   :  { %472 = vsyncadd [#allocation10], 4294966528 }
  0x6c   :  { %473 = dma.done.wait [#allocation13], 256  }
  0x6d   :  { %474 = vsyncadd [#allocation13], 4294967040  ;;  %vm108_vm0 = vcmask 261120   ;;  %v485_v0 = vmov 0.0   ;;  %v128_v1 = vld [vmem:[#allocation9] sm:$0xff]  ;;  %v129_v2 = vld [vmem:[#allocation9 + $0x8] sm:$0xff] }
  0x6e   :  { %110 = vst.msk [vmem:[#allocation2 + $0x8] sm:$0xff] %vm108_vm0, %v485_v0  ;;  %109 = vst.msk [vmem:[#allocation2] sm:$0xff] %vm108_vm0, %v485_v0  ;;  %v130_v3 = vld [vmem:[#allocation9 + $0x10] sm:$0xff]  ;;  %v287_v4 = vpack.c.bf16 %v129_v2, %v128_v1  ;;  %v131_v5 = vld [vmem:[#allocation9 + $0x18] sm:$0xff]  ;;  %s486_s5 = smov [#allocation14]  }
  0x6f   :  { %v113_v6 = vld [vmem:[#allocation6] sm:$0xff]  ;;  %v291_v7 = vpack.c.bf16 %v131_v5, %v130_v3  ;;  %v111_v8 = vld [vmem:[#allocation3] sm:$0xff]  ;;  %v114_v9 = vld [vmem:[#allocation6 + $0x8] sm:$0xff]  ;;  %s250_s1 = sshll.u32 %s486_s5, 4  ;;  %s251_s1 = int_to_ptr.vmem [resolvable:$true] %s250_s1 }
  0x70   :  { %v265_v10 = vld [vmem:[#allocation8] ss:$0 sm:$0xff]  ;;  %288 = vmatprep.subr.bf16.mxu0 %v287_v4  ;;  %v112_v13 = vld [vmem:[#allocation3 + $0x8] sm:$0xff]  ;;  %v239_v36 = vld [vmem:[#allocation12] sm:$0xff]  ;;  %s445_s0 = scalar_lea.vmem %s251_s1, 256  ;;  %p450_p7 = scmp.lt.s32.totalorder %s251_s1, %s251_s1 }
  0x71   :  { %v122_v11 = vmul.f32 %v265_v10, %v113_v6  ;;  %v123_v12 = vmul.f32 %v265_v10, %v114_v9  ;;  %290 = vmatpush3.bf16.msra.mxu0 %v287_v4  ;;  %v236_v30 = vld [vmem:[#allocation11 + $0x8] sm:$0xff]  ;;  %v235_v31 = vld [vmem:[#allocation11] sm:$0xff]  ;;  %v240_v33 = vld [vmem:[#allocation12 + $0x8] sm:$0xff]  ;;  %p446_p6 = scmp.ne.s32.totalorder %s251_s1, %s445_s0  ;;  %p451_p8 = scmp.lt.s32.totalorder %s445_s0, %s445_s0 }
  0x72   :  { %292 = vmatprep.subr.bf16.mxu0 %v291_v7 }
  0x73   :  { %v124_v14 = vadd.f32 %v122_v11, %v111_v8  ;;  %v125_v15 = vadd.f32 %v123_v12, %v112_v13  ;;  %p452_p9 = por %p451_p8, %p450_p7 }
  0x75   :  { %284 = vmatprep.mubr.msk.f32.mxu0 %vm108_vm0, %v124_v14  ;;  %294 = vmatpush3.bf16.msra.mxu0 %v291_v7  ;;  %v127_v16 = vld [vmem:[#allocation2 + $0x8] sm:$0xff]  ;;  %v126_v17 = vld [vmem:[#allocation2] sm:$0xff]  ;;  %p453_p10 = pnand %p452_p9, %p446_p6 }
  0x78   :  { %285 = vmatmul.mubr.msk.f32.vlgmr.msra.gmra.mrb[0].mxu0 %vm108_vm0, %v125_v15 }
 0x14b   :  { %v286_v18 = vpop.f32.mrb[0].mxu0 }
 0x14c   :  { %v215_v19 = vadd.f32 %v286_v18, %v127_v16  ;;  %v205_v20 = vpop.f32.mrb[1].mxu0 }
 0x14d   :  { %v214_v21 = vadd.f32 %v205_v20, %v126_v17 }
 0x14e   :  { %217 = vst.msk [vmem:[#allocation2 + $0x8] sm:$0xff] %vm108_vm0, %v215_v19 }
 0x14f   :  { %216 = vst.msk [vmem:[#allocation2] sm:$0xff] %vm108_vm0, %v214_v21 }
 0x155   :  { %v222_v22 = vld [vmem:[#allocation2 + $0x8] sm:$0xff] }
 0x156   :  { %v221_v23 = vld [vmem:[#allocation2] sm:$0xff]  ;;  %v269_v24 = vmul.f32 -1.442695, %v222_v22 }
 0x157   :  { %v268_v25 = vmul.f32 -1.442695, %v221_v23 }
 0x158   :  { %305 = vpow2.f32 %v269_v24 }
 0x159   :  { %307 = vpow2.f32 %v268_v25 }
 0x162   :  { %v306_v26 = vpop.eup %305 }
 0x163   :  { %v308_v27 = vpop.eup %307  ;;  %v230_v28 = vadd.f32 1.0, %v306_v26 }
 0x164   :  { %v229_v29 = vadd.f32 1.0, %v308_v27 }
 0x165   :  { %309 = vrcp.f32 %v230_v28 }
 0x166   :  { %311 = vrcp.f32 %v229_v29 }
 0x16f   :  { %v310_v32 = vpop.eup %309 }
 0x170   :  { %v312_v34 = vpop.eup %311  ;;  %v238_v35 = vmul.f32 %v310_v32, %v236_v30 }
 0x171   :  { %v237_v37 = vmul.f32 %v312_v34, %v235_v31 }
 0x172   :  { %v242_v38 = vadd.f32 %v240_v33, %v238_v35 }
 0x173   :  { %v241_v39 = vadd.f32 %v239_v36, %v237_v37 }
 0x174   :  { %244 = vst.msk [vmem:[#allocation14 + $0x8] sm:$0xff] %vm108_vm0, %v242_v38 }
 0x175   :  { %243 = vst.msk [vmem:[#allocation14] sm:$0xff] %vm108_vm0, %v241_v39 }
 0x176   :  { %456 = shalt.err (!%p453_p10)
}
 0x177   :  { %s457_s23 = scalar_lea.hbm %s652_s6, 256 }
 0x178   :  { %p458_p11 = scmp.ne.s32.totalorder %s652_s6, %s457_s23  ;;  %p461_p12 = scmp.lt.u32.totalorder %s457_s23, %s652_s6 }
 0x17a   :  { %p463_p13 = pnand %p461_p12, %p458_p11 }
 0x17c   :  { %466 = shalt.err (!%p463_p13)
}
 0x17d   :  { %256 = dma.vmem_to_hbm [thread:$0]  %s251_s1, 256, %s652_s6, [#allocation5], %s479_s9, %s479_s9, %s480_s10  }
 0x17e   :  { %475 = dma.done.wait [#allocation5], 256  }
 0x17f   :  { %476 = vsyncadd [#allocation5], 4294967040 }
 0x180   :  { %260 = vsyncpa [#allocation4], 1 }
 0x181   :  { %261 = vsyncpa [#allocation7], 1 }
 0x182   :  { %262 = vsyncpa [#allocation10], 1 }
 0x183   :  { %263 = vsyncpa [#allocation13], 1 }
 0x184   :  { %264 = vsyncpa [#allocation5], 1 }

</bundles_post_ra>
